<compile_context>
chip_gen: v6e
topology: v6e:2x2x1
jax: 0.10.0
libtpu: 0.0.40
codegen_flags: <defaults>
</compile_context>

<pallas_src>
import functools

import numpy as np
import jax
import jax.numpy as jnp
from jax import lax
from jax.experimental import pallas as pl
from jax.experimental.pallas import tpu as pltpu


# ----------------------------------------------------------------------------
# Static geometry of the pipeline for an (H, W) input image.
# ----------------------------------------------------------------------------
def _geometry(H, W):
    H1, W1 = 2 * H, 2 * W                 # after nearest x2 upsample
    Hp1, Wp1 = H1 + 2, W1 + 2             # up_conv: 3x3, pad=1
    Ho1, Wo1 = H1, W1
    Hp2, Wp2 = Ho1 + 4, Wo1 + 4           # conv1 (transpose) == 3x3 conv, pad=2
    Ho2, Wo2 = Ho1 + 2, Wo1 + 2
    Hp3, Wp3 = Ho2 + 4, Wo2 + 4           # conv2 (transpose) == 3x3 conv, pad=2
    Ho3, Wo3 = Ho2 + 2, Wo2 + 2
    g = dict(H=H, W=W, H1=H1, W1=W1,
             Hp1=Hp1, Wp1=Wp1, Ho1=Ho1, Wo1=Wo1,
             Hp2=Hp2, Wp2=Wp2, Ho2=Ho2, Wo2=Wo2,
             Hp3=Hp3, Wp3=Wp3, Ho3=Ho3, Wo3=Wo3)
    # Flattened padded buffers carry 2 spare zero lanes so every 3x3 tap slice
    # [s : s + Ho*Wp] (max s = 2*Wp + 2) stays in bounds.
    g["L1"] = Hp1 * Wp1 + 2
    g["L2"] = Hp2 * Wp2 + 2
    g["L3"] = Hp3 * Wp3 + 2
    g["M1"] = Ho1 * Wp1                   # conv outputs are computed over the full
    g["M2"] = Ho2 * Wp2                   # padded width; the last 2 columns per row
    g["M3"] = Ho3 * Wp3                   # are junk (killed by R1/R2 zero rows, or
    return g                              # stripped in the wrapper for the output)


# ----------------------------------------------------------------------------
# One-time constants: 0/1 repack matrices (bf16) and stacked-tap weights (bf16).
# ----------------------------------------------------------------------------
def _scatter_matrix(h_valid, w_valid, src_stride, dst_stride, n_cols, pad):
    """(h_valid*src_stride, n_cols): move valid pixels (cols < w_valid of each source
    row) to (+pad, +pad) in the destination row-major layout; everything else -> 0."""
    m = np.zeros((h_valid * src_stride, n_cols), np.float32)
    for r in range(h_valid):
        for c in range(w_valid):
            m[r * src_stride + c, (r + pad) * dst_stride + (c + pad)] = 1.0
    return m


def prepare_up_block(params, channels, H, W, const_dtype=jnp.bfloat16):
    """Hoisted out of the forward path: weight re-layout + repack matrices."""
    c0, c1, c2, c3 = channels
    g = _geometry(H, W)

    def stack_taps(w_oihw):
        # (O, I, 3, 3) -> (O, 9*I) with column index (kh*3 + kw)*I + ci, matching the
        # (9*Cin, M) stacked-tap activation buffer staged inside the kernel.
        o, i = w_oihw.shape[0], w_oihw.shape[1]
        return jnp.transpose(w_oihw, (0, 2, 3, 1)).reshape(o, 9 * i)

    # ConvTranspose2d (I,O,3,3), s=1, p=0  ==  pad=2 conv with flipped kernel:
    #   W_eff[co, ci, kh, kw] = w[ci, co, 2-kh, 2-kw]
    w1_eff = jnp.transpose(jnp.flip(params["conv1_w"], (2, 3)), (1, 0, 2, 3))
    w2_eff = jnp.transpose(jnp.flip(params["conv2_w"], (2, 3)), (1, 0, 2, 3))

    return {
        # 0/1 repack matrices (bf16 is exact for 0/1); kept only for the two
        # intermediate repacks -- U / Pprev / E3 were moved to the wrapper / removed.
        "R1": jnp.asarray(_scatter_matrix(g["Ho1"], g["Wo1"], g["Wp1"],
                                          g["Wp2"], g["L2"], 2), const_dtype),
        "R2": jnp.asarray(_scatter_matrix(g["Ho2"], g["Wo2"], g["Wp2"],
                                          g["Wp3"], g["L3"], 2), const_dtype),
        "wup": stack_taps(params["up_conv_w"]).astype(const_dtype),
        "bup": params["up_conv_b"].reshape(c1, 1).astype(jnp.float32),
        "w1":  stack_taps(w1_eff).astype(const_dtype),        # unsplit: concat == row
        "b1":  params["conv1_b"].reshape(c2, 1).astype(jnp.float32),  # layout of s_cat
        "w2":  stack_taps(w2_eff).astype(const_dtype),
        "b2":  params["conv2_b"].reshape(c3, 1).astype(jnp.float32),
    }


# ----------------------------------------------------------------------------
# Fused Pallas kernel: the whole up_block for one image, resident in VMEM.
# ----------------------------------------------------------------------------
def _up_block_kernel(xup_ref, prev_ref, R1_ref, R2_ref,
                     wup_ref, bup_ref, w1_ref, b1_ref, w2_ref, b2_ref,
                     o_ref, T1, s_cat, T2, s_a2, T3, *, g):
    f32, bf16 = jnp.float32, jnp.bfloat16
    C0 = xup_ref.shape[0]
    C1 = wup_ref.shape[0]
    C2 = w1_ref.shape[0]

    def stage_taps(src_ref, T_ref, Wp, M, Cin):
        # Build the (9*Cin, M) stacked-tap RHS of a 3x3 conv from the zero-padded,
        # row-major flattened image in src_ref (Cin, Hp*Wp + 2).  Static slice copies
        # only; they land on vld/vst/XLU slots which have slack.
        for kh in range(3):
            for kw in range(3):
                t = kh * 3 + kw
                s = kh * Wp + kw
                T_ref[t * Cin:(t + 1) * Cin, :] = src_ref[:, s:s + M]

    def conv(T_ref, w_ref, b_ref):
        # ONE MXU matmul per conv: (Cout, 9*Cin) @ (9*Cin, M), bf16 inputs, f32 acc.
        acc = jnp.dot(w_ref[...], T_ref[...].astype(bf16),
                      preferred_element_type=f32)
        return jnp.maximum(acc + b_ref[...], 0.0)

    # ---- stage 1: up_conv 3x3 pad=1 (over the pre-upsampled image) + bias + ReLU ----
    stage_taps(xup_ref, T1, g["Wp1"], g["M1"], C0)
    a1 = conv(T1, wup_ref, bup_ref)                                    # (C1, M1) f32

    # Repack valid a1 pixels into the pad=2 conv1 input (junk columns hit all-zero R1
    # rows; the pad ring comes from all-zero R1 columns, so no explicit zeroing needed).
    # torch.cat is realised purely by the row layout of s_cat.
    s_cat[0:C1, :] = jnp.dot(a1.astype(bf16), R1_ref[...],
                             preferred_element_type=f32)
    s_cat[C1:C0, :] = prev_ref[...]                                    # pre-padded prev

    # ---- stage 2: ConvTranspose2d #1 == 3x3 conv pad=2 + bias + ReLU ---------------
    stage_taps(s_cat, T2, g["Wp2"], g["M2"], C0)
    a2 = conv(T2, w1_ref, b1_ref)                                      # (C2, M2) f32
    s_a2[...] = jnp.dot(a2.astype(bf16), R2_ref[...],
                        preferred_element_type=f32)

    # ---- stage 3: ConvTranspose2d #2 == 3x3 conv pad=2 + bias + ReLU ---------------
    # Output keeps the 2 junk columns per row (width Wp3); the wrapper strips them
    # with a free slice (replaces the former E3 scatter matmul).
    stage_taps(s_a2, T3, g["Wp3"], g["M3"], C2)
    o_ref[...] = conv(T3, w2_ref, b2_ref).astype(o_ref.dtype)


def _const_spec(shape, single_buffer):
    """BlockSpec for a grid-invariant operand; single-buffered when supported."""
    index_map = lambda *args: (0,) * len(shape)
    if single_buffer:
        return pl.BlockSpec(shape, index_map, pipeline_mode=pl.Buffered(1))
    return pl.BlockSpec(shape, index_map)


# ----------------------------------------------------------------------------
# Forward pass (NCHW in / NCHW out, matching the PyTorch module).
# ----------------------------------------------------------------------------
@functools.partial(jax.jit, static_argnames=("single_buffer_consts",))
def up_block_forward(consts, x_nchw, prev_nchw, single_buffer_consts=True):
    N, C0, H, W = x_nchw.shape
    Cprev = prev_nchw.shape[1]
    C1 = consts["wup"].shape[0]
    C2 = consts["w1"].shape[0]
    C3 = consts["w2"].shape[0]
    g = _geometry(H, W)

    # mirrors `assert out.size(2) == prev_x.size(2)` of the PyTorch module
    assert prev_nchw.shape[2] == g["H1"] and prev_nchw.shape[3] == g["W1"]
    assert C1 + Cprev == C0

    # Pure layout prep hoisted to XLA (perf review): nearest x2 upsample + pad=1 of x
    # and pad=2 of prev_x are a few KB each -- far cheaper than streaming the former
    # U / Pprev 0/1 matrices through the MXU inside the kernel.
    xup = jnp.repeat(jnp.repeat(x_nchw, 2, axis=2), 2, axis=3)
    xup = jnp.pad(xup, ((0, 0), (0, 0), (1, 1), (1, 1)))
    xup = jnp.pad(xup.reshape(N, C0, g["Hp1"] * g["Wp1"]),
                  ((0, 0), (0, 0), (0, 2))).astype(jnp.float32)        # (N, C0, L1)

    prev = jnp.pad(prev_nchw, ((0, 0), (0, 0), (2, 2), (2, 2)))
    prev = jnp.pad(prev.reshape(N, Cprev, g["Hp2"] * g["Wp2"]),
                   ((0, 0), (0, 0), (0, 2))).astype(jnp.float32)       # (N, Cprev, L2)

    flops = 2 * N * (9 * C1 * C0 * g["M1"] + C1 * g["M1"] * g["L2"]
                     + 9 * C2 * C0 * g["M2"] + C2 * g["M2"] * g["L3"]
                     + 9 * C3 * C2 * g["M3"])
    const_bytes = sum(int(v.size) * v.dtype.itemsize for v in consts.values())
    bytes_accessed = 4 * (xup.size + prev.size + N * C3 * g["M3"]) + const_bytes

    sb = single_buffer_consts
    out_flat = pl.pallas_call(
        functools.partial(_up_block_kernel, g=g),
        out_shape=jax.ShapeDtypeStruct((N, C3, g["M3"]), jnp.float32),
        grid=(N,),
        in_specs=[
            pl.BlockSpec((None, C0, g["L1"]), lambda n: (n, 0, 0)),
            pl.BlockSpec((None, Cprev, g["L2"]), lambda n: (n, 0, 0)),
            _const_spec((g["M1"], g["L2"]), sb),       # R1
            _const_spec((g["M2"], g["L3"]), sb),       # R2
            _const_spec((C1, 9 * C0), sb),             # wup (stacked taps)
            _const_spec((C1, 1), sb),                  # bup
            _const_spec((C2, 9 * C0), sb),             # w1  (stacked taps, unsplit)
            _const_spec((C2, 1), sb),                  # b1
            _const_spec((C3, 9 * C2), sb),             # w2  (stacked taps)
            _const_spec((C3, 1), sb),                  # b2
        ],
        out_specs=pl.BlockSpec((None, C3, g["M3"]), lambda n: (n, 0, 0)),
        scratch_shapes=[
            pltpu.VMEM((9 * C0, g["M1"]), jnp.float32),   # T1: stacked taps, up_conv
            pltpu.VMEM((C0, g["L2"]), jnp.float32),       # s_cat: up_conv out ++ prev
            pltpu.VMEM((9 * C0, g["M2"]), jnp.float32),   # T2: stacked taps, conv1
            pltpu.VMEM((C2, g["L3"]), jnp.float32),       # s_a2: conv1 out, pad=2
            pltpu.VMEM((9 * C2, g["M3"]), jnp.float32),   # T3: stacked taps, conv2
        ],
        compiler_params=pltpu.CompilerParams(
            dimension_semantics=("parallel",),             # batch images across cores
            vmem_limit_bytes=32 * 1024 * 1024),
        cost_estimate=pl.CostEstimate(flops=flops, transcendentals=0,
                                      bytes_accessed=bytes_accessed),
    )(xup, prev,
      consts["R1"], consts["R2"],
      consts["wup"], consts["bup"], consts["w1"], consts["b1"],
      consts["w2"], consts["b2"])

    # Strip the 2 junk columns per output row (replaces the former E3 matmul).
    return out_flat.reshape(N, C3, g["Ho3"], g["Wp3"])[:, :, :, :g["Wo3"]]


# ----------------------------------------------------------------------------
# Pure-JAX reference (XLA convs) for verification
# ----------------------------------------------------------------------------
def up_block_reference(params, x, prev):
    up = jnp.repeat(jnp.repeat(x, 2, axis=2), 2, axis=3)
    out = lax.conv_general_dilated(up, params["up_conv_w"], (1, 1), ((1, 1), (1, 1)),
                                   dimension_numbers=("NCHW", "OIHW", "NCHW"))
    out = jnp.maximum(out + params["up_conv_b"][None, :, None, None], 0.0)
    out = jnp.concatenate([out, prev], axis=1)
    out = lax.conv_general_dilated(out, jnp.flip(params["conv1_w"], axis=(2, 3)), (1, 1),
                                   ((2, 2), (2, 2)), dimension_numbers=("NCHW", "IOHW", "NCHW"))
    out = jnp.maximum(out + params["conv1_b"][None, :, None, None], 0.0)
    out = lax.conv_general_dilated(out, jnp.flip(params["conv2_w"], axis=(2, 3)), (1, 1),
                                   ((2, 2), (2, 2)), dimension_numbers=("NCHW", "IOHW", "NCHW"))
    out = jnp.maximum(out + params["conv2_b"][None, :, None, None], 0.0)
    return out


# ----------------------------------------------------------------------------
# Deterministic parameter construction (shapes follow nn.Module __init__)
# ----------------------------------------------------------------------------
def init_params(key, channels):
    c0, c1, c2, c3 = channels
    keys = jax.random.split(key, 6)
    return {
        "up_conv_w": 0.1 * jax.random.normal(keys[0], (c1, c0, 3, 3), jnp.float32),  # Conv2d OIHW
        "up_conv_b": 0.1 * jax.random.normal(keys[1], (c1,), jnp.float32),
        "conv1_w":   0.1 * jax.random.normal(keys[2], (c0, c2, 3, 3), jnp.float32),  # ConvT IOHW
        "conv1_b":   0.1 * jax.random.normal(keys[3], (c2,), jnp.float32),
        "conv2_w":   0.1 * jax.random.normal(keys[4], (c2, c3, 3, 3), jnp.float32),  # ConvT IOHW
        "conv2_b":   0.1 * jax.random.normal(keys[5], (c3,), jnp.float32),
    }


if __name__ == "__main__":
    channels = (4, 2, 4, 4)              # (C0, C1, C2, C3); prev_x has C0 - C1 = 2 channels
    N, H, W = 2, 8, 8                    # x spatial 8 -> upsampled to 16 (matches prev_x)

    key = jax.random.PRNGKey(0)
    k_x, k_p, k_w = jax.random.split(key, 3)
    x = jax.random.normal(k_x, (N, channels[0], H, W), jnp.float32)
    prev_x = jax.random.normal(k_p, (N, channels[0] - channels[1], 2 * H, 2 * W), jnp.float32)
    params = init_params(k_w, channels)

    consts = prepare_up_block(params, channels, H, W)   # one-time weight/constant re-layout

    try:
        out = jax.block_until_ready(
            up_block_forward(consts, x, prev_x, single_buffer_consts=True))
    except Exception:
        # Fallback for JAX builds that reject pipeline_mode=pl.Buffered(1).
        out = jax.block_until_ready(
            up_block_forward(consts, x, prev_x, single_buffer_consts=False))

    ref = jax.block_until_ready(up_block_reference(params, x, prev_x))

    assert out.shape == (N, channels[3], 2 * H + 4, 2 * W + 4), out.shape
    assert out.shape == ref.shape
    # Weights / repack constants are bf16 (activations rounded to bf16 at each matmul,
    # f32 accumulation), so allow ~1e-2-level differences vs the f32 XLA reference.
    assert bool(jnp.allclose(out, ref, atol=2e-2, rtol=2e-2)), "mismatch vs XLA reference"

    print("KERNEL_OK")
</pallas_src>

<mosaic_0001>
module attributes {stable_mosaic.version = 11 : i64} {
  func.func @_up_block_kernel(%arg0: i32, %arg1: memref<1x4x326xf32, #tpu.memory_space<vmem>>, %arg2: memref<1x2x402xf32, #tpu.memory_space<vmem>>, %arg3: memref<288x402xbf16, #tpu.memory_space<vmem>>, %arg4: memref<360x486xbf16, #tpu.memory_space<vmem>>, %arg5: memref<2x36xbf16, #tpu.memory_space<vmem>>, %arg6: memref<2x1xf32, #tpu.memory_space<vmem>>, %arg7: memref<4x36xbf16, #tpu.memory_space<vmem>>, %arg8: memref<4x1xf32, #tpu.memory_space<vmem>>, %arg9: memref<4x36xbf16, #tpu.memory_space<vmem>>, %arg10: memref<4x1xf32, #tpu.memory_space<vmem>>, %arg11: memref<1x4x440xf32, #tpu.memory_space<vmem>>, %arg12: memref<36x288xf32, #tpu.memory_space<vmem>>, %arg13: memref<4x402xf32, #tpu.memory_space<vmem>>, %arg14: memref<36x360xf32, #tpu.memory_space<vmem>>, %arg15: memref<4x486xf32, #tpu.memory_space<vmem>>, %arg16: memref<36x440xf32, #tpu.memory_space<vmem>>) attributes {dimension_semantics = [#tpu.dimension_semantics<parallel>], iteration_bounds = array<i64: 2>, scalar_prefetch = 0 : i64, scratch_operands = 5 : i64, tpu.core_type = #tpu.core_type<tc>, window_params = [{transform_indices = @transform_0, window_bounds = array<i64: 1, 4, 326>}, {transform_indices = @transform_1, window_bounds = array<i64: 1, 2, 402>}, {pipeline_mode = #tpu.pipeline_mode<synchronous>, transform_indices = @transform_2, window_bounds = array<i64: 288, 402>}, {pipeline_mode = #tpu.pipeline_mode<synchronous>, transform_indices = @transform_3, window_bounds = array<i64: 360, 486>}, {pipeline_mode = #tpu.pipeline_mode<synchronous>, transform_indices = @transform_4, window_bounds = array<i64: 2, 36>}, {pipeline_mode = #tpu.pipeline_mode<synchronous>, transform_indices = @transform_5, window_bounds = array<i64: 2, 1>}, {pipeline_mode = #tpu.pipeline_mode<synchronous>, transform_indices = @transform_6, window_bounds = array<i64: 4, 36>}, {pipeline_mode = #tpu.pipeline_mode<synchronous>, transform_indices = @transform_7, window_bounds = array<i64: 4, 1>}, {pipeline_mode = #tpu.pipeline_mode<synchronous>, transform_indices = @transform_8, window_bounds = array<i64: 4, 36>}, {pipeline_mode = #tpu.pipeline_mode<synchronous>, transform_indices = @transform_9, window_bounds = array<i64: 4, 1>}, {transform_indices = @transform_10, window_bounds = array<i64: 1, 4, 440>}]} {
    %c0 = arith.constant 0 : index
    %c0_0 = arith.constant 0 : index
    %c0_1 = arith.constant 0 : index
    %0 = vector.load %arg1[%c0, %c0_0, %c0_1] : memref<1x4x326xf32, #tpu.memory_space<vmem>>, vector<1x4x288xf32>
    %1 = vector.shape_cast %0 : vector<1x4x288xf32> to vector<4x288xf32>
    %c0_2 = arith.constant 0 : index
    %c0_3 = arith.constant 0 : index
    %2 = vector.load %arg12[%c0_2, %c0_3] : memref<36x288xf32, #tpu.memory_space<vmem>>, vector<4x288xf32>
    tpu.vector_store %arg12[%c0_2, %c0_3], %1 {strides = array<i32>} : memref<36x288xf32, #tpu.memory_space<vmem>>, vector<4x288xf32>,
    %c0_4 = arith.constant 0 : index
    %c0_5 = arith.constant 0 : index
    %c1 = arith.constant 1 : index
    %3 = vector.load %arg1[%c0_4, %c0_5, %c1] : memref<1x4x326xf32, #tpu.memory_space<vmem>>, vector<1x4x288xf32>
    %4 = vector.shape_cast %3 : vector<1x4x288xf32> to vector<4x288xf32>
    %c4 = arith.constant 4 : index
    %c0_6 = arith.constant 0 : index
    %5 = vector.load %arg12[%c4, %c0_6] : memref<36x288xf32, #tpu.memory_space<vmem>>, vector<4x288xf32>
    tpu.vector_store %arg12[%c4, %c0_6], %4 {strides = array<i32>} : memref<36x288xf32, #tpu.memory_space<vmem>>, vector<4x288xf32>,
    %c0_7 = arith.constant 0 : index
    %c0_8 = arith.constant 0 : index
    %c2 = arith.constant 2 : index
    %6 = vector.load %arg1[%c0_7, %c0_8, %c2] : memref<1x4x326xf32, #tpu.memory_space<vmem>>, vector<1x4x288xf32>
    %7 = vector.shape_cast %6 : vector<1x4x288xf32> to vector<4x288xf32>
    %c8 = arith.constant 8 : index
    %c0_9 = arith.constant 0 : index
    %8 = vector.load %arg12[%c8, %c0_9] : memref<36x288xf32, #tpu.memory_space<vmem>>, vector<4x288xf32>
    tpu.vector_store %arg12[%c8, %c0_9], %7 {strides = array<i32>} : memref<36x288xf32, #tpu.memory_space<vmem>>, vector<4x288xf32>,
    %c0_10 = arith.constant 0 : index
    %c0_11 = arith.constant 0 : index
    %c18 = arith.constant 18 : index
    %9 = vector.load %arg1[%c0_10, %c0_11, %c18] : memref<1x4x326xf32, #tpu.memory_space<vmem>>, vector<1x4x288xf32>
    %10 = vector.shape_cast %9 : vector<1x4x288xf32> to vector<4x288xf32>
    %c12 = arith.constant 12 : index
    %c0_12 = arith.constant 0 : index
    %11 = vector.load %arg12[%c12, %c0_12] : memref<36x288xf32, #tpu.memory_space<vmem>>, vector<4x288xf32>
    tpu.vector_store %arg12[%c12, %c0_12], %10 {strides = array<i32>} : memref<36x288xf32, #tpu.memory_space<vmem>>, vector<4x288xf32>,
    %c0_13 = arith.constant 0 : index
    %c0_14 = arith.constant 0 : index
    %c19 = arith.constant 19 : index
    %12 = vector.load %arg1[%c0_13, %c0_14, %c19] : memref<1x4x326xf32, #tpu.memory_space<vmem>>, vector<1x4x288xf32>
    %13 = vector.shape_cast %12 : vector<1x4x288xf32> to vector<4x288xf32>
    %c16 = arith.constant 16 : index
    %c0_15 = arith.constant 0 : index
    %14 = vector.load %arg12[%c16, %c0_15] : memref<36x288xf32, #tpu.memory_space<vmem>>, vector<4x288xf32>
    tpu.vector_store %arg12[%c16, %c0_15], %13 {strides = array<i32>} : memref<36x288xf32, #tpu.memory_space<vmem>>, vector<4x288xf32>,
    %c0_16 = arith.constant 0 : index
    %c0_17 = arith.constant 0 : index
    %c20 = arith.constant 20 : index
    %15 = vector.load %arg1[%c0_16, %c0_17, %c20] : memref<1x4x326xf32, #tpu.memory_space<vmem>>, vector<1x4x288xf32>
    %16 = vector.shape_cast %15 : vector<1x4x288xf32> to vector<4x288xf32>
    %c20_18 = arith.constant 20 : index
    %c0_19 = arith.constant 0 : index
    %17 = vector.load %arg12[%c20_18, %c0_19] : memref<36x288xf32, #tpu.memory_space<vmem>>, vector<4x288xf32>
    tpu.vector_store %arg12[%c20_18, %c0_19], %16 {strides = array<i32>} : memref<36x288xf32, #tpu.memory_space<vmem>>, vector<4x288xf32>,
    %c0_20 = arith.constant 0 : index
    %c0_21 = arith.constant 0 : index
    %c36 = arith.constant 36 : index
    %18 = vector.load %arg1[%c0_20, %c0_21, %c36] : memref<1x4x326xf32, #tpu.memory_space<vmem>>, vector<1x4x288xf32>
    %19 = vector.shape_cast %18 : vector<1x4x288xf32> to vector<4x288xf32>
    %c24 = arith.constant 24 : index
    %c0_22 = arith.constant 0 : index
    %20 = vector.load %arg12[%c24, %c0_22] : memref<36x288xf32, #tpu.memory_space<vmem>>, vector<4x288xf32>
    tpu.vector_store %arg12[%c24, %c0_22], %19 {strides = array<i32>} : memref<36x288xf32, #tpu.memory_space<vmem>>, vector<4x288xf32>,
    %c0_23 = arith.constant 0 : index
    %c0_24 = arith.constant 0 : index
    %c37 = arith.constant 37 : index
    %21 = vector.load %arg1[%c0_23, %c0_24, %c37] : memref<1x4x326xf32, #tpu.memory_space<vmem>>, vector<1x4x288xf32>
    %22 = vector.shape_cast %21 : vector<1x4x288xf32> to vector<4x288xf32>
    %c28 = arith.constant 28 : index
    %c0_25 = arith.constant 0 : index
    %23 = vector.load %arg12[%c28, %c0_25] : memref<36x288xf32, #tpu.memory_space<vmem>>, vector<4x288xf32>
    tpu.vector_store %arg12[%c28, %c0_25], %22 {strides = array<i32>} : memref<36x288xf32, #tpu.memory_space<vmem>>, vector<4x288xf32>,
    %c0_26 = arith.constant 0 : index
    %c0_27 = arith.constant 0 : index
    %c38 = arith.constant 38 : index
    %24 = vector.load %arg1[%c0_26, %c0_27, %c38] : memref<1x4x326xf32, #tpu.memory_space<vmem>>, vector<1x4x288xf32>
    %25 = vector.shape_cast %24 : vector<1x4x288xf32> to vector<4x288xf32>
    %c32 = arith.constant 32 : index
    %c0_28 = arith.constant 0 : index
    %26 = vector.load %arg12[%c32, %c0_28] : memref<36x288xf32, #tpu.memory_space<vmem>>, vector<4x288xf32>
    tpu.vector_store %arg12[%c32, %c0_28], %25 {strides = array<i32>} : memref<36x288xf32, #tpu.memory_space<vmem>>, vector<4x288xf32>,
    %c0_29 = arith.constant 0 : index
    %c0_30 = arith.constant 0 : index
    %27 = vector.load %arg5[%c0_29, %c0_30] : memref<2x36xbf16, #tpu.memory_space<vmem>>, vector<2x36xbf16>
    %c0_31 = arith.constant 0 : index
    %c0_32 = arith.constant 0 : index
    %28 = vector.load %arg12[%c0_31, %c0_32] : memref<36x288xf32, #tpu.memory_space<vmem>>, vector<36x288xf32>
    %29 = arith.truncf %28 : vector<36x288xf32> to vector<36x288xbf16>
    %cst = arith.constant dense<0.000000e+00> : vector<2x288xf32>
    %30 = tpu.matmul %27, %29, %cst {dimension_numbers = #tpu.dot_dimension_numbers<[1], [0], [0], [1], [0, 0, 1, 1], [], []>} : vector<2x36xbf16>, vector<36x288xbf16>, vector<2x288xf32> -> vector<2x288xf32>
    %c0_33 = arith.constant 0 : index
    %c0_34 = arith.constant 0 : index
    %31 = vector.load %arg6[%c0_33, %c0_34] : memref<2x1xf32, #tpu.memory_space<vmem>>, vector<2x1xf32>
    %32 = vector.broadcast %31 : vector<2x1xf32> to vector<2x288xf32>
    %33 = arith.addf %30, %32 : vector<2x288xf32>
    %cst_35 = arith.constant 0.000000e+00 : f32
    %34 = vector.broadcast %cst_35 : f32 to vector<2x288xf32>
    %35 = arith.maximumf %33, %34 : vector<2x288xf32>
    %36 = arith.truncf %35 : vector<2x288xf32> to vector<2x288xbf16>
    %c0_36 = arith.constant 0 : index
    %c0_37 = arith.constant 0 : index
    %37 = vector.load %arg3[%c0_36, %c0_37] : memref<288x402xbf16, #tpu.memory_space<vmem>>, vector<288x402xbf16>
    %cst_38 = arith.constant dense<0.000000e+00> : vector<2x402xf32>
    %38 = tpu.matmul %36, %37, %cst_38 {dimension_numbers = #tpu.dot_dimension_numbers<[1], [0], [0], [1], [0, 0, 1, 1], [], []>} : vector<2x288xbf16>, vector<288x402xbf16>, vector<2x402xf32> -> vector<2x402xf32>
    %c0_39 = arith.constant 0 : index
    %c0_40 = arith.constant 0 : index
    %39 = vector.load %arg13[%c0_39, %c0_40] : memref<4x402xf32, #tpu.memory_space<vmem>>, vector<2x402xf32>
    tpu.vector_store %arg13[%c0_39, %c0_40], %38 {strides = array<i32>} : memref<4x402xf32, #tpu.memory_space<vmem>>, vector<2x402xf32>,
    %c0_41 = arith.constant 0 : index
    %c0_42 = arith.constant 0 : index
    %c0_43 = arith.constant 0 : index
    %40 = vector.load %arg2[%c0_41, %c0_42, %c0_43] : memref<1x2x402xf32, #tpu.memory_space<vmem>>, vector<1x2x402xf32>
    %41 = vector.shape_cast %40 : vector<1x2x402xf32> to vector<2x402xf32>
    %c2_44 = arith.constant 2 : index
    %c0_45 = arith.constant 0 : index
    %42 = vector.load %arg13[%c2_44, %c0_45] : memref<4x402xf32, #tpu.memory_space<vmem>>, vector<2x402xf32>
    tpu.vector_store %arg13[%c2_44, %c0_45], %41 {strides = array<i32>} : memref<4x402xf32, #tpu.memory_space<vmem>>, vector<2x402xf32>,
    %c0_46 = arith.constant 0 : index
    %c0_47 = arith.constant 0 : index
    %43 = vector.load %arg13[%c0_46, %c0_47] : memref<4x402xf32, #tpu.memory_space<vmem>>, vector<4x360xf32>
    %c0_48 = arith.constant 0 : index
    %c0_49 = arith.constant 0 : index
    %44 = vector.load %arg14[%c0_48, %c0_49] : memref<36x360xf32, #tpu.memory_space<vmem>>, vector<4x360xf32>
    tpu.vector_store %arg14[%c0_48, %c0_49], %43 {strides = array<i32>} : memref<36x360xf32, #tpu.memory_space<vmem>>, vector<4x360xf32>,
    %c0_50 = arith.constant 0 : index
    %c1_51 = arith.constant 1 : index
    %45 = vector.load %arg13[%c0_50, %c1_51] : memref<4x402xf32, #tpu.memory_space<vmem>>, vector<4x360xf32>
    %c4_52 = arith.constant 4 : index
    %c0_53 = arith.constant 0 : index
    %46 = vector.load %arg14[%c4_52, %c0_53] : memref<36x360xf32, #tpu.memory_space<vmem>>, vector<4x360xf32>
    tpu.vector_store %arg14[%c4_52, %c0_53], %45 {strides = array<i32>} : memref<36x360xf32, #tpu.memory_space<vmem>>, vector<4x360xf32>,
    %c0_54 = arith.constant 0 : index
    %c2_55 = arith.constant 2 : index
    %47 = vector.load %arg13[%c0_54, %c2_55] : memref<4x402xf32, #tpu.memory_space<vmem>>, vector<4x360xf32>
    %c8_56 = arith.constant 8 : index
    %c0_57 = arith.constant 0 : index
    %48 = vector.load %arg14[%c8_56, %c0_57] : memref<36x360xf32, #tpu.memory_space<vmem>>, vector<4x360xf32>
    tpu.vector_store %arg14[%c8_56, %c0_57], %47 {strides = array<i32>} : memref<36x360xf32, #tpu.memory_space<vmem>>, vector<4x360xf32>,
    %c0_58 = arith.constant 0 : index
    %c20_59 = arith.constant 20 : index
    %49 = vector.load %arg13[%c0_58, %c20_59] : memref<4x402xf32, #tpu.memory_space<vmem>>, vector<4x360xf32>
    %c12_60 = arith.constant 12 : index
    %c0_61 = arith.constant 0 : index
    %50 = vector.load %arg14[%c12_60, %c0_61] : memref<36x360xf32, #tpu.memory_space<vmem>>, vector<4x360xf32>
    tpu.vector_store %arg14[%c12_60, %c0_61], %49 {strides = array<i32>} : memref<36x360xf32, #tpu.memory_space<vmem>>, vector<4x360xf32>,
    %c0_62 = arith.constant 0 : index
    %c21 = arith.constant 21 : index
    %51 = vector.load %arg13[%c0_62, %c21] : memref<4x402xf32, #tpu.memory_space<vmem>>, vector<4x360xf32>
    %c16_63 = arith.constant 16 : index
    %c0_64 = arith.constant 0 : index
    %52 = vector.load %arg14[%c16_63, %c0_64] : memref<36x360xf32, #tpu.memory_space<vmem>>, vector<4x360xf32>
    tpu.vector_store %arg14[%c16_63, %c0_64], %51 {strides = array<i32>} : memref<36x360xf32, #tpu.memory_space<vmem>>, vector<4x360xf32>,
    %c0_65 = arith.constant 0 : index
    %c22 = arith.constant 22 : index
    %53 = vector.load %arg13[%c0_65, %c22] : memref<4x402xf32, #tpu.memory_space<vmem>>, vector<4x360xf32>
    %c20_66 = arith.constant 20 : index
    %c0_67 = arith.constant 0 : index
    %54 = vector.load %arg14[%c20_66, %c0_67] : memref<36x360xf32, #tpu.memory_space<vmem>>, vector<4x360xf32>
    tpu.vector_store %arg14[%c20_66, %c0_67], %53 {strides = array<i32>} : memref<36x360xf32, #tpu.memory_space<vmem>>, vector<4x360xf32>,
    %c0_68 = arith.constant 0 : index
    %c40 = arith.constant 40 : index
    %55 = vector.load %arg13[%c0_68, %c40] : memref<4x402xf32, #tpu.memory_space<vmem>>, vector<4x360xf32>
    %c24_69 = arith.constant 24 : index
    %c0_70 = arith.constant 0 : index
    %56 = vector.load %arg14[%c24_69, %c0_70] : memref<36x360xf32, #tpu.memory_space<vmem>>, vector<4x360xf32>
    tpu.vector_store %arg14[%c24_69, %c0_70], %55 {strides = array<i32>} : memref<36x360xf32, #tpu.memory_space<vmem>>, vector<4x360xf32>,
    %c0_71 = arith.constant 0 : index
    %c41 = arith.constant 41 : index
    %57 = vector.load %arg13[%c0_71, %c41] : memref<4x402xf32, #tpu.memory_space<vmem>>, vector<4x360xf32>
    %c28_72 = arith.constant 28 : index
    %c0_73 = arith.constant 0 : index
    %58 = vector.load %arg14[%c28_72, %c0_73] : memref<36x360xf32, #tpu.memory_space<vmem>>, vector<4x360xf32>
    tpu.vector_store %arg14[%c28_72, %c0_73], %57 {strides = array<i32>} : memref<36x360xf32, #tpu.memory_space<vmem>>, vector<4x360xf32>,
    %c0_74 = arith.constant 0 : index
    %c42 = arith.constant 42 : index
    %59 = vector.load %arg13[%c0_74, %c42] : memref<4x402xf32, #tpu.memory_space<vmem>>, vector<4x360xf32>
    %c32_75 = arith.constant 32 : index
    %c0_76 = arith.constant 0 : index
    %60 = vector.load %arg14[%c32_75, %c0_76] : memref<36x360xf32, #tpu.memory_space<vmem>>, vector<4x360xf32>
    tpu.vector_store %arg14[%c32_75, %c0_76], %59 {strides = array<i32>} : memref<36x360xf32, #tpu.memory_space<vmem>>, vector<4x360xf32>,
    %c0_77 = arith.constant 0 : index
    %c0_78 = arith.constant 0 : index
    %61 = vector.load %arg7[%c0_77, %c0_78] : memref<4x36xbf16, #tpu.memory_space<vmem>>, vector<4x36xbf16>
    %c0_79 = arith.constant 0 : index
    %c0_80 = arith.constant 0 : index
    %62 = vector.load %arg14[%c0_79, %c0_80] : memref<36x360xf32, #tpu.memory_space<vmem>>, vector<36x360xf32>
    %63 = arith.truncf %62 : vector<36x360xf32> to vector<36x360xbf16>
    %cst_81 = arith.constant dense<0.000000e+00> : vector<4x360xf32>
    %64 = tpu.matmul %61, %63, %cst_81 {dimension_numbers = #tpu.dot_dimension_numbers<[1], [0], [0], [1], [0, 0, 1, 1], [], []>} : vector<4x36xbf16>, vector<36x360xbf16>, vector<4x360xf32> -> vector<4x360xf32>
    %c0_82 = arith.constant 0 : index
    %c0_83 = arith.constant 0 : index
    %65 = vector.load %arg8[%c0_82, %c0_83] : memref<4x1xf32, #tpu.memory_space<vmem>>, vector<4x1xf32>
    %66 = vector.broadcast %65 : vector<4x1xf32> to vector<4x360xf32>
    %67 = arith.addf %64, %66 : vector<4x360xf32>
    %cst_84 = arith.constant 0.000000e+00 : f32
    %68 = vector.broadcast %cst_84 : f32 to vector<4x360xf32>
    %69 = arith.maximumf %67, %68 : vector<4x360xf32>
    %70 = arith.truncf %69 : vector<4x360xf32> to vector<4x360xbf16>
    %c0_85 = arith.constant 0 : index
    %c0_86 = arith.constant 0 : index
    %71 = vector.load %arg4[%c0_85, %c0_86] : memref<360x486xbf16, #tpu.memory_space<vmem>>, vector<360x486xbf16>
    %cst_87 = arith.constant dense<0.000000e+00> : vector<4x486xf32>
    %72 = tpu.matmul %70, %71, %cst_87 {dimension_numbers = #tpu.dot_dimension_numbers<[1], [0], [0], [1], [0, 0, 1, 1], [], []>} : vector<4x360xbf16>, vector<360x486xbf16>, vector<4x486xf32> -> vector<4x486xf32>
    %c0_88 = arith.constant 0 : index
    %c0_89 = arith.constant 0 : index
    %73 = vector.load %arg15[%c0_88, %c0_89] : memref<4x486xf32, #tpu.memory_space<vmem>>, vector<4x486xf32>
    tpu.vector_store %arg15[%c0_88, %c0_89], %72 {strides = array<i32>} : memref<4x486xf32, #tpu.memory_space<vmem>>, vector<4x486xf32>,
    %c0_90 = arith.constant 0 : index
    %c0_91 = arith.constant 0 : index
    %74 = vector.load %arg15[%c0_90, %c0_91] : memref<4x486xf32, #tpu.memory_space<vmem>>, vector<4x440xf32>
    %c0_92 = arith.constant 0 : index
    %c0_93 = arith.constant 0 : index
    %75 = vector.load %arg16[%c0_92, %c0_93] : memref<36x440xf32, #tpu.memory_space<vmem>>, vector<4x440xf32>
    tpu.vector_store %arg16[%c0_92, %c0_93], %74 {strides = array<i32>} : memref<36x440xf32, #tpu.memory_space<vmem>>, vector<4x440xf32>,
    %c0_94 = arith.constant 0 : index
    %c1_95 = arith.constant 1 : index
    %76 = vector.load %arg15[%c0_94, %c1_95] : memref<4x486xf32, #tpu.memory_space<vmem>>, vector<4x440xf32>
    %c4_96 = arith.constant 4 : index
    %c0_97 = arith.constant 0 : index
    %77 = vector.load %arg16[%c4_96, %c0_97] : memref<36x440xf32, #tpu.memory_space<vmem>>, vector<4x440xf32>
    tpu.vector_store %arg16[%c4_96, %c0_97], %76 {strides = array<i32>} : memref<36x440xf32, #tpu.memory_space<vmem>>, vector<4x440xf32>,
    %c0_98 = arith.constant 0 : index
    %c2_99 = arith.constant 2 : index
    %78 = vector.load %arg15[%c0_98, %c2_99] : memref<4x486xf32, #tpu.memory_space<vmem>>, vector<4x440xf32>
    %c8_100 = arith.constant 8 : index
    %c0_101 = arith.constant 0 : index
    %79 = vector.load %arg16[%c8_100, %c0_101] : memref<36x440xf32, #tpu.memory_space<vmem>>, vector<4x440xf32>
    tpu.vector_store %arg16[%c8_100, %c0_101], %78 {strides = array<i32>} : memref<36x440xf32, #tpu.memory_space<vmem>>, vector<4x440xf32>,
    %c0_102 = arith.constant 0 : index
    %c22_103 = arith.constant 22 : index
    %80 = vector.load %arg15[%c0_102, %c22_103] : memref<4x486xf32, #tpu.memory_space<vmem>>, vector<4x440xf32>
    %c12_104 = arith.constant 12 : index
    %c0_105 = arith.constant 0 : index
    %81 = vector.load %arg16[%c12_104, %c0_105] : memref<36x440xf32, #tpu.memory_space<vmem>>, vector<4x440xf32>
    tpu.vector_store %arg16[%c12_104, %c0_105], %80 {strides = array<i32>} : memref<36x440xf32, #tpu.memory_space<vmem>>, vector<4x440xf32>,
    %c0_106 = arith.constant 0 : index
    %c23 = arith.constant 23 : index
    %82 = vector.load %arg15[%c0_106, %c23] : memref<4x486xf32, #tpu.memory_space<vmem>>, vector<4x440xf32>
    %c16_107 = arith.constant 16 : index
    %c0_108 = arith.constant 0 : index
    %83 = vector.load %arg16[%c16_107, %c0_108] : memref<36x440xf32, #tpu.memory_space<vmem>>, vector<4x440xf32>
    tpu.vector_store %arg16[%c16_107, %c0_108], %82 {strides = array<i32>} : memref<36x440xf32, #tpu.memory_space<vmem>>, vector<4x440xf32>,
    %c0_109 = arith.constant 0 : index
    %c24_110 = arith.constant 24 : index
    %84 = vector.load %arg15[%c0_109, %c24_110] : memref<4x486xf32, #tpu.memory_space<vmem>>, vector<4x440xf32>
    %c20_111 = arith.constant 20 : index
    %c0_112 = arith.constant 0 : index
    %85 = vector.load %arg16[%c20_111, %c0_112] : memref<36x440xf32, #tpu.memory_space<vmem>>, vector<4x440xf32>
    tpu.vector_store %arg16[%c20_111, %c0_112], %84 {strides = array<i32>} : memref<36x440xf32, #tpu.memory_space<vmem>>, vector<4x440xf32>,
    %c0_113 = arith.constant 0 : index
    %c44 = arith.constant 44 : index
    %86 = vector.load %arg15[%c0_113, %c44] : memref<4x486xf32, #tpu.memory_space<vmem>>, vector<4x440xf32>
    %c24_114 = arith.constant 24 : index
    %c0_115 = arith.constant 0 : index
    %87 = vector.load %arg16[%c24_114, %c0_115] : memref<36x440xf32, #tpu.memory_space<vmem>>, vector<4x440xf32>
    tpu.vector_store %arg16[%c24_114, %c0_115], %86 {strides = array<i32>} : memref<36x440xf32, #tpu.memory_space<vmem>>, vector<4x440xf32>,
    %c0_116 = arith.constant 0 : index
    %c45 = arith.constant 45 : index
    %88 = vector.load %arg15[%c0_116, %c45] : memref<4x486xf32, #tpu.memory_space<vmem>>, vector<4x440xf32>
    %c28_117 = arith.constant 28 : index
    %c0_118 = arith.constant 0 : index
    %89 = vector.load %arg16[%c28_117, %c0_118] : memref<36x440xf32, #tpu.memory_space<vmem>>, vector<4x440xf32>
    tpu.vector_store %arg16[%c28_117, %c0_118], %88 {strides = array<i32>} : memref<36x440xf32, #tpu.memory_space<vmem>>, vector<4x440xf32>,
    %c0_119 = arith.constant 0 : index
    %c46 = arith.constant 46 : index
    %90 = vector.load %arg15[%c0_119, %c46] : memref<4x486xf32, #tpu.memory_space<vmem>>, vector<4x440xf32>
    %c32_120 = arith.constant 32 : index
    %c0_121 = arith.constant 0 : index
    %91 = vector.load %arg16[%c32_120, %c0_121] : memref<36x440xf32, #tpu.memory_space<vmem>>, vector<4x440xf32>
    tpu.vector_store %arg16[%c32_120, %c0_121], %90 {strides = array<i32>} : memref<36x440xf32, #tpu.memory_space<vmem>>, vector<4x440xf32>,
    %c0_122 = arith.constant 0 : index
    %c0_123 = arith.constant 0 : index
    %92 = vector.load %arg9[%c0_122, %c0_123] : memref<4x36xbf16, #tpu.memory_space<vmem>>, vector<4x36xbf16>
    %c0_124 = arith.constant 0 : index
    %c0_125 = arith.constant 0 : index
    %93 = vector.load %arg16[%c0_124, %c0_125] : memref<36x440xf32, #tpu.memory_space<vmem>>, vector<36x440xf32>
    %94 = arith.truncf %93 : vector<36x440xf32> to vector<36x440xbf16>
    %cst_126 = arith.constant dense<0.000000e+00> : vector<4x440xf32>
    %95 = tpu.matmul %92, %94, %cst_126 {dimension_numbers = #tpu.dot_dimension_numbers<[1], [0], [0], [1], [0, 0, 1, 1], [], []>} : vector<4x36xbf16>, vector<36x440xbf16>, vector<4x440xf32> -> vector<4x440xf32>
    %c0_127 = arith.constant 0 : index
    %c0_128 = arith.constant 0 : index
    %96 = vector.load %arg10[%c0_127, %c0_128] : memref<4x1xf32, #tpu.memory_space<vmem>>, vector<4x1xf32>
    %97 = vector.broadcast %96 : vector<4x1xf32> to vector<4x440xf32>
    %98 = arith.addf %95, %97 : vector<4x440xf32>
    %cst_129 = arith.constant 0.000000e+00 : f32
    %99 = vector.broadcast %cst_129 : f32 to vector<4x440xf32>
    %100 = arith.maximumf %98, %99 : vector<4x440xf32>
    %c0_130 = arith.constant 0 : index
    %c0_131 = arith.constant 0 : index
    %c0_132 = arith.constant 0 : index
    %101 = vector.load %arg11[%c0_130, %c0_131, %c0_132] : memref<1x4x440xf32, #tpu.memory_space<vmem>>, vector<1x4x440xf32>
    %102 = vector.shape_cast %101 : vector<1x4x440xf32> to vector<4x440xf32>
    %103 = vector.shape_cast %100 : vector<4x440xf32> to vector<1x4x440xf32>
    tpu.vector_store %arg11[%c0_130, %c0_131, %c0_132], %103 {strides = array<i32>} : memref<1x4x440xf32, #tpu.memory_space<vmem>>, vector<1x4x440xf32>,
    return
  }
  func.func @transform_0(%arg0: i32) -> (i32, i32, i32) {
    %c0_i32 = arith.constant 0 : i32
    %c0_i32_0 = arith.constant 0 : i32
    %c0_i32_1 = arith.constant 0 : i32
    return %arg0, %c0_i32, %c0_i32_0 : i32, i32, i32
  }
  func.func @transform_1(%arg0: i32) -> (i32, i32, i32) {
    %c0_i32 = arith.constant 0 : i32
    %c0_i32_0 = arith.constant 0 : i32
    %c0_i32_1 = arith.constant 0 : i32
    return %arg0, %c0_i32, %c0_i32_0 : i32, i32, i32
  }
  func.func @transform_2(%arg0: i32) -> (i32, i32) {
    %c0_i32 = arith.constant 0 : i32
    %c0_i32_0 = arith.constant 0 : i32
    %c0_i32_1 = arith.constant 0 : i32
    return %c0_i32, %c0_i32_0 : i32, i32
  }
  func.func @transform_3(%arg0: i32) -> (i32, i32) {
    %c0_i32 = arith.constant 0 : i32
    %c0_i32_0 = arith.constant 0 : i32
    %c0_i32_1 = arith.constant 0 : i32
    return %c0_i32, %c0_i32_0 : i32, i32
  }
  func.func @transform_4(%arg0: i32) -> (i32, i32) {
    %c0_i32 = arith.constant 0 : i32
    %c0_i32_0 = arith.constant 0 : i32
    %c0_i32_1 = arith.constant 0 : i32
    return %c0_i32, %c0_i32_0 : i32, i32
  }
  func.func @transform_5(%arg0: i32) -> (i32, i32) {
    %c0_i32 = arith.constant 0 : i32
    %c0_i32_0 = arith.constant 0 : i32
    %c0_i32_1 = arith.constant 0 : i32
    return %c0_i32, %c0_i32_0 : i32, i32
  }
  func.func @transform_6(%arg0: i32) -> (i32, i32) {
    %c0_i32 = arith.constant 0 : i32
    %c0_i32_0 = arith.constant 0 : i32
    %c0_i32_1 = arith.constant 0 : i32
    return %c0_i32, %c0_i32_0 : i32, i32
  }
  func.func @transform_7(%arg0: i32) -> (i32, i32) {
    %c0_i32 = arith.constant 0 : i32
    %c0_i32_0 = arith.constant 0 : i32
    %c0_i32_1 = arith.constant 0 : i32
    return %c0_i32, %c0_i32_0 : i32, i32
  }
  func.func @transform_8(%arg0: i32) -> (i32, i32) {
    %c0_i32 = arith.constant 0 : i32
    %c0_i32_0 = arith.constant 0 : i32
    %c0_i32_1 = arith.constant 0 : i32
    return %c0_i32, %c0_i32_0 : i32, i32
  }
  func.func @transform_9(%arg0: i32) -> (i32, i32) {
    %c0_i32 = arith.constant 0 : i32
    %c0_i32_0 = arith.constant 0 : i32
    %c0_i32_1 = arith.constant 0 : i32
    return %c0_i32, %c0_i32_0 : i32, i32
  }
  func.func @transform_10(%arg0: i32) -> (i32, i32, i32) {
    %c0_i32 = arith.constant 0 : i32
    %c0_i32_0 = arith.constant 0 : i32
    %c0_i32_1 = arith.constant 0 : i32
    return %arg0, %c0_i32, %c0_i32_0 : i32, i32, i32
  }
}

module attributes {stable_mosaic.version = 11 : i64} {
  func.func @_up_block_kernel(%arg0: i32, %arg1: memref<1x4x326xf32, #tpu.memory_space<vmem>>, %arg2: memref<1x2x402xf32, #tpu.memory_space<vmem>>, %arg3: memref<288x402xbf16, #tpu.memory_space<vmem>>, %arg4: memref<360x486xbf16, #tpu.memory_space<vmem>>, %arg5: memref<2x36xbf16, #tpu.memory_space<vmem>>, %arg6: memref<2x1xf32, #tpu.memory_space<vmem>>, %arg7: memref<4x36xbf16, #tpu.memory_space<vmem>>, %arg8: memref<4x1xf32, #tpu.memory_space<vmem>>, %arg9: memref<4x36xbf16, #tpu.memory_space<vmem>>, %arg10: memref<4x1xf32, #tpu.memory_space<vmem>>, %arg11: memref<1x4x440xf32, #tpu.memory_space<vmem>>, %arg12: memref<36x288xf32, #tpu.memory_space<vmem>>, %arg13: memref<4x402xf32, #tpu.memory_space<vmem>>, %arg14: memref<36x360xf32, #tpu.memory_space<vmem>>, %arg15: memref<4x486xf32, #tpu.memory_space<vmem>>, %arg16: memref<36x440xf32, #tpu.memory_space<vmem>>) attributes {dimension_semantics = [#tpu.dimension_semantics<parallel>], iteration_bounds = array<i64: 2>, scalar_prefetch = 0 : i64, scratch_operands = 5 : i64, tpu.core_type = #tpu.core_type<tc>, window_params = [{transform_indices = @transform_0, window_bounds = array<i64: 1, 4, 326>}, {transform_indices = @transform_1, window_bounds = array<i64: 1, 2, 402>}, {pipeline_mode = #tpu.pipeline_mode<synchronous>, transform_indices = @transform_2, window_bounds = array<i64: 288, 402>}, {pipeline_mode = #tpu.pipeline_mode<synchronous>, transform_indices = @transform_3, window_bounds = array<i64: 360, 486>}, {pipeline_mode = #tpu.pipeline_mode<synchronous>, transform_indices = @transform_4, window_bounds = array<i64: 2, 36>}, {pipeline_mode = #tpu.pipeline_mode<synchronous>, transform_indices = @transform_5, window_bounds = array<i64: 2, 1>}, {pipeline_mode = #tpu.pipeline_mode<synchronous>, transform_indices = @transform_6, window_bounds = array<i64: 4, 36>}, {pipeline_mode = #tpu.pipeline_mode<synchronous>, transform_indices = @transform_7, window_bounds = array<i64: 4, 1>}, {pipeline_mode = #tpu.pipeline_mode<synchronous>, transform_indices = @transform_8, window_bounds = array<i64: 4, 36>}, {pipeline_mode = #tpu.pipeline_mode<synchronous>, transform_indices = @transform_9, window_bounds = array<i64: 4, 1>}, {transform_indices = @transform_10, window_bounds = array<i64: 1, 4, 440>}]} {
    %c0 = arith.constant 0 : index
    %c0_0 = arith.constant 0 : index
    %c0_1 = arith.constant 0 : index
    %0 = vector.load %arg1[%c0, %c0_0, %c0_1] : memref<1x4x326xf32, #tpu.memory_space<vmem>>, vector<1x4x288xf32>
    %1 = vector.shape_cast %0 : vector<1x4x288xf32> to vector<4x288xf32>
    %c0_2 = arith.constant 0 : index
    %c0_3 = arith.constant 0 : index
    %2 = vector.load %arg12[%c0_2, %c0_3] : memref<36x288xf32, #tpu.memory_space<vmem>>, vector<4x288xf32>
    tpu.vector_store %arg12[%c0_2, %c0_3], %1 {strides = array<i32>} : memref<36x288xf32, #tpu.memory_space<vmem>>, vector<4x288xf32>,
    %c0_4 = arith.constant 0 : index
    %c0_5 = arith.constant 0 : index
    %c1 = arith.constant 1 : index
    %3 = vector.load %arg1[%c0_4, %c0_5, %c1] : memref<1x4x326xf32, #tpu.memory_space<vmem>>, vector<1x4x288xf32>
    %4 = vector.shape_cast %3 : vector<1x4x288xf32> to vector<4x288xf32>
    %c4 = arith.constant 4 : index
    %c0_6 = arith.constant 0 : index
    %5 = vector.load %arg12[%c4, %c0_6] : memref<36x288xf32, #tpu.memory_space<vmem>>, vector<4x288xf32>
    tpu.vector_store %arg12[%c4, %c0_6], %4 {strides = array<i32>} : memref<36x288xf32, #tpu.memory_space<vmem>>, vector<4x288xf32>,
    %c0_7 = arith.constant 0 : index
    %c0_8 = arith.constant 0 : index
    %c2 = arith.constant 2 : index
    %6 = vector.load %arg1[%c0_7, %c0_8, %c2] : memref<1x4x326xf32, #tpu.memory_space<vmem>>, vector<1x4x288xf32>
    %7 = vector.shape_cast %6 : vector<1x4x288xf32> to vector<4x288xf32>
    %c8 = arith.constant 8 : index
    %c0_9 = arith.constant 0 : index
    %8 = vector.load %arg12[%c8, %c0_9] : memref<36x288xf32, #tpu.memory_space<vmem>>, vector<4x288xf32>
    tpu.vector_store %arg12[%c8, %c0_9], %7 {strides = array<i32>} : memref<36x288xf32, #tpu.memory_space<vmem>>, vector<4x288xf32>,
    %c0_10 = arith.constant 0 : index
    %c0_11 = arith.constant 0 : index
    %c18 = arith.constant 18 : index
    %9 = vector.load %arg1[%c0_10, %c0_11, %c18] : memref<1x4x326xf32, #tpu.memory_space<vmem>>, vector<1x4x288xf32>
    %10 = vector.shape_cast %9 : vector<1x4x288xf32> to vector<4x288xf32>
    %c12 = arith.constant 12 : index
    %c0_12 = arith.constant 0 : index
    %11 = vector.load %arg12[%c12, %c0_12] : memref<36x288xf32, #tpu.memory_space<vmem>>, vector<4x288xf32>
    tpu.vector_store %arg12[%c12, %c0_12], %10 {strides = array<i32>} : memref<36x288xf32, #tpu.memory_space<vmem>>, vector<4x288xf32>,
    %c0_13 = arith.constant 0 : index
    %c0_14 = arith.constant 0 : index
    %c19 = arith.constant 19 : index
    %12 = vector.load %arg1[%c0_13, %c0_14, %c19] : memref<1x4x326xf32, #tpu.memory_space<vmem>>, vector<1x4x288xf32>
    %13 = vector.shape_cast %12 : vector<1x4x288xf32> to vector<4x288xf32>
    %c16 = arith.constant 16 : index
    %c0_15 = arith.constant 0 : index
    %14 = vector.load %arg12[%c16, %c0_15] : memref<36x288xf32, #tpu.memory_space<vmem>>, vector<4x288xf32>
    tpu.vector_store %arg12[%c16, %c0_15], %13 {strides = array<i32>} : memref<36x288xf32, #tpu.memory_space<vmem>>, vector<4x288xf32>,
    %c0_16 = arith.constant 0 : index
    %c0_17 = arith.constant 0 : index
    %c20 = arith.constant 20 : index
    %15 = vector.load %arg1[%c0_16, %c0_17, %c20] : memref<1x4x326xf32, #tpu.memory_space<vmem>>, vector<1x4x288xf32>
    %16 = vector.shape_cast %15 : vector<1x4x288xf32> to vector<4x288xf32>
    %c20_18 = arith.constant 20 : index
    %c0_19 = arith.constant 0 : index
    %17 = vector.load %arg12[%c20_18, %c0_19] : memref<36x288xf32, #tpu.memory_space<vmem>>, vector<4x288xf32>
    tpu.vector_store %arg12[%c20_18, %c0_19], %16 {strides = array<i32>} : memref<36x288xf32, #tpu.memory_space<vmem>>, vector<4x288xf32>,
    %c0_20 = arith.constant 0 : index
    %c0_21 = arith.constant 0 : index
    %c36 = arith.constant 36 : index
    %18 = vector.load %arg1[%c0_20, %c0_21, %c36] : memref<1x4x326xf32, #tpu.memory_space<vmem>>, vector<1x4x288xf32>
    %19 = vector.shape_cast %18 : vector<1x4x288xf32> to vector<4x288xf32>
    %c24 = arith.constant 24 : index
    %c0_22 = arith.constant 0 : index
    %20 = vector.load %arg12[%c24, %c0_22] : memref<36x288xf32, #tpu.memory_space<vmem>>, vector<4x288xf32>
    tpu.vector_store %arg12[%c24, %c0_22], %19 {strides = array<i32>} : memref<36x288xf32, #tpu.memory_space<vmem>>, vector<4x288xf32>,
    %c0_23 = arith.constant 0 : index
    %c0_24 = arith.constant 0 : index
    %c37 = arith.constant 37 : index
    %21 = vector.load %arg1[%c0_23, %c0_24, %c37] : memref<1x4x326xf32, #tpu.memory_space<vmem>>, vector<1x4x288xf32>
    %22 = vector.shape_cast %21 : vector<1x4x288xf32> to vector<4x288xf32>
    %c28 = arith.constant 28 : index
    %c0_25 = arith.constant 0 : index
    %23 = vector.load %arg12[%c28, %c0_25] : memref<36x288xf32, #tpu.memory_space<vmem>>, vector<4x288xf32>
    tpu.vector_store %arg12[%c28, %c0_25], %22 {strides = array<i32>} : memref<36x288xf32, #tpu.memory_space<vmem>>, vector<4x288xf32>,
    %c0_26 = arith.constant 0 : index
    %c0_27 = arith.constant 0 : index
    %c38 = arith.constant 38 : index
    %24 = vector.load %arg1[%c0_26, %c0_27, %c38] : memref<1x4x326xf32, #tpu.memory_space<vmem>>, vector<1x4x288xf32>
    %25 = vector.shape_cast %24 : vector<1x4x288xf32> to vector<4x288xf32>
    %c32 = arith.constant 32 : index
    %c0_28 = arith.constant 0 : index
    %26 = vector.load %arg12[%c32, %c0_28] : memref<36x288xf32, #tpu.memory_space<vmem>>, vector<4x288xf32>
    tpu.vector_store %arg12[%c32, %c0_28], %25 {strides = array<i32>} : memref<36x288xf32, #tpu.memory_space<vmem>>, vector<4x288xf32>,
    %c0_29 = arith.constant 0 : index
    %c0_30 = arith.constant 0 : index
    %27 = vector.load %arg5[%c0_29, %c0_30] : memref<2x36xbf16, #tpu.memory_space<vmem>>, vector<2x36xbf16>
    %c0_31 = arith.constant 0 : index
    %c0_32 = arith.constant 0 : index
    %28 = vector.load %arg12[%c0_31, %c0_32] : memref<36x288xf32, #tpu.memory_space<vmem>>, vector<36x288xf32>
    %29 = arith.truncf %28 : vector<36x288xf32> to vector<36x288xbf16>
    %cst = arith.constant dense<0.000000e+00> : vector<2x288xf32>
    %30 = tpu.matmul %27, %29, %cst {dimension_numbers = #tpu.dot_dimension_numbers<[1], [0], [0], [1], [0, 0, 1, 1], [], []>} : vector<2x36xbf16>, vector<36x288xbf16>, vector<2x288xf32> -> vector<2x288xf32>
    %c0_33 = arith.constant 0 : index
    %c0_34 = arith.constant 0 : index
    %31 = vector.load %arg6[%c0_33, %c0_34] : memref<2x1xf32, #tpu.memory_space<vmem>>, vector<2x1xf32>
    %32 = vector.broadcast %31 : vector<2x1xf32> to vector<2x288xf32>
    %33 = arith.addf %30, %32 : vector<2x288xf32>
    %cst_35 = arith.constant 0.000000e+00 : f32
    %34 = vector.broadcast %cst_35 : f32 to vector<2x288xf32>
    %35 = arith.maximumf %33, %34 : vector<2x288xf32>
    %36 = arith.truncf %35 : vector<2x288xf32> to vector<2x288xbf16>
    %c0_36 = arith.constant 0 : index
    %c0_37 = arith.constant 0 : index
    %37 = vector.load %arg3[%c0_36, %c0_37] : memref<288x402xbf16, #tpu.memory_space<vmem>>, vector<288x402xbf16>
    %cst_38 = arith.constant dense<0.000000e+00> : vector<2x402xf32>
    %38 = tpu.matmul %36, %37, %cst_38 {dimension_numbers = #tpu.dot_dimension_numbers<[1], [0], [0], [1], [0, 0, 1, 1], [], []>} : vector<2x288xbf16>, vector<288x402xbf16>, vector<2x402xf32> -> vector<2x402xf32>
    %c0_39 = arith.constant 0 : index
    %c0_40 = arith.constant 0 : index
    %39 = vector.load %arg13[%c0_39, %c0_40] : memref<4x402xf32, #tpu.memory_space<vmem>>, vector<2x402xf32>
    tpu.vector_store %arg13[%c0_39, %c0_40], %38 {strides = array<i32>} : memref<4x402xf32, #tpu.memory_space<vmem>>, vector<2x402xf32>,
    %c0_41 = arith.constant 0 : index
    %c0_42 = arith.constant 0 : index
    %c0_43 = arith.constant 0 : index
    %40 = vector.load %arg2[%c0_41, %c0_42, %c0_43] : memref<1x2x402xf32, #tpu.memory_space<vmem>>, vector<1x2x402xf32>
    %41 = vector.shape_cast %40 : vector<1x2x402xf32> to vector<2x402xf32>
    %c2_44 = arith.constant 2 : index
    %c0_45 = arith.constant 0 : index
    %42 = vector.load %arg13[%c2_44, %c0_45] : memref<4x402xf32, #tpu.memory_space<vmem>>, vector<2x402xf32>
    tpu.vector_store %arg13[%c2_44, %c0_45], %41 {strides = array<i32>} : memref<4x402xf32, #tpu.memory_space<vmem>>, vector<2x402xf32>,
    %c0_46 = arith.constant 0 : index
    %c0_47 = arith.constant 0 : index
    %43 = vector.load %arg13[%c0_46, %c0_47] : memref<4x402xf32, #tpu.memory_space<vmem>>, vector<4x360xf32>
    %c0_48 = arith.constant 0 : index
    %c0_49 = arith.constant 0 : index
    %44 = vector.load %arg14[%c0_48, %c0_49] : memref<36x360xf32, #tpu.memory_space<vmem>>, vector<4x360xf32>
    tpu.vector_store %arg14[%c0_48, %c0_49], %43 {strides = array<i32>} : memref<36x360xf32, #tpu.memory_space<vmem>>, vector<4x360xf32>,
    %c0_50 = arith.constant 0 : index
    %c1_51 = arith.constant 1 : index
    %45 = vector.load %arg13[%c0_50, %c1_51] : memref<4x402xf32, #tpu.memory_space<vmem>>, vector<4x360xf32>
    %c4_52 = arith.constant 4 : index
    %c0_53 = arith.constant 0 : index
    %46 = vector.load %arg14[%c4_52, %c0_53] : memref<36x360xf32, #tpu.memory_space<vmem>>, vector<4x360xf32>
    tpu.vector_store %arg14[%c4_52, %c0_53], %45 {strides = array<i32>} : memref<36x360xf32, #tpu.memory_space<vmem>>, vector<4x360xf32>,
    %c0_54 = arith.constant 0 : index
    %c2_55 = arith.constant 2 : index
    %47 = vector.load %arg13[%c0_54, %c2_55] : memref<4x402xf32, #tpu.memory_space<vmem>>, vector<4x360xf32>
    %c8_56 = arith.constant 8 : index
    %c0_57 = arith.constant 0 : index
    %48 = vector.load %arg14[%c8_56, %c0_57] : memref<36x360xf32, #tpu.memory_space<vmem>>, vector<4x360xf32>
    tpu.vector_store %arg14[%c8_56, %c0_57], %47 {strides = array<i32>} : memref<36x360xf32, #tpu.memory_space<vmem>>, vector<4x360xf32>,
    %c0_58 = arith.constant 0 : index
    %c20_59 = arith.constant 20 : index
    %49 = vector.load %arg13[%c0_58, %c20_59] : memref<4x402xf32, #tpu.memory_space<vmem>>, vector<4x360xf32>
    %c12_60 = arith.constant 12 : index
    %c0_61 = arith.constant 0 : index
    %50 = vector.load %arg14[%c12_60, %c0_61] : memref<36x360xf32, #tpu.memory_space<vmem>>, vector<4x360xf32>
    tpu.vector_store %arg14[%c12_60, %c0_61], %49 {strides = array<i32>} : memref<36x360xf32, #tpu.memory_space<vmem>>, vector<4x360xf32>,
    %c0_62 = arith.constant 0 : index
    %c21 = arith.constant 21 : index
    %51 = vector.load %arg13[%c0_62, %c21] : memref<4x402xf32, #tpu.memory_space<vmem>>, vector<4x360xf32>
    %c16_63 = arith.constant 16 : index
    %c0_64 = arith.constant 0 : index
    %52 = vector.load %arg14[%c16_63, %c0_64] : memref<36x360xf32, #tpu.memory_space<vmem>>, vector<4x360xf32>
    tpu.vector_store %arg14[%c16_63, %c0_64], %51 {strides = array<i32>} : memref<36x360xf32, #tpu.memory_space<vmem>>, vector<4x360xf32>,
    %c0_65 = arith.constant 0 : index
    %c22 = arith.constant 22 : index
    %53 = vector.load %arg13[%c0_65, %c22] : memref<4x402xf32, #tpu.memory_space<vmem>>, vector<4x360xf32>
    %c20_66 = arith.constant 20 : index
    %c0_67 = arith.constant 0 : index
    %54 = vector.load %arg14[%c20_66, %c0_67] : memref<36x360xf32, #tpu.memory_space<vmem>>, vector<4x360xf32>
    tpu.vector_store %arg14[%c20_66, %c0_67], %53 {strides = array<i32>} : memref<36x360xf32, #tpu.memory_space<vmem>>, vector<4x360xf32>,
    %c0_68 = arith.constant 0 : index
    %c40 = arith.constant 40 : index
    %55 = vector.load %arg13[%c0_68, %c40] : memref<4x402xf32, #tpu.memory_space<vmem>>, vector<4x360xf32>
    %c24_69 = arith.constant 24 : index
    %c0_70 = arith.constant 0 : index
    %56 = vector.load %arg14[%c24_69, %c0_70] : memref<36x360xf32, #tpu.memory_space<vmem>>, vector<4x360xf32>
    tpu.vector_store %arg14[%c24_69, %c0_70], %55 {strides = array<i32>} : memref<36x360xf32, #tpu.memory_space<vmem>>, vector<4x360xf32>,
    %c0_71 = arith.constant 0 : index
    %c41 = arith.constant 41 : index
    %57 = vector.load %arg13[%c0_71, %c41] : memref<4x402xf32, #tpu.memory_space<vmem>>, vector<4x360xf32>
    %c28_72 = arith.constant 28 : index
    %c0_73 = arith.constant 0 : index
    %58 = vector.load %arg14[%c28_72, %c0_73] : memref<36x360xf32, #tpu.memory_space<vmem>>, vector<4x360xf32>
    tpu.vector_store %arg14[%c28_72, %c0_73], %57 {strides = array<i32>} : memref<36x360xf32, #tpu.memory_space<vmem>>, vector<4x360xf32>,
    %c0_74 = arith.constant 0 : index
    %c42 = arith.constant 42 : index
    %59 = vector.load %arg13[%c0_74, %c42] : memref<4x402xf32, #tpu.memory_space<vmem>>, vector<4x360xf32>
    %c32_75 = arith.constant 32 : index
    %c0_76 = arith.constant 0 : index
    %60 = vector.load %arg14[%c32_75, %c0_76] : memref<36x360xf32, #tpu.memory_space<vmem>>, vector<4x360xf32>
    tpu.vector_store %arg14[%c32_75, %c0_76], %59 {strides = array<i32>} : memref<36x360xf32, #tpu.memory_space<vmem>>, vector<4x360xf32>,
    %c0_77 = arith.constant 0 : index
    %c0_78 = arith.constant 0 : index
    %61 = vector.load %arg7[%c0_77, %c0_78] : memref<4x36xbf16, #tpu.memory_space<vmem>>, vector<4x36xbf16>
    %c0_79 = arith.constant 0 : index
    %c0_80 = arith.constant 0 : index
    %62 = vector.load %arg14[%c0_79, %c0_80] : memref<36x360xf32, #tpu.memory_space<vmem>>, vector<36x360xf32>
    %63 = arith.truncf %62 : vector<36x360xf32> to vector<36x360xbf16>
    %cst_81 = arith.constant dense<0.000000e+00> : vector<4x360xf32>
    %64 = tpu.matmul %61, %63, %cst_81 {dimension_numbers = #tpu.dot_dimension_numbers<[1], [0], [0], [1], [0, 0, 1, 1], [], []>} : vector<4x36xbf16>, vector<36x360xbf16>, vector<4x360xf32> -> vector<4x360xf32>
    %c0_82 = arith.constant 0 : index
    %c0_83 = arith.constant 0 : index
    %65 = vector.load %arg8[%c0_82, %c0_83] : memref<4x1xf32, #tpu.memory_space<vmem>>, vector<4x1xf32>
    %66 = vector.broadcast %65 : vector<4x1xf32> to vector<4x360xf32>
    %67 = arith.addf %64, %66 : vector<4x360xf32>
    %cst_84 = arith.constant 0.000000e+00 : f32
    %68 = vector.broadcast %cst_84 : f32 to vector<4x360xf32>
    %69 = arith.maximumf %67, %68 : vector<4x360xf32>
    %70 = arith.truncf %69 : vector<4x360xf32> to vector<4x360xbf16>
    %c0_85 = arith.constant 0 : index
    %c0_86 = arith.constant 0 : index
    %71 = vector.load %arg4[%c0_85, %c0_86] : memref<360x486xbf16, #tpu.memory_space<vmem>>, vector<360x486xbf16>
    %cst_87 = arith.constant dense<0.000000e+00> : vector<4x486xf32>
    %72 = tpu.matmul %70, %71, %cst_87 {dimension_numbers = #tpu.dot_dimension_numbers<[1], [0], [0], [1], [0, 0, 1, 1], [], []>} : vector<4x360xbf16>, vector<360x486xbf16>, vector<4x486xf32> -> vector<4x486xf32>
    %c0_88 = arith.constant 0 : index
    %c0_89 = arith.constant 0 : index
    %73 = vector.load %arg15[%c0_88, %c0_89] : memref<4x486xf32, #tpu.memory_space<vmem>>, vector<4x486xf32>
    tpu.vector_store %arg15[%c0_88, %c0_89], %72 {strides = array<i32>} : memref<4x486xf32, #tpu.memory_space<vmem>>, vector<4x486xf32>,
    %c0_90 = arith.constant 0 : index
    %c0_91 = arith.constant 0 : index
    %74 = vector.load %arg15[%c0_90, %c0_91] : memref<4x486xf32, #tpu.memory_space<vmem>>, vector<4x440xf32>
    %c0_92 = arith.constant 0 : index
    %c0_93 = arith.constant 0 : index
    %75 = vector.load %arg16[%c0_92, %c0_93] : memref<36x440xf32, #tpu.memory_space<vmem>>, vector<4x440xf32>
    tpu.vector_store %arg16[%c0_92, %c0_93], %74 {strides = array<i32>} : memref<36x440xf32, #tpu.memory_space<vmem>>, vector<4x440xf32>,
    %c0_94 = arith.constant 0 : index
    %c1_95 = arith.constant 1 : index
    %76 = vector.load %arg15[%c0_94, %c1_95] : memref<4x486xf32, #tpu.memory_space<vmem>>, vector<4x440xf32>
    %c4_96 = arith.constant 4 : index
    %c0_97 = arith.constant 0 : index
    %77 = vector.load %arg16[%c4_96, %c0_97] : memref<36x440xf32, #tpu.memory_space<vmem>>, vector<4x440xf32>
    tpu.vector_store %arg16[%c4_96, %c0_97], %76 {strides = array<i32>} : memref<36x440xf32, #tpu.memory_space<vmem>>, vector<4x440xf32>,
    %c0_98 = arith.constant 0 : index
    %c2_99 = arith.constant 2 : index
    %78 = vector.load %arg15[%c0_98, %c2_99] : memref<4x486xf32, #tpu.memory_space<vmem>>, vector<4x440xf32>
    %c8_100 = arith.constant 8 : index
    %c0_101 = arith.constant 0 : index
    %79 = vector.load %arg16[%c8_100, %c0_101] : memref<36x440xf32, #tpu.memory_space<vmem>>, vector<4x440xf32>
    tpu.vector_store %arg16[%c8_100, %c0_101], %78 {strides = array<i32>} : memref<36x440xf32, #tpu.memory_space<vmem>>, vector<4x440xf32>,
    %c0_102 = arith.constant 0 : index
    %c22_103 = arith.constant 22 : index
    %80 = vector.load %arg15[%c0_102, %c22_103] : memref<4x486xf32, #tpu.memory_space<vmem>>, vector<4x440xf32>
    %c12_104 = arith.constant 12 : index
    %c0_105 = arith.constant 0 : index
    %81 = vector.load %arg16[%c12_104, %c0_105] : memref<36x440xf32, #tpu.memory_space<vmem>>, vector<4x440xf32>
    tpu.vector_store %arg16[%c12_104, %c0_105], %80 {strides = array<i32>} : memref<36x440xf32, #tpu.memory_space<vmem>>, vector<4x440xf32>,
    %c0_106 = arith.constant 0 : index
    %c23 = arith.constant 23 : index
    %82 = vector.load %arg15[%c0_106, %c23] : memref<4x486xf32, #tpu.memory_space<vmem>>, vector<4x440xf32>
    %c16_107 = arith.constant 16 : index
    %c0_108 = arith.constant 0 : index
    %83 = vector.load %arg16[%c16_107, %c0_108] : memref<36x440xf32, #tpu.memory_space<vmem>>, vector<4x440xf32>
    tpu.vector_store %arg16[%c16_107, %c0_108], %82 {strides = array<i32>} : memref<36x440xf32, #tpu.memory_space<vmem>>, vector<4x440xf32>,
    %c0_109 = arith.constant 0 : index
    %c24_110 = arith.constant 24 : index
    %84 = vector.load %arg15[%c0_109, %c24_110] : memref<4x486xf32, #tpu.memory_space<vmem>>, vector<4x440xf32>
    %c20_111 = arith.constant 20 : index
    %c0_112 = arith.constant 0 : index
    %85 = vector.load %arg16[%c20_111, %c0_112] : memref<36x440xf32, #tpu.memory_space<vmem>>, vector<4x440xf32>
    tpu.vector_store %arg16[%c20_111, %c0_112], %84 {strides = array<i32>} : memref<36x440xf32, #tpu.memory_space<vmem>>, vector<4x440xf32>,
    %c0_113 = arith.constant 0 : index
    %c44 = arith.constant 44 : index
    %86 = vector.load %arg15[%c0_113, %c44] : memref<4x486xf32, #tpu.memory_space<vmem>>, vector<4x440xf32>
    %c24_114 = arith.constant 24 : index
    %c0_115 = arith.constant 0 : index
    %87 = vector.load %arg16[%c24_114, %c0_115] : memref<36x440xf32, #tpu.memory_space<vmem>>, vector<4x440xf32>
    tpu.vector_store %arg16[%c24_114, %c0_115], %86 {strides = array<i32>} : memref<36x440xf32, #tpu.memory_space<vmem>>, vector<4x440xf32>,
    %c0_116 = arith.constant 0 : index
    %c45 = arith.constant 45 : index
    %88 = vector.load %arg15[%c0_116, %c45] : memref<4x486xf32, #tpu.memory_space<vmem>>, vector<4x440xf32>
    %c28_117 = arith.constant 28 : index
    %c0_118 = arith.constant 0 : index
    %89 = vector.load %arg16[%c28_117, %c0_118] : memref<36x440xf32, #tpu.memory_space<vmem>>, vector<4x440xf32>
    tpu.vector_store %arg16[%c28_117, %c0_118], %88 {strides = array<i32>} : memref<36x440xf32, #tpu.memory_space<vmem>>, vector<4x440xf32>,
    %c0_119 = arith.constant 0 : index
    %c46 = arith.constant 46 : index
    %90 = vector.load %arg15[%c0_119, %c46] : memref<4x486xf32, #tpu.memory_space<vmem>>, vector<4x440xf32>
    %c32_120 = arith.constant 32 : index
    %c0_121 = arith.constant 0 : index
    %91 = vector.load %arg16[%c32_120, %c0_121] : memref<36x440xf32, #tpu.memory_space<vmem>>, vector<4x440xf32>
    tpu.vector_store %arg16[%c32_120, %c0_121], %90 {strides = array<i32>} : memref<36x440xf32, #tpu.memory_space<vmem>>, vector<4x440xf32>,
    %c0_122 = arith.constant 0 : index
    %c0_123 = arith.constant 0 : index
    %92 = vector.load %arg9[%c0_122, %c0_123] : memref<4x36xbf16, #tpu.memory_space<vmem>>, vector<4x36xbf16>
    %c0_124 = arith.constant 0 : index
    %c0_125 = arith.constant 0 : index
    %93 = vector.load %arg16[%c0_124, %c0_125] : memref<36x440xf32, #tpu.memory_space<vmem>>, vector<36x440xf32>
    %94 = arith.truncf %93 : vector<36x440xf32> to vector<36x440xbf16>
    %cst_126 = arith.constant dense<0.000000e+00> : vector<4x440xf32>
    %95 = tpu.matmul %92, %94, %cst_126 {dimension_numbers = #tpu.dot_dimension_numbers<[1], [0], [0], [1], [0, 0, 1, 1], [], []>} : vector<4x36xbf16>, vector<36x440xbf16>, vector<4x440xf32> -> vector<4x440xf32>
    %c0_127 = arith.constant 0 : index
    %c0_128 = arith.constant 0 : index
    %96 = vector.load %arg10[%c0_127, %c0_128] : memref<4x1xf32, #tpu.memory_space<vmem>>, vector<4x1xf32>
    %97 = vector.broadcast %96 : vector<4x1xf32> to vector<4x440xf32>
    %98 = arith.addf %95, %97 : vector<4x440xf32>
    %cst_129 = arith.constant 0.000000e+00 : f32
    %99 = vector.broadcast %cst_129 : f32 to vector<4x440xf32>
    %100 = arith.maximumf %98, %99 : vector<4x440xf32>
    %c0_130 = arith.constant 0 : index
    %c0_131 = arith.constant 0 : index
    %c0_132 = arith.constant 0 : index
    %101 = vector.load %arg11[%c0_130, %c0_131, %c0_132] : memref<1x4x440xf32, #tpu.memory_space<vmem>>, vector<1x4x440xf32>
    %102 = vector.shape_cast %101 : vector<1x4x440xf32> to vector<4x440xf32>
    %103 = vector.shape_cast %100 : vector<4x440xf32> to vector<1x4x440xf32>
    tpu.vector_store %arg11[%c0_130, %c0_131, %c0_132], %103 {strides = array<i32>} : memref<1x4x440xf32, #tpu.memory_space<vmem>>, vector<1x4x440xf32>,
    return
  }
  func.func @transform_0(%arg0: i32) -> (i32, i32, i32) {
    %c0_i32 = arith.constant 0 : i32
    %c0_i32_0 = arith.constant 0 : i32
    %c0_i32_1 = arith.constant 0 : i32
    return %arg0, %c0_i32, %c0_i32_0 : i32, i32, i32
  }
  func.func @transform_1(%arg0: i32) -> (i32, i32, i32) {
    %c0_i32 = arith.constant 0 : i32
    %c0_i32_0 = arith.constant 0 : i32
    %c0_i32_1 = arith.constant 0 : i32
    return %arg0, %c0_i32, %c0_i32_0 : i32, i32, i32
  }
  func.func @transform_2(%arg0: i32) -> (i32, i32) {
    %c0_i32 = arith.constant 0 : i32
    %c0_i32_0 = arith.constant 0 : i32
    %c0_i32_1 = arith.constant 0 : i32
    return %c0_i32, %c0_i32_0 : i32, i32
  }
  func.func @transform_3(%arg0: i32) -> (i32, i32) {
    %c0_i32 = arith.constant 0 : i32
    %c0_i32_0 = arith.constant 0 : i32
    %c0_i32_1 = arith.constant 0 : i32
    return %c0_i32, %c0_i32_0 : i32, i32
  }
  func.func @transform_4(%arg0: i32) -> (i32, i32) {
    %c0_i32 = arith.constant 0 : i32
    %c0_i32_0 = arith.constant 0 : i32
    %c0_i32_1 = arith.constant 0 : i32
    return %c0_i32, %c0_i32_0 : i32, i32
  }
  func.func @transform_5(%arg0: i32) -> (i32, i32) {
    %c0_i32 = arith.constant 0 : i32
    %c0_i32_0 = arith.constant 0 : i32
    %c0_i32_1 = arith.constant 0 : i32
    return %c0_i32, %c0_i32_0 : i32, i32
  }
  func.func @transform_6(%arg0: i32) -> (i32, i32) {
    %c0_i32 = arith.constant 0 : i32
    %c0_i32_0 = arith.constant 0 : i32
    %c0_i32_1 = arith.constant 0 : i32
    return %c0_i32, %c0_i32_0 : i32, i32
  }
  func.func @transform_7(%arg0: i32) -> (i32, i32) {
    %c0_i32 = arith.constant 0 : i32
    %c0_i32_0 = arith.constant 0 : i32
    %c0_i32_1 = arith.constant 0 : i32
    return %c0_i32, %c0_i32_0 : i32, i32
  }
  func.func @transform_8(%arg0: i32) -> (i32, i32) {
    %c0_i32 = arith.constant 0 : i32
    %c0_i32_0 = arith.constant 0 : i32
    %c0_i32_1 = arith.constant 0 : i32
    return %c0_i32, %c0_i32_0 : i32, i32
  }
  func.func @transform_9(%arg0: i32) -> (i32, i32) {
    %c0_i32 = arith.constant 0 : i32
    %c0_i32_0 = arith.constant 0 : i32
    %c0_i32_1 = arith.constant 0 : i32
    return %c0_i32, %c0_i32_0 : i32, i32
  }
  func.func @transform_10(%arg0: i32) -> (i32, i32, i32) {
    %c0_i32 = arith.constant 0 : i32
    %c0_i32_0 = arith.constant 0 : i32
    %c0_i32_1 = arith.constant 0 : i32
    return %arg0, %c0_i32, %c0_i32_0 : i32, i32, i32
  }
}

</mosaic_0001>

<bundles_post_ra>
// kernel: up_block_forward.1
= control target key start
LH: loop header
LB: loop body
LE: loop exit
PB: predicated region body
PF: predicated region fallthrough
CT: control target
= control target key end

     0   :  { %s3406_s13 = smov 0   ;;  %s4200_s0 = inlined_call_operand.vmem [shape: f32[2,4,326], index: 0, kind: input, shape index: {}]   ;;  %s4201_s1 = inlined_call_operand.vmem [shape: f32[2,2,402], index: 1, kind: input, shape index: {}]   ;;  %s4202_s2 = inlined_call_operand.vmem [shape: bf16[288,402], index: 2, kind: input, shape index: {}]   ;;  %s4203_s3 = inlined_call_operand.vmem [shape: bf16[360,486], index: 3, kind: input, shape index: {}]   ;;  %s4204_s4 = inlined_call_operand.vmem [shape: bf16[2,36], index: 4, kind: input, shape index: {}]   ;;  %s4205_s5 = inlined_call_operand.vmem [shape: f32[2,1], index: 5, kind: input, shape index: {}]   ;;  %s4206_s6 = inlined_call_operand.vmem [shape: bf16[4,36], index: 6, kind: input, shape index: {}]   ;;  %s4207_s7 = inlined_call_operand.vmem [shape: f32[4,1], index: 7, kind: input, shape index: {}]   ;;  %s4208_s8 = inlined_call_operand.vmem [shape: bf16[4,36], index: 8, kind: input, shape index: {}]   ;;  %s4209_s9 = inlined_call_operand.vmem [shape: f32[4,1], index: 9, kind: input, shape index: {}]   ;;  %s4210_s10 = inlined_call_operand.vmem [shape: f32[2,4,440], index: 10, kind: output, shape index: {}]  }
   0x1 LB: > { %s2804_s14 = sadd.s32 4294967295, %s3327_s13   ;;  %p2808_p0 = scmp.ge.s32.totalorder %s3327_s13, 1  ;;  %s3327_s13 = sphi %s3406_s13, %s20_s13  }
   0x2   : > { %p322_p1 = scmp.lt.s32.totalorder %s3327_s13, 3 }
   0x4   : > { %p323_p2 = pnand %p2808_p0, %p322_p1 }
   0x5   : > { %p365_p3 = scmp.lt.s32.totalorder (!%p323_p2), %s2804_s14, 1  ;;  %s3330_s19 = smov (!%p323_p2), 90  }
   0x6   : > { %326 = sbr.rel (%p323_p2) target bundleno = 1632 (0x660), region = 60  ;;  %s3331_s20 = smov (!%p323_p2), 92  }
   0x7   : > { %s3332_s21 = smov (!%p323_p2), 108   ;;  %s3333_s22 = smov (!%p323_p2), 109  }
   0x8   : > { %s3334_s23 = smov (!%p323_p2), 91   ;;  %s3335_s24 = smov (!%p323_p2), 127  }
   0x9   : > { %s3337_s25 = smov (!%p323_p2), 126   ;;  %s3338_s26 = smov (!%p323_p2), 110  }
   0xa   : > { %s3341_s29 = smov (!%p323_p2), 86   ;;  %s3342_s30 = smov (!%p323_p2), 88  }
   0xb   : > { %s4212_s14 = smov (!%p365_p3, %s2804_s14), 1  ;;  %v3329_v0 = vmov 0.0   ;;  %vm388_vm0 = vcmask 257024   ;;  %vm3336_vm1 = vmmov 0   ;;  %v3339_v13 = vmov 0   ;;  %s3343_s11 = smov 87  }
   0xc   : > { %s3027_s15 = smul.u32 12, %s4212_s14  ;;  %3007 = vmatprep.subr.bf16.mxu1 %v3329_v0  ;;  %3013 = vmatprep.mubr.msk.bf16.mxu1 %vm3336_vm1, %v3329_v0  ;;  %v580_v14 = vld [vmem:[%s4205_s5] sm:$0x3]  ;;  %vm410_vm2 = vcmask 261124   ;;  %vm590_vm3 = vcmask 1041408   ;;  %vm546_vm4 = vcmask 736256  }
   0xd   : > { %632 = vmatprep.mubr.bf16.mxu0 %v3339_v13  ;;  %3058 = vset.pattern.permute.xlu0 %v3339_v13  ;;  %vm464_vm5 = vcmask 891904   ;;  %vm485_vm6 = vcmask 883712   ;;  %v3083_v37 = vld [vmem:[%s4202_s2 + $0x224] ss:$16 sps:$4 sm:$0xff]   ;;  %vm505_vm7 = vcmask 752640   ;;  %vm526_vm8 = vcmask 744448  }
   0xe   : > { %s369_s18 = scalar_lea.vmem %s4200_s0, %s3027_s15  ;;  %3059 = vset.pattern.permute.xlu1 %v3339_v13  ;;  %v3473_v41 = vld [vmem:[%s4204_s4] sm:$0x1]  ;;  %vm586_vm9 = vcmask 293888   ;;  %vm423_vm10 = vcmask 1031168   ;;  %vm402_vm11 = vcmask 1039360   ;;  %vm444_vm12 = vcmask 900096  }
   0xf   : > { %v536_v1 = vld [vmem:[%s369_s18 + $0x8] sm:$0xf]  ;;  %v535_v7 = vld [vmem:[%s369_s18] sm:$0xff]  ;;  %vm1119_vm13 = vcmask 261120   ;;  %vm1319_vm14 = vcmask 1043458   ;;  %vm1320_vm15 = vcmask 146438  }
  0x10   : > { %v495_v2 = vld [vmem:[%s369_s18 + $0x8] sm:$0xf]  ;;  %544 = vrot.lane.b32.xlu0 %v536_v1, %s3330_s19  ;;  %v539_v9 = vcombine.high %v535_v7, %v535_v7  ;;  %386 = vst [vmem:[#allocation2] sm:$0xf] %v535_v7  ;;  %v477_v12 = vcombine.low %v535_v7, %v535_v7  ;;  %v3081_v42 = vld [vmem:[%s4202_s2 + $0x220] ss:$16 sps:$4 sm:$0xff]  }
  0x11   : > { %503 = vrot.lane.b32.xlu1 %v495_v2, %s3331_s20  ;;  %v3060_v3 = vld [vmem:[%s369_s18 + $0x8] ss:$0 sps:$4 sm:$0xff]   ;;  %s3344_s12 = smov 107   ;;  %s3345_s15 = smov 106  }
  0x12   : > { %v454_v4 = vld [vmem:[%s369_s18 + $0x8] sm:$0xf]  ;;  %387 = vst [vmem:[#allocation2 + $0x8] sm:$0xf] %v539_v9 }
  0x13   : > { %v3061_v5 = vld [vmem:[%s369_s18 + $0x8] ss:$0 sps:$4 sm:$0xff]  }
  0x14   : > { %v3062_v6 = vld [vmem:[%s369_s18 + $0x8] ss:$0 sps:$4 sm:$0xff]   ;;  %462 = vrot.lane.b32.xlu0 %v454_v4, %s3333_s22 }
  0x15   : > { %v382_v8 = vld [vmem:[%s369_s18 + $0x8] sm:$0xf]  ;;  %483 = vrot.lane.b32.xlu1 %v3060_v3, %s3332_s21 }
  0x16   : > { %389 = vst.msk [vmem:[#allocation2 + $0x10] sm:$0xf] %vm388_vm0, %v382_v8  ;;  %v3063_v10 = vld [vmem:[%s369_s18 + $0x8] ss:$0 sps:$4 sm:$0xff]  }
  0x17   : > { %v413_v11 = vld [vmem:[%s369_s18 + $0x8] sm:$0xf] }
  0x18   : > { %524 = vrot.lane.b32.xlu0 %v3061_v5, %s3334_s23 }
  0x19   : > { %400 = vrot.lane.b32.xlu1 %v3062_v6, %s3335_s24 }
  0x1c   : > { %421 = vrot.lane.b32.xlu0 %v413_v11, %s3337_s25 }
  0x1d   : > { %442 = vrot.lane.b32.xlu1 %v3063_v10, %s3338_s26 }
  0x20   : > { %540 = vrot.lane.b32.xlu0 %v535_v7, %s3330_s19 }
  0x21   : > { %542 = vrot.lane.b32.xlu1 %v539_v9, %s3330_s19  ;;  %s3346_s19 = smov 82  }
  0x24   : > { %460 = vrot.lane.b32.xlu0 %v539_v9, %s3333_s22 }
  0x25   : > { %481 = vrot.lane.b32.xlu1 %v535_v7, %s3332_s21 }
  0x28   : > { %501 = vrot.lane.b32.xlu0 %v539_v9, %s3331_s20 }
  0x29   : > { %522 = vrot.lane.b32.xlu1 %v535_v7, %s3334_s23 }
  0x2c   : > { %458 = vrot.lane.b32.xlu0 %v535_v7, %s3333_s22  ;;  %s3348_s22 = smov 83  }
  0x2d   : > { %479 = vrot.lane.b32.xlu1 %v477_v12, %s3332_s21 }
  0x30   : > { %499 = vrot.lane.b32.xlu0 %v535_v7, %s3331_s20  ;;  %s3347_s20 = smov 104  }
  0x31   : > { %520 = vrot.lane.b32.xlu1 %v477_v12, %s3334_s23  ;;  %s2997_s23 = sshll.u32 %s4212_s14, 3 }
  0x32   : > { %s374_s28 = scalar_lea.vmem %s4201_s1, %s2997_s23  ;;  %s3349_s23 = smov 105  }
  0x34   : > { %398 = vrot.lane.b32.xlu0 %v535_v7, %s3335_s24 }
  0x35   : > { %419 = vrot.lane.b32.xlu1 %v539_v9, %s3337_s25 }
  0x38   : > { %440 = vrot.lane.b32.xlu0 %v535_v7, %s3338_s26 }
  0x39   : > { %396 = vrot.lane.b32.xlu1 %v477_v12, %s3335_s24 }
  0x3c   : > { %417 = vrot.lane.b32.xlu0 %v535_v7, %s3337_s25 }
  0x3d   : > { %438 = vrot.lane.b32.xlu1 %v477_v12, %s3338_s26  ;;  %s3350_s26 = smov 84  }
  0x40   : > { %583 = vperm.xlu0 %3058, %v580_v14  }
  0x82   : > { %v545_v15 = vpop.permute.xlu0 %544 }
  0x83   : > { %v504_v16 = vpop.permute.xlu1 %503  ;;  %554 = vst.msk [vmem:[#allocation2 + $0x70] sm:$0xf] %vm388_vm0, %v545_v15 }
  0x84   : > { %513 = vst.msk [vmem:[#allocation2 + $0x58] sm:$0xf] %vm388_vm0, %v504_v16 }
  0x86   : > { %v463_v18 = vpop.permute.xlu0 %462 }
  0x87   : > { %v484_v17 = vpop.permute.xlu1 %483  ;;  %472 = vst.msk [vmem:[#allocation2 + $0x40] sm:$0xf] %vm388_vm0, %v463_v18 }
  0x88   : > { %493 = vst.msk [vmem:[#allocation2 + $0x40] sm:$0xf0] %vm410_vm2, %v484_v17 }
  0x8a   : > { %v525_v19 = vpop.permute.xlu0 %524  ;;  %v570_v21 = vld [vmem:[#allocation2 + $0x70] sm:$0xf] }
  0x8b   : > { %v3449_v20 = vpop.permute.xlu1 %400  ;;  %534 = vst.msk [vmem:[#allocation2 + $0x58] sm:$0xf0] %vm410_vm2, %v525_v19  ;;  %v579_v22 = vpack.c.bf16 %v570_v21, %v570_v21  ;;  %v3068_v21 = vld [vmem:[%s4202_s2 + $0xe4] ss:$16 sps:$4 sm:$0xff]  }
  0x8c   : > { %411 = vst.msk [vmem:[#allocation2 + $0x10] sm:$0xf0] %vm410_vm2, %v3449_v20 }
  0x8d   : > { %v598_v23 = vsel %vm590_vm3, %v579_v22, 0 }
  0x8e   : > { %3008 = vmatpush3.bf16.msra.mxu1 %v598_v23  ;;  %v3455_v24 = vpop.permute.xlu0 %421  ;;  %v3066_v23 = vld [vmem:[%s4202_s2 + $0xe0] ss:$16 sps:$4 sm:$0xff]  }
  0x8f   : > { %v3457_v25 = vpop.permute.xlu1 %442  ;;  %431 = vst.msk [vmem:[#allocation2 + $0x28] sm:$0xf] %vm388_vm0, %v3455_v24  ;;  %3009 = vmatprep.subr.bf16.mxu1 %v3329_v0  ;;  %v564_v28 = vld [vmem:[#allocation2 + $0x40] sm:$0xff]  ;;  %vm1321_vm0 = vmor %vm1320_vm15, %vm1319_vm14  ;;  %vm1403_vm14 = vcmask 875520   ;;  %vm2179_vm15 = vcmask 1043456  }
  0x90   : > { %452 = vst.msk [vmem:[#allocation2 + $0x28] sm:$0xf0] %vm410_vm2, %v3457_v25 }
  0x92   : > { %v541_v26 = vpop.permute.xlu0 %540  ;;  %v567_v29 = vld [vmem:[#allocation2 + $0x58] sm:$0xff] }
  0x93   : > { %v543_v27 = vpop.permute.xlu1 %542  ;;  %v576_v32 = vpack.c.bf16 %v567_v29, %v564_v28  ;;  %v558_v35 = vld [vmem:[#allocation2 + $0x10] sm:$0xff] }
  0x94   : > { %v547_v30 = vsel %vm546_vm4, %v541_v26, %v543_v27  ;;  %v548_v31 = vsel %vm546_vm4, %v543_v27, %v545_v15  ;;  %v3074_v26 = vld [vmem:[%s4202_s2 + $0xa4] ss:$16 sps:$4 sm:$0xff]   ;;  %v3072_v27 = vld [vmem:[%s4202_s2 + $0xa0] ss:$16 sps:$4 sm:$0xff]   ;;  %vm1330_vm4 = vcmask 846848  }
  0x95   : > { %552 = vst [vmem:[#allocation2 + $0x60] sm:$0xf] %v547_v30  ;;  %553 = vst [vmem:[#allocation2 + $0x68] sm:$0xf] %v548_v31  ;;  %3010 = vmatpush3.bf16.msra.mxu1 %v576_v32  ;;  %v3077_v28 = vld [vmem:[%s4202_s2 + $0x84] ss:$16 sps:$4 sm:$0xff]  }
  0x96   : > { %v461_v33 = vpop.permute.xlu0 %460  ;;  %3011 = vmatprep.subr.bf16.mxu1 %v3329_v0  ;;  %v3075_v29 = vld [vmem:[%s4202_s2 + $0x80] ss:$16 sps:$4 sm:$0xff]   ;;  %v3080_v30 = vld [vmem:[%s4202_s2 + $0x64] ss:$16 sps:$4 sm:$0xff]  }
  0x97   : > { %v482_v34 = vpop.permute.xlu1 %481  ;;  %v561_v36 = vld [vmem:[#allocation2 + $0x28] sm:$0xff]  ;;  %v466_v38 = vsel %vm464_vm5, %v461_v33, %v463_v18  ;;  %v3078_v31 = vld [vmem:[%s4202_s2 + $0x60] ss:$16 sps:$4 sm:$0xff]   ;;  %v3086_v32 = vld [vmem:[%s4202_s2 + $0x44] ss:$16 sps:$4 sm:$0xff]  }
  0x98   : > { %v487_v39 = vsel %vm485_vm6, %v482_v34, %v484_v17  ;;  %v573_v40 = vpack.c.bf16 %v561_v36, %v558_v35  ;;  %471 = vst [vmem:[#allocation2 + $0x38] sm:$0xf] %v466_v38  ;;  %v3087_v35 = vld [vmem:[%s4202_s2 + $0x200] ss:$16 sps:$4 sm:$0xff]   ;;  %v3092_v36 = vld [vmem:[%s4202_s2 + $0x24] ss:$16 sps:$4 sm:$0xff]  }
  0x99   : > { %492 = vst [vmem:[#allocation2 + $0x38] sm:$0xf0] %v487_v39  ;;  %v3095_v38 = vld [vmem:[%s4202_s2 + $0xec] ss:$16 sps:$4 sm:$0xff]   ;;  %v3098_v39 = vld [vmem:[%s4202_s2 + $0x4] ss:$16 sps:$4 sm:$0xff]  }
  0x9a   : > { %3012 = vmatpush3.bf16.msra.mxu1 %v573_v40  ;;  %v502_v43 = vpop.permute.xlu0 %501  ;;  %v3096_v40 = vld [vmem:[%s4202_s2] ss:$16 sps:$4 sm:$0xff]  }
  0x9b   : > { %v523_v44 = vpop.permute.xlu1 %522  ;;  %1176 = vmatprep.subr.bf16.mxu1 %v3083_v37  ;;  %v507_v45 = vsel %vm505_vm7, %v502_v43, %v504_v16  ;;  %v3090_v37 = vld [vmem:[%s4202_s2 + $0x20] ss:$16 sps:$4 sm:$0xff]  }
  0x9c   : > { %v528_v46 = vsel %vm526_vm8, %v523_v44, %v525_v19  ;;  %v569_v47 = vld [vmem:[#allocation2 + $0x68] sm:$0xf]  ;;  %v568_v48 = vld [vmem:[#allocation2 + $0x60] sm:$0xf]  ;;  %512 = vst [vmem:[#allocation2 + $0x50] sm:$0xf] %v507_v45 }
  0x9d   : > { %533 = vst [vmem:[#allocation2 + $0x50] sm:$0xf0] %v528_v46  ;;  %3014 = vmatmul.mubr.msk.bf16.vlgmr.msra.gmra.mxu1 %vm586_vm9, %v3473_v41  ;;  %v578_v49 = vpack.c.bf16 %v569_v47, %v569_v47  ;;  %v577_v50 = vpack.c.bf16 %v568_v48, %v568_v48  ;;  %v3114_v45 = vld [vmem:[%s4202_s2 + $0x1a0] ss:$16 sps:$4 sm:$0xff]   ;;  %v3116_v46 = vld [vmem:[%s4202_s2 + $0x1a4] ss:$16 sps:$4 sm:$0xff]  }
  0x9e   : > { %1177 = vmatpush1.bf16.msra.mxu1 %v3081_v42  ;;  %1196 = vmatprep.mubr.bf16.mxu1 %v3339_v13  ;;  %v459_v51 = vpop.permute.xlu0 %458  ;;  %v3104_v42 = vld [vmem:[%s4202_s2 + $0x1e4] ss:$16 sps:$4 sm:$0xff]   ;;  %v3120_v47 = vld [vmem:[%s4202_s2 + $0x180] ss:$16 sps:$4 sm:$0xff]  }
  0x9f   : > { %2814 = vmatprep.subr.msk.bf16.mxu0 %vm590_vm3, %v578_v49  ;;  %v480_v52 = vpop.permute.xlu1 %479  ;;  %v592_v53 = vsel %vm590_vm3, %v577_v50, 0  ;;  %v465_v54 = vsel %vm464_vm5, %v459_v51, %v461_v33  ;;  %v3084_v33 = vld [vmem:[%s4202_s2 + $0x40] ss:$16 sps:$4 sm:$0xff]   ;;  %v3122_v48 = vld [vmem:[%s4202_s2 + $0x184] ss:$16 sps:$4 sm:$0xff]   ;;  %vm1495_vm5 = vcmask 703488  }
  0xa0   : > { %v486_v55 = vsel %vm485_vm6, %v480_v52, %v482_v34  ;;  %611 = vmatpush1.bf16.msra.mxu0 %v592_v53  ;;  %470 = vst [vmem:[#allocation2 + $0x30] sm:$0xf] %v465_v54  ;;  %v563_v60 = vld [vmem:[#allocation2 + $0x38] sm:$0xff]  ;;  %v3089_v34 = vld [vmem:[%s4202_s2 + $0x204] ss:$16 sps:$4 sm:$0xff]  }
  0xa1   : > { %491 = vst [vmem:[#allocation2 + $0x30] sm:$0xf0] %v486_v55  ;;  %1178 = vmatprep.subr.bf16.mxu1 %v3089_v34  ;;  %v3126_v49 = vld [vmem:[%s4202_s2 + $0x160] ss:$16 sps:$4 sm:$0xff]   ;;  %v3128_v50 = vld [vmem:[%s4202_s2 + $0x164] ss:$16 sps:$4 sm:$0xff]  }
  0xa2   : > { %v500_v56 = vpop.permute.xlu0 %499  ;;  %1179 = vmatpush1.bf16.msra.mxu1 %v3087_v35  ;;  %v3132_v51 = vld [vmem:[%s4202_s2 + $0x140] ss:$16 sps:$4 sm:$0xff]   ;;  %v3134_v52 = vld [vmem:[%s4202_s2 + $0x144] ss:$16 sps:$4 sm:$0xff]   ;;  %v3155_v34 = vld [vmem:[%s4202_s2 + $0x1ac] ss:$16 sps:$4 sm:$0xff]  }
  0xa3   : > { %v521_v57 = vpop.permute.xlu1 %520  ;;  %v506_v58 = vsel %vm505_vm7, %v500_v56, %v502_v43  ;;  %1205 = vmatprep.subr.bf16.mxu1 %v3095_v38  ;;  %v3108_v43 = vld [vmem:[%s4202_s2 + $0x1c0] ss:$16 sps:$4 sm:$0xff]   ;;  %v3140_v53 = vld [vmem:[%s4202_s2 + $0x124] ss:$16 sps:$4 sm:$0xff]   ;;  %v3158_v35 = vld [vmem:[%s4202_s2 + $0x20c] ss:$16 sps:$4 sm:$0xff]  }
  0xa4   : > { %v527_v59 = vsel %vm526_vm8, %v521_v57, %v523_v44  ;;  %v566_v61 = vld [vmem:[#allocation2 + $0x50] sm:$0xff]  ;;  %511 = vst [vmem:[#allocation2 + $0x48] sm:$0xf] %v506_v58  ;;  %v3152_v57 = vld [vmem:[%s4202_s2 + $0x22c] ss:$16 sps:$4 sm:$0xff]   ;;  %vm1471_vm7 = vcmask 711680  }
  0xa5   : > { %532 = vst [vmem:[#allocation2 + $0x48] sm:$0xf0] %v527_v59  ;;  %v575_v62 = vpack.c.bf16 %v566_v61, %v563_v60  ;;  %v3110_v44 = vld [vmem:[%s4202_s2 + $0x1c4] ss:$16 sps:$4 sm:$0xff]   ;;  %v3138_v54 = vld [vmem:[%s4202_s2 + $0x120] ss:$16 sps:$4 sm:$0xff]  }
  0xa6   : > { %v399_v1 = vpop.permute.xlu0 %398  ;;  %v3146_v55 = vld [vmem:[%s4202_s2 + $0x104] ss:$16 sps:$4 sm:$0xff]   ;;  %v3144_v56 = vld [vmem:[%s4202_s2 + $0x100] ss:$16 sps:$4 sm:$0xff]   ;;  %v3161_v38 = vld [vmem:[%s4202_s2 + $0x18c] ss:$16 sps:$4 sm:$0xff]  }
  0xa7   : > { %612 = vmatprep.subr.bf16.mxu0 %v575_v62  ;;  %v420_v63 = vpop.permute.xlu1 %419  ;;  %v404_v3 = vsel %vm402_vm11, %v399_v1, %v3449_v20  ;;  %vm1351_vm8 = vcmask 850948  }
  0xa8   : > { %v425_v2 = vsel %vm423_vm10, %v420_v63, %v3455_v24  ;;  %409 = vst [vmem:[#allocation2 + $0x8] sm:$0xf0] %v404_v3  ;;  %v562_v4 = vld [vmem:[#allocation2 + $0x30] sm:$0xff]  ;;  %v3101_v3 = vld [vmem:[%s4202_s2 + $0xcc] ss:$16 sps:$4 sm:$0xff]  }
  0xa9   : > { %430 = vst [vmem:[#allocation2 + $0x20] sm:$0xf] %v425_v2  ;;  %v3071_v24 = vld [vmem:[%s4202_s2 + $0xc4] ss:$16 sps:$4 sm:$0xff]  }
  0xaa   : > { %v441_v5 = vpop.permute.xlu0 %440 }
  0xab   : > { %v397_v6 = vpop.permute.xlu1 %396  ;;  %v446_v7 = vsel %vm444_vm12, %v441_v5, %v3457_v25  ;;  %v3069_v25 = vld [vmem:[%s4202_s2 + $0xc0] ss:$16 sps:$4 sm:$0xff]  }
  0xac   : > { %v403_v8 = vsel %vm402_vm11, %v397_v6, %v399_v1  ;;  %v565_v9 = vld [vmem:[#allocation2 + $0x48] sm:$0xff]  ;;  %451 = vst [vmem:[#allocation2 + $0x20] sm:$0xf0] %v446_v7 }
  0xad   : > { %408 = vst [vmem:[#allocation2] sm:$0xf0] %v403_v8  ;;  %v574_v10 = vpack.c.bf16 %v565_v9, %v562_v4  ;;  %v3093_v1 = vld [vmem:[%s4202_s2 + $0xe8] ss:$16 sps:$4 sm:$0xff]   ;;  %v3107_v6 = vld [vmem:[%s4202_s2 + $0xac] ss:$16 sps:$4 sm:$0xff]  }
  0xae   : > { %v418_v11 = vpop.permute.xlu0 %417  ;;  %v3105_v7 = vld [vmem:[%s4202_s2 + $0xa8] ss:$16 sps:$4 sm:$0xff]   ;;  %v3113_v8 = vld [vmem:[%s4202_s2 + $0x8c] ss:$16 sps:$4 sm:$0xff]  }
  0xaf   : > { %v439_v12 = vpop.permute.xlu1 %438  ;;  %613 = vmatpush1.bf16.msra.mxu0 %v574_v10  ;;  %v424_v14 = vsel %vm423_vm10, %v418_v11, %v420_v63  ;;  %v557_v16 = vld [vmem:[#allocation2 + $0x8] sm:$0xff] }
  0xb0   : > { %v445_v15 = vsel %vm444_vm12, %v439_v12, %v441_v5  ;;  %429 = vst [vmem:[#allocation2 + $0x18] sm:$0xf] %v424_v14  ;;  %v3099_v5 = vld [vmem:[%s4202_s2 + $0xc8] ss:$16 sps:$4 sm:$0xff]   ;;  %v3119_v10 = vld [vmem:[%s4202_s2 + $0x6c] ss:$16 sps:$4 sm:$0xff]  }
  0xb1   : > { %450 = vst [vmem:[#allocation2 + $0x18] sm:$0xf0] %v445_v15  ;;  %v3111_v9 = vld [vmem:[%s4202_s2 + $0x88] ss:$16 sps:$4 sm:$0xff]   ;;  %v3125_v12 = vld [vmem:[%s4202_s2 + $0x4c] ss:$16 sps:$4 sm:$0xff]  }
  0xb2   : > { %v3117_v11 = vld [vmem:[%s4202_s2 + $0x68] ss:$16 sps:$4 sm:$0xff]   ;;  %v3131_v15 = vld [vmem:[%s4202_s2 + $0x2c] ss:$16 sps:$4 sm:$0xff]   ;;  %vm1447_vm12 = vcmask 719872  }
  0xb3   : > { %v560_v17 = vld [vmem:[#allocation2 + $0x20] sm:$0xff]  ;;  %v3123_v14 = vld [vmem:[%s4202_s2 + $0x48] ss:$16 sps:$4 sm:$0xff]  }
  0xb4   : > { %v572_v18 = vpack.c.bf16 %v560_v17, %v557_v16  ;;  %v556_v19 = vld [vmem:[#allocation2] sm:$0xff]  ;;  %v3129_v16 = vld [vmem:[%s4202_s2 + $0x28] ss:$16 sps:$4 sm:$0xff]   ;;  %v3137_v17 = vld [vmem:[%s4202_s2 + $0xc] ss:$16 sps:$4 sm:$0xff]  }
  0xb6   : > { %614 = vmatprep.subr.bf16.mxu0 %v572_v18  ;;  %v3135_v18 = vld [vmem:[%s4202_s2 + $0x8] ss:$16 sps:$4 sm:$0xff]  }
  0xb8   : > { %v559_v20 = vld [vmem:[#allocation2 + $0x18] sm:$0xff] }
  0xb9   : > { %v571_v22 = vpack.c.bf16 %v559_v20, %v556_v19  ;;  %v3143_v20 = vld [vmem:[%s4202_s2 + $0x1ec] ss:$16 sps:$4 sm:$0xff]  }
  0xbb   : > { %615 = vmatpush1.bf16.msra.mxu0 %v571_v22  ;;  %v584_v58 = vpop.permute.xlu0 %583 }
  0xbc   : > { %1123 = vmatprep.subr.bf16.mxu0 %v3068_v21 }
  0xbe   : > { %2815 = vmatmul.mubr.msk.bf16.vlgmr.msra.gmra.mxu0 %vm586_vm9, %v3473_v41  ;;  %v3102_v41 = vld [vmem:[%s4202_s2 + $0x1e0] ss:$16 sps:$4 sm:$0xff]  }
  0xbf   : > { %1124 = vmatpush1.bf16.msra.mxu0 %v3066_v23 }
  0xc0   : > { %1125 = vmatprep.subr.bf16.mxu0 %v3071_v24  ;;  %v3141_v24 = vld [vmem:[%s4202_s2 + $0x1e8] ss:$16 sps:$4 sm:$0xff]  }
  0xc3   : > { %1126 = vmatpush1.bf16.msra.mxu0 %v3069_v25 }
  0xc4   : > { %1127 = vmatprep.subr.bf16.mxu0 %v3074_v26  ;;  %v3149_v26 = vld [vmem:[%s4202_s2 + $0x1cc] ss:$16 sps:$4 sm:$0xff]  }
  0xc7   : > { %1128 = vmatpush1.bf16.msra.mxu0 %v3072_v27 }
  0xc8   : > { %1129 = vmatprep.subr.bf16.mxu0 %v3077_v28 }
  0xcb   : > { %1130 = vmatpush1.bf16.msra.mxu0 %v3075_v29 }
  0xcc   : > { %1131 = vmatprep.subr.bf16.mxu0 %v3080_v30 }
  0xcf   : > { %1132 = vmatpush1.bf16.msra.mxu0 %v3078_v31  ;;  %v3147_v31 = vld [vmem:[%s4202_s2 + $0x1c8] ss:$16 sps:$4 sm:$0xff]  }
  0xd0   : > { %1133 = vmatprep.subr.bf16.mxu0 %v3086_v32  ;;  %v3150_v32 = vld [vmem:[%s4202_s2 + $0x228] ss:$16 sps:$4 sm:$0xff]  }
  0xd3   : > { %1134 = vmatpush1.bf16.msra.mxu0 %v3084_v33 }
  0xd4   : > { %1135 = vmatprep.subr.bf16.mxu0 %v3092_v36  ;;  %v3153_v36 = vld [vmem:[%s4202_s2 + $0x1a8] ss:$16 sps:$4 sm:$0xff]  }
  0xd7   : > { %1136 = vmatpush1.bf16.msra.mxu0 %v3090_v37  ;;  %v3156_v37 = vld [vmem:[%s4202_s2 + $0x208] ss:$16 sps:$4 sm:$0xff]  }
  0xd8   : > { %1137 = vmatprep.subr.bf16.mxu0 %v3098_v39  ;;  %v3159_v39 = vld [vmem:[%s4202_s2 + $0x188] ss:$16 sps:$4 sm:$0xff]  }
  0xdb   : > { %1138 = vmatpush1.bf16.msra.mxu0 %v3096_v40  ;;  %v3164_v40 = vld [vmem:[%s4202_s2 + $0x16c] ss:$16 sps:$4 sm:$0xff]  }
  0xdc   : > { %1139 = vmatprep.subr.bf16.mxu0 %v3104_v42  ;;  %v3167_v42 = vld [vmem:[%s4202_s2 + $0x14c] ss:$16 sps:$4 sm:$0xff]  }
  0xdf   : > { %1140 = vmatpush2.bf16.msra.mxu0 %v3102_v41  ;;  %v3162_v41 = vld [vmem:[%s4202_s2 + $0x168] ss:$16 sps:$4 sm:$0xff]  }
  0xe0   : > { %1141 = vmatprep.subr.bf16.mxu0 %v3110_v44  ;;  %v3170_v44 = vld [vmem:[%s4202_s2 + $0x12c] ss:$16 sps:$4 sm:$0xff]  }
  0xe3   : > { %1142 = vmatpush2.bf16.msra.mxu0 %v3108_v43  ;;  %v3165_v43 = vld [vmem:[%s4202_s2 + $0x148] ss:$16 sps:$4 sm:$0xff]  }
  0xe4   : > { %1143 = vmatprep.subr.bf16.mxu0 %v3116_v46  ;;  %v3173_v46 = vld [vmem:[%s4202_s2 + $0x10c] ss:$16 sps:$4 sm:$0xff]  }
  0xe7   : > { %1144 = vmatpush2.bf16.msra.mxu0 %v3114_v45  ;;  %v3168_v45 = vld [vmem:[%s4202_s2 + $0x128] ss:$16 sps:$4 sm:$0xff]  }
  0xe8   : > { %1145 = vmatprep.subr.bf16.mxu0 %v3122_v48  ;;  %v1299_v48 = vld [vmem:[%s374_s28] sm:$0xff] }
  0xeb   : > { %1146 = vmatpush2.bf16.msra.mxu0 %v3120_v47  ;;  %v3171_v47 = vld [vmem:[%s4202_s2 + $0x108] ss:$16 sps:$4 sm:$0xff]  }
  0xec   : > { %1147 = vmatprep.subr.bf16.mxu0 %v3128_v50  ;;  %v3340_v50 = vmov 1983009808  }
  0xef   : > { %1148 = vmatpush2.bf16.msra.mxu0 %v3126_v49  ;;  %v1301_v49 = vcombine.low %v1299_v48, %v1299_v48 }
  0xf0   : > { %1149 = vmatprep.subr.bf16.mxu0 %v3134_v52  ;;  %v1312_v52 = vlaneseq }
  0xf1   : > { %2891 = vst.sshfl [vmem:[#allocation3] sm:$0xf0 pattern:$0x76325410] %v1301_v49 }
  0xf3   : > { %1150 = vmatpush2.bf16.msra.mxu0 %v3132_v51  ;;  %v1310_v51 = vunpack.c.l.s4 %v3340_v50 }
  0xf4   : > { %1151 = vmatprep.subr.bf16.mxu0 %v3140_v53 }
  0xf5   : > { %v1311_v53 = vunpack.c.0.s8 %v1310_v51 }
  0xf7   : > { %1152 = vmatpush2.bf16.msra.mxu0 %v3138_v54  ;;  %v1313_v54 = vshrl.u32 %v1312_v52, 7 }
  0xf8   : > { %1153 = vmatprep.subr.bf16.mxu0 %v3146_v55 }
  0xf9   : > { %v1314_v55 = vsub.s32 %v1311_v53, %v1313_v54 }
  0xfb   : > { %1154 = vmatpush2.bf16.msra.mxu0 %v3144_v56  ;;  %v1315_v56 = vrot.slane %v1299_v48, %v1314_v55 }
  0xfc   : > { %1258 = vmatprep.subr.bf16.mxu0 %v3152_v57 }
  0xfd   : > { %1322 = vst.msk [vmem:[#allocation3 + $0x8] sm:$0xcc] %vm1321_vm0, %v1315_v56  ;;  %v1723_v56 = vld [vmem:[%s4203_s3 + $0x2c0] sm:$0xff]  ;;  %vm2365_vm0 = vcmask 834564  }
 0x15d   : > { %v675_v59 = vpop.f32.mrf.mxu1 }
 0x15e   : > { %v676_v60 = vadd.f32 %v675_v59, %v584_v58 }
 0x15f   : > { %v3015_v61 = vpop.f32.mrf.mxu1 }
 0x160   : > { %v683_v62 = vmax.f32 %v676_v60, 0.0 }
 0x161   : > { %v678_v63 = vpop.f32.mrf.mxu1 }
 0x162   : > { %v3609_v2 = vpack.c.bf16 %v683_v62, %v683_v62 }
 0x163   : > { %v3016_v4 = vpop.f32.mrf.mxu1 }
 0x164   : > { %2889 = vmatmul.mubr.msk.bf16.vlgmr.msra.gmra.mxu1 %vm1119_vm13, %v3609_v2 }
 0x165   : > { %1206 = vmatpush1.bf16.msra.mxu1 %v3093_v1 }
 0x166   : > { %1207 = vmatprep.subr.bf16.mxu1 %v3101_v3 }
 0x169   : > { %1208 = vmatpush1.bf16.msra.mxu1 %v3099_v5 }
 0x16a   : > { %1209 = vmatprep.subr.bf16.mxu1 %v3107_v6 }
 0x16d   : > { %1210 = vmatpush1.bf16.msra.mxu1 %v3105_v7 }
 0x16e   : > { %1211 = vmatprep.subr.bf16.mxu1 %v3113_v8 }
 0x171   : > { %1212 = vmatpush1.bf16.msra.mxu1 %v3111_v9 }
 0x172   : > { %1213 = vmatprep.subr.bf16.mxu1 %v3119_v10 }
 0x175   : > { %1214 = vmatpush1.bf16.msra.mxu1 %v3117_v11 }
 0x176   : > { %1215 = vmatprep.subr.bf16.mxu1 %v3125_v12 }
 0x179   : > { %1216 = vmatpush1.bf16.msra.mxu1 %v3123_v14 }
 0x17a   : > { %1217 = vmatprep.subr.bf16.mxu1 %v3131_v15 }
 0x17d   : > { %1218 = vmatpush1.bf16.msra.mxu1 %v3129_v16 }
 0x17e   : > { %v634_v19 = vpop.f32.mrf.mxu0  ;;  %1219 = vmatprep.subr.bf16.mxu1 %v3137_v17 }
 0x17f   : > { %v635_v21 = vadd.f32 %v634_v19, %v584_v58 }
 0x180   : > { %v636_v22 = vpop.f32.mrf.mxu0 }
 0x181   : > { %v637_v23 = vadd.f32 %v636_v22, %v584_v58  ;;  %1220 = vmatpush1.bf16.msra.mxu1 %v3135_v18  ;;  %v681_v25 = vmax.f32 %v635_v21, 0.0 }
 0x182   : > { %1221 = vmatprep.subr.bf16.mxu1 %v3143_v20  ;;  %v638_v27 = vpop.f32.mrf.mxu0 }
 0x183   : > { %v682_v28 = vmax.f32 %v637_v23, 0.0  ;;  %v684_v33 = vpack.c.bf16 %v681_v25, %v681_v25 }
 0x184   : > { %v639_v29 = vpop.f32.mrf.mxu0 }
 0x185   : > { %v685_v30 = vpack.c.bf16 %v682_v28, %v682_v28  ;;  %1222 = vmatpush2.bf16.msra.mxu1 %v3141_v24  ;;  %v1530_v29 = vld [vmem:[%s4207_s7] sm:$0xf] }
 0x186   : > { %1223 = vmatprep.subr.bf16.mxu1 %v3149_v26 }
 0x187   : > { %1155 = vmatprep.mubr.bf16.mxu0 %v685_v30  ;;  %1237 = vmatprep.mubr.bf16.mxu1 %v685_v30 }
 0x188   : > { %1156 = vmatmul.mubr.bf16.vlgmr.msra.gmra.mxu0 %v684_v33 }
 0x189   : > { %1224 = vmatpush2.bf16.msra.mxu1 %v3147_v31  ;;  %1259 = vmatpush1.bf16.msra.mxu0 %v3150_v32 }
 0x18a   : > { %1225 = vmatprep.subr.bf16.mxu1 %v3155_v34  ;;  %1260 = vmatprep.subr.bf16.mxu0 %v3158_v35 }
 0x18b   : > { %1278 = vmatprep.mubr.bf16.mxu0 %v3339_v13 }
 0x18d   : > { %1226 = vmatpush2.bf16.msra.mxu1 %v3153_v36  ;;  %1261 = vmatpush1.bf16.msra.mxu0 %v3156_v37 }
 0x18e   : > { %1227 = vmatprep.subr.bf16.mxu1 %v3161_v38 }
 0x190   : > { %2890 = vmatmul.mubr.msk.bf16.vlgmr.msra.gmra.mxu0 %vm1119_vm13, %v3609_v2  ;;  %vm1424_vm13 = vcmask 867328  }
 0x191   : > { %1228 = vmatpush2.bf16.msra.mxu1 %v3159_v39  ;;  %1580 = vmatprep.mubr.bf16.mxu0 %v3339_v13 }
 0x192   : > { %1229 = vmatprep.subr.bf16.mxu1 %v3164_v40 }
 0x195   : > { %1230 = vmatpush2.bf16.msra.mxu1 %v3162_v41 }
 0x196   : > { %1231 = vmatprep.subr.bf16.mxu1 %v3167_v42 }
 0x199   : > { %1232 = vmatpush2.bf16.msra.mxu1 %v3165_v43 }
 0x19a   : > { %1233 = vmatprep.subr.bf16.mxu1 %v3170_v44 }
 0x19d   : > { %1234 = vmatpush2.bf16.msra.mxu1 %v3168_v45 }
 0x19e   : > { %1235 = vmatprep.subr.bf16.mxu1 %v3173_v46 }
 0x1a1   : > { %1236 = vmatpush2.bf16.msra.mxu1 %v3171_v47 }
 0x1a2   : > { %3017 = vmatprep.subr.bf16.mxu1 %v3329_v0 }
 0x1a4   : > { %1238 = vmatmul.mubr.bf16.vlgmr.msra.gmra.mxu1 %v684_v33 }
 0x1a5   : > { %3023 = vmatprep.mubr.msk.bf16.mxu1 %vm3336_vm1, %v3329_v0  ;;  %vm1296_vm1 = vcmask 144388  }
 0x1a6   : > { %vm1297_vm2 = vmor %vm1296_vm1, %vm590_vm3 }
 0x1a7   : > { %vm2366_vm1 = vmor %vm2365_vm0, %vm2179_vm15 }
 0x224   : > { %v1198_v57 = vpop.f32.mrf.mxu1 }
 0x226   : > { %v1200_v58 = vpop.f32.mrf.mxu1 }
 0x228   : > { %v1202_v59 = vpop.f32.mrf.mxu1 }
 0x22a   : > { %v1203_v60 = vpop.f32.mrf.mxu1 }
 0x248   : > { %v1157_v61 = vpop.f32.mrf.mxu0 }
 0x249   : > { %v1199_v63 = vadd.f32 %v1198_v57, %v1157_v61  ;;  %v2984_v61 = vcombine.high %v1723_v56, %v1723_v56 }
 0x24a   : > { %v1159_v62 = vpop.f32.mrf.mxu0 }
 0x24b   : > { %v1201_v1 = vadd.f32 %v1200_v58, %v1159_v62  ;;  %v2983_v62 = vcombine.low %v1723_v56, %v1723_v56  ;;  %v3188_v56 = vld [vmem:[%s4203_s3 + $0xc4] ss:$16 sps:$4 sm:$0xff]  }
 0x24c   : > { %v1161_v2 = vpop.f32.mrf.mxu0 }
 0x24d   : > { %v1291_v3 = vcombine.low %v1199_v63, %v1201_v1 }
 0x24e   : > { %v1162_v4 = vpop.f32.mrf.mxu0 }
 0x24f   : > { %1295 = vst [vmem:[#allocation3] sm:$0x33] %v1291_v3 }
 0x250   : > { %v1280_v5 = vpop.f32.mrf.mxu0 }
 0x252   : > { %v1282_v6 = vpop.f32.mrf.mxu0 }
 0x254   : > { %v1284_v7 = vpop.f32.mrf.mxu0 }
 0x255   : > { %v2181_v7 = vsel %vm2179_vm15, %v2983_v62, 0  ;;  %v3206_v62 = vld [vmem:[%s4203_s3 + $0x64] ss:$16 sps:$4 sm:$0xff]  }
 0x256   : > { %v1323_v8 = vld [vmem:[#allocation3] sm:$0xff]  ;;  %v1285_v9 = vpop.f32.mrf.mxu0 }
 0x257   : > { %v1326_v10 = vcombine.high %v1323_v8, %v1323_v8  ;;  %1328 = vst [vmem:[#allocation4] sm:$0xf] %v1323_v8  ;;  %v1416_v28 = vcombine.low %v1323_v8, %v1323_v8 }
 0x259   : > { %1329 = vst [vmem:[#allocation4 + $0x8] sm:$0xf] %v1326_v10 }
 0x264   : > { %v1239_v11 = vpop.f32.mrf.mxu1 }
 0x265   : > { %v1281_v14 = vadd.f32 %v1280_v5, %v1239_v11  ;;  %v3781_v5 = vld [vmem:[%s4206_s6] sm:$0x3] }
 0x266   : > { %v1241_v12 = vpop.f32.mrf.mxu1 }
 0x267   : > { %v1283_v15 = vadd.f32 %v1282_v6, %v1241_v12 }
 0x268   : > { %v1243_v16 = vpop.f32.mrf.mxu1 }
 0x269   : > { %v1292_v17 = vcombine.low %v1281_v14, %v1283_v15  ;;  %v3189_v14 = vld [vmem:[%s4203_s3 + $0x2a0] ss:$16 sps:$4 sm:$0xff]  }
 0x26a   : > { %v1244_v18 = vpop.f32.mrf.mxu1 }
 0x26b   : > { %1298 = vst.msk [vmem:[#allocation3 + $0x8] sm:$0x33] %vm1297_vm2, %v1292_v17  ;;  %v3197_v18 = vld [vmem:[%s4203_s3 + $0x284] ss:$16 sps:$4 sm:$0xff]   ;;  %vm2379_vm2 = vcmask 453632  }
 0x272   : > { %v1482_v19 = vld [vmem:[#allocation3 + $0x8] sm:$0xff] }
 0x273   : > { %1491 = vrot.lane.b32.xlu1 %v1482_v19, %s3341_s29  ;;  %1443 = vrot.lane.b32.xlu0 %v1482_v19, %s3342_s30  ;;  %v1324_v20 = vld [vmem:[#allocation3 + $0x8] sm:$0xf]  ;;  %v1486_v22 = vcombine.high %v1482_v19, %v1482_v19  ;;  %v1462_v23 = vcombine.low %v1482_v19, %v1482_v19 }
 0x274   : > { %v1393_v21 = vld [vmem:[#allocation3 + $0x8] sm:$0xf]  ;;  %1331 = vst.msk [vmem:[#allocation4 + $0x10] sm:$0xf] %vm1330_vm4, %v1324_v20 }
 0x275   : > { %v3178_v24 = vld [vmem:[#allocation3 + $0x8] ss:$0 sps:$4 sm:$0xff]  }
 0x276   : > { %v3179_v25 = vld [vmem:[#allocation3 + $0x8] ss:$0 sps:$4 sm:$0xff]  }
 0x277   : > { %1469 = vrot.lane.b32.xlu1 %v1482_v19, %s3343_s11  ;;  %1401 = vrot.lane.b32.xlu0 %v1393_v21, %s3344_s12  ;;  %v3180_v26 = vld [vmem:[#allocation3 + $0x8] ss:$0 sps:$4 sm:$0xff]  }
 0x278   : > { %v1354_v27 = vld [vmem:[#allocation3 + $0x8] sm:$0xf] }
 0x279   : > { %v3195_v21 = vld [vmem:[%s4203_s3 + $0x280] ss:$16 sps:$4 sm:$0xff]  }
 0x27b   : > { %1493 = vrot.lane.b32.xlu1 %v1486_v22, %s3341_s29  ;;  %1467 = vrot.lane.b32.xlu0 %v1462_v23, %s3343_s11 }
 0x27f   : > { %1445 = vrot.lane.b32.xlu1 %v1486_v22, %s3342_s30  ;;  %1342 = vrot.lane.b32.xlu0 %v3178_v24, %s3335_s24  ;;  %v3203_v24 = vld [vmem:[%s4203_s3 + $0x264] ss:$16 sps:$4 sm:$0xff]  }
 0x283   : > { %1422 = vrot.lane.b32.xlu1 %v3179_v25, %s3345_s15  ;;  %1382 = vrot.lane.b32.xlu0 %v3180_v26, %s3332_s21 }
 0x287   : > { %1362 = vrot.lane.b32.xlu1 %v1354_v27, %s3337_s25  ;;  %1489 = vrot.lane.b32.xlu0 %v1326_v10, %s3341_s29 }
 0x28b   : > { %1487 = vrot.lane.b32.xlu1 %v1323_v8, %s3341_s29  ;;  %1420 = vrot.lane.b32.xlu0 %v1323_v8, %s3345_s15 }
 0x28f   : > { %1399 = vrot.lane.b32.xlu1 %v1326_v10, %s3344_s12  ;;  %1465 = vrot.lane.b32.xlu0 %v1323_v8, %s3343_s11 }
 0x293   : > { %1441 = vrot.lane.b32.xlu1 %v1326_v10, %s3342_s30  ;;  %1418 = vrot.lane.b32.xlu0 %v1416_v28, %s3345_s15 }
 0x297   : > { %1397 = vrot.lane.b32.xlu1 %v1323_v8, %s3344_s12  ;;  %1463 = vrot.lane.b32.xlu0 %v1416_v28, %s3343_s11 }
 0x29b   : > { %1439 = vrot.lane.b32.xlu1 %v1323_v8, %s3342_s30  ;;  %1360 = vrot.lane.b32.xlu0 %v1326_v10, %s3337_s25 }
 0x29f   : > { %1340 = vrot.lane.b32.xlu1 %v1323_v8, %s3335_s24  ;;  %1338 = vrot.lane.b32.xlu0 %v1416_v28, %s3335_s24 }
 0x2a3   : > { %1380 = vrot.lane.b32.xlu1 %v1323_v8, %s3332_s21  ;;  %1378 = vrot.lane.b32.xlu0 %v1416_v28, %s3332_s21 }
 0x2a7   : > { %1358 = vrot.lane.b32.xlu1 %v1323_v8, %s3337_s25  ;;  %v3191_v8 = vld [vmem:[%s4203_s3 + $0x2a4] ss:$16 sps:$4 sm:$0xff]  }
 0x2ab   : > { %1533 = vperm.xlu1 %3059, %v1530_v29  }
 0x2e5   : > { %v1492_v30 = vpop.permute.xlu1 %1491  ;;  %v3744_v31 = vpop.permute.xlu0 %1443 }
 0x2e9   : > { %v1470_v32 = vpop.permute.xlu1 %1469  ;;  %v1402_v33 = vpop.permute.xlu0 %1401 }
 0x2ea   : > { %1411 = vst.msk [vmem:[#allocation4 + $0x40] sm:$0xf] %vm1330_vm4, %v1402_v33 }
 0x2ed   : > { %v1494_v34 = vpop.permute.xlu1 %1493  ;;  %v1468_v35 = vpop.permute.xlu0 %1467 }
 0x2ee   : > { %v1498_v36 = vsel %vm1495_vm5, %v1492_v30, %v1494_v34  ;;  %v1474_v37 = vsel %vm1471_vm7, %v1468_v35, %v1470_v32 }
 0x2ef   : > { %1504 = vst.msk [vmem:[#allocation4 + $0x70] sm:$0xf] %vm1330_vm4, %v1498_v36  ;;  %v3207_v36 = vld [vmem:[%s4203_s3 + $0x240] ss:$16 sps:$4 sm:$0xff]  }
 0x2f0   : > { %1480 = vst.msk [vmem:[#allocation4 + $0x58] sm:$0xf0] %vm1351_vm8, %v1474_v37 }
 0x2f1   : > { %v1446_v38 = vpop.permute.xlu1 %1445  ;;  %v3751_v39 = vpop.permute.xlu0 %1342 }
 0x2f2   : > { %v1450_v40 = vsel %vm1447_vm12, %v3744_v31, %v1446_v38  ;;  %1352 = vst.msk [vmem:[#allocation4 + $0x10] sm:$0xf0] %vm1351_vm8, %v3751_v39 }
 0x2f3   : > { %1456 = vst.msk [vmem:[#allocation4 + $0x58] sm:$0xf] %vm1330_vm4, %v1450_v40  ;;  %v3215_v40 = vld [vmem:[%s4203_s3 + $0x224] ss:$16 sps:$4 sm:$0xff]  }
 0x2f5   : > { %v1423_v41 = vpop.permute.xlu1 %1422  ;;  %v3758_v42 = vpop.permute.xlu0 %1382 }
 0x2f6   : > { %1432 = vst.msk [vmem:[#allocation4 + $0x40] sm:$0xf0] %vm1351_vm8, %v1423_v41  ;;  %1391 = vst.msk [vmem:[#allocation4 + $0x28] sm:$0xf0] %vm1351_vm8, %v3758_v42  ;;  %v1520_v43 = vld [vmem:[#allocation4 + $0x70] sm:$0xf] }
 0x2f7   : > { %v1529_v44 = vpack.c.bf16 %v1520_v43, %v1520_v43  ;;  %vm2548_vm8 = vcmask 678912  }
 0x2f9   : > { %v3763_v45 = vpop.permute.xlu1 %1362  ;;  %v1490_v46 = vpop.permute.xlu0 %1489  ;;  %v1546_v47 = vsel %vm590_vm3, %v1529_v44, 0  ;;  %v1508_v59 = vld [vmem:[#allocation4 + $0x10] sm:$0xff] }
 0x2fa   : > { %1371 = vst.msk [vmem:[#allocation4 + $0x28] sm:$0xf] %vm1330_vm4, %v3763_v45  ;;  %v1497_v48 = vsel %vm1495_vm5, %v1490_v46, %v1492_v30  ;;  %3018 = vmatpush3.bf16.msra.mxu1 %v1546_v47  ;;  %v1517_v52 = vld [vmem:[#allocation4 + $0x58] sm:$0xff]  ;;  %vm2574_vm4 = vcmask 670720  }
 0x2fb   : > { %1503 = vst [vmem:[#allocation4 + $0x68] sm:$0xf] %v1497_v48  ;;  %3019 = vmatprep.subr.bf16.mxu1 %v3329_v0  ;;  %v3201_v30 = vld [vmem:[%s4203_s3 + $0x260] ss:$16 sps:$4 sm:$0xff]  }
 0x2fd   : > { %v1488_v49 = vpop.permute.xlu1 %1487  ;;  %v1421_v50 = vpop.permute.xlu0 %1420  ;;  %v1514_v51 = vld [vmem:[#allocation4 + $0x40] sm:$0xff] }
 0x2fe   : > { %v1496_v53 = vsel %vm1495_vm5, %v1488_v49, %v1490_v46  ;;  %v1426_v54 = vsel %vm1424_vm13, %v1421_v50, %v1423_v41  ;;  %v1526_v55 = vpack.c.bf16 %v1517_v52, %v1514_v51  ;;  %v3213_v46 = vld [vmem:[%s4203_s3 + $0x220] ss:$16 sps:$4 sm:$0xff]   ;;  %vm2471_vm5 = vcmask 859136  }
 0x2ff   : > { %1502 = vst [vmem:[#allocation4 + $0x60] sm:$0xf] %v1496_v53  ;;  %1431 = vst [vmem:[#allocation4 + $0x38] sm:$0xf0] %v1426_v54  ;;  %v3183_v53 = vld [vmem:[%s4203_s3 + $0xe4] ss:$16 sps:$4 sm:$0xff]  }
 0x300   : > { %3020 = vmatpush3.bf16.msra.mxu1 %v1526_v55  ;;  %v3181_v55 = vld [vmem:[%s4203_s3 + $0xe0] ss:$16 sps:$4 sm:$0xff]  }
 0x301   : > { %v1400_v57 = vpop.permute.xlu1 %1399  ;;  %v1466_v58 = vpop.permute.xlu0 %1465  ;;  %3021 = vmatprep.subr.bf16.mxu1 %v3329_v0  ;;  %v1511_v60 = vld [vmem:[#allocation4 + $0x28] sm:$0xff] }
 0x302   : > { %v1405_v63 = vsel %vm1403_vm14, %v1400_v57, %v1402_v33  ;;  %v1473_v1 = vsel %vm1471_vm7, %v1466_v58, %v1468_v35  ;;  %v1523_v2 = vpack.c.bf16 %v1511_v60, %v1508_v59  ;;  %v1519_v3 = vld [vmem:[#allocation4 + $0x68] sm:$0xf]  ;;  %v3209_v33 = vld [vmem:[%s4203_s3 + $0x244] ss:$16 sps:$4 sm:$0xff]  }
 0x303   : > { %1410 = vst [vmem:[#allocation4 + $0x38] sm:$0xf] %v1405_v63  ;;  %1479 = vst [vmem:[#allocation4 + $0x50] sm:$0xf0] %v1473_v1  ;;  %v1528_v4 = vpack.c.bf16 %v1519_v3, %v1519_v3  ;;  %v3192_v59 = vld [vmem:[%s4203_s3 + $0xa0] ss:$16 sps:$4 sm:$0xff]  }
 0x304   : > { %3022 = vmatpush3.bf16.msra.mxu1 %v1523_v2  ;;  %v3200_v60 = vld [vmem:[%s4203_s3 + $0x84] ss:$16 sps:$4 sm:$0xff]   ;;  %v3204_v63 = vld [vmem:[%s4203_s3 + $0x60] ss:$16 sps:$4 sm:$0xff]  }
 0x305   : > { %v1442_v0 = vpop.permute.xlu1 %1441  ;;  %2892 = vmatprep.subr.msk.bf16.mxu0 %vm590_vm3, %v1528_v4  ;;  %v1419_v6 = vpop.permute.xlu0 %1418  ;;  %2987 = vmatprep.subr.msk.bf16.mxu1 %vm2179_vm15, %v2984_v61  ;;  %v3198_v61 = vld [vmem:[%s4203_s3 + $0x80] ss:$16 sps:$4 sm:$0xff]   ;;  %v3212_v1 = vld [vmem:[%s4203_s3 + $0x44] ss:$16 sps:$4 sm:$0xff]  }
 0x306   : > { %v1449_v9 = vsel %vm1447_vm12, %v1442_v0, %v3744_v31  ;;  %v1425_v10 = vsel %vm1424_vm13, %v1419_v6, %v1421_v50  ;;  %v1518_v11 = vld [vmem:[#allocation4 + $0x60] sm:$0xf]  ;;  %v3210_v2 = vld [vmem:[%s4203_s3 + $0x40] ss:$16 sps:$4 sm:$0xff]   ;;  %v3218_v3 = vld [vmem:[%s4203_s3 + $0x24] ss:$16 sps:$4 sm:$0xff]  }
 0x307   : > { %1455 = vst [vmem:[#allocation4 + $0x50] sm:$0xf] %v1449_v9  ;;  %1430 = vst [vmem:[#allocation4 + $0x30] sm:$0xf0] %v1425_v10  ;;  %3024 = vmatmul.mubr.msk.bf16.vlgmr.msra.gmra.mxu1 %vm586_vm9, %v3781_v5  ;;  %v1527_v12 = vpack.c.bf16 %v1518_v11, %v1518_v11  ;;  %v3221_v4 = vld [vmem:[%s4203_s3 + $0x204] ss:$16 sps:$4 sm:$0xff]  }
 0x308   : > { %2236 = vmatpush1.bf16.msra.mxu1 %v2181_v7  ;;  %2265 = vmatprep.mubr.bf16.mxu1 %v3339_v13  ;;  %v3222_v6 = vld [vmem:[%s4203_s3] ss:$16 sps:$4 sm:$0xff]   ;;  %v3224_v7 = vld [vmem:[%s4203_s3 + $0x4] ss:$16 sps:$4 sm:$0xff]  }
 0x309   : > { %v1398_v15 = vpop.permute.xlu1 %1397  ;;  %v1464_v16 = vpop.permute.xlu0 %1463  ;;  %v1540_v17 = vsel %vm590_vm3, %v1527_v12, 0  ;;  %2237 = vmatprep.subr.bf16.mxu1 %v3191_v8  ;;  %v3227_v8 = vld [vmem:[%s4203_s3 + $0xec] ss:$16 sps:$4 sm:$0xff]   ;;  %v3230_v9 = vld [vmem:[%s4203_s3 + $0x1e4] ss:$16 sps:$4 sm:$0xff]  }
 0x30a   : > { %v1404_v19 = vsel %vm1403_vm14, %v1398_v15, %v1400_v57  ;;  %v1472_v20 = vsel %vm1471_vm7, %v1464_v16, %v1466_v58  ;;  %1559 = vmatpush1.bf16.msra.mxu0 %v1540_v17  ;;  %v1513_v27 = vld [vmem:[#allocation4 + $0x38] sm:$0xff]  ;;  %vm2522_vm7 = vcmask 687104  }
 0x30b   : > { %1409 = vst [vmem:[#allocation4 + $0x30] sm:$0xf] %v1404_v19  ;;  %1478 = vst [vmem:[#allocation4 + $0x48] sm:$0xf0] %v1472_v20  ;;  %v3186_v57 = vld [vmem:[%s4203_s3 + $0xc0] ss:$16 sps:$4 sm:$0xff]  }
 0x30c   : > { %2238 = vmatpush1.bf16.msra.mxu1 %v3189_v14  ;;  %v3194_v58 = vld [vmem:[%s4203_s3 + $0xa4] ss:$16 sps:$4 sm:$0xff]   ;;  %v3228_v10 = vld [vmem:[%s4203_s3 + $0x1e0] ss:$16 sps:$4 sm:$0xff]  }
 0x30d   : > { %v1440_v22 = vpop.permute.xlu1 %1439  ;;  %v1361_v23 = vpop.permute.xlu0 %1360  ;;  %2239 = vmatprep.subr.bf16.mxu1 %v3197_v18  ;;  %v3236_v11 = vld [vmem:[%s4203_s3 + $0x1c4] ss:$16 sps:$4 sm:$0xff]   ;;  %v3234_v12 = vld [vmem:[%s4203_s3 + $0x1c0] ss:$16 sps:$4 sm:$0xff]  }
 0x30e   : > { %v1448_v25 = vsel %vm1447_vm12, %v1440_v22, %v1442_v0  ;;  %v1365_v26 = vsel %vm423_vm10, %v1361_v23, %v3763_v45  ;;  %v1516_v28 = vld [vmem:[#allocation4 + $0x50] sm:$0xff]  ;;  %v3219_v0 = vld [vmem:[%s4203_s3 + $0x200] ss:$16 sps:$4 sm:$0xff]   ;;  %v3242_v14 = vld [vmem:[%s4203_s3 + $0x1a4] ss:$16 sps:$4 sm:$0xff]   ;;  %vm2405_vm12 = vcmask 457732  }
 0x30f   : > { %1454 = vst [vmem:[#allocation4 + $0x48] sm:$0xf] %v1448_v25  ;;  %1370 = vst [vmem:[#allocation4 + $0x20] sm:$0xf] %v1365_v26  ;;  %v1525_v29 = vpack.c.bf16 %v1516_v28, %v1513_v27  ;;  %v3240_v15 = vld [vmem:[%s4203_s3 + $0x1a0] ss:$16 sps:$4 sm:$0xff]  }
 0x310   : > { %2240 = vmatpush1.bf16.msra.mxu1 %v3195_v21  ;;  %v3248_v16 = vld [vmem:[%s4203_s3 + $0x184] ss:$16 sps:$4 sm:$0xff]   ;;  %v3246_v17 = vld [vmem:[%s4203_s3 + $0x180] ss:$16 sps:$4 sm:$0xff]   ;;  %v1724_v26 = vld [vmem:[%s4203_s3 + $0x2c8] sm:$0xff] }
 0x311   : > { %v1341_v31 = vpop.permute.xlu1 %1340  ;;  %1560 = vmatprep.subr.bf16.mxu0 %v1525_v29  ;;  %v1339_v32 = vpop.permute.xlu0 %1338  ;;  %2241 = vmatprep.subr.bf16.mxu1 %v3203_v24  ;;  %v3254_v18 = vld [vmem:[%s4203_s3 + $0x164] ss:$16 sps:$4 sm:$0xff]   ;;  %v3252_v19 = vld [vmem:[%s4203_s3 + $0x160] ss:$16 sps:$4 sm:$0xff]   ;;  %v2986_v27 = vcombine.high %v1724_v26, %v1724_v26 }
 0x312   : > { %v1345_v34 = vsel %vm402_vm11, %v1341_v31, %v3751_v39  ;;  %v1344_v35 = vsel %vm402_vm11, %v1339_v32, %v1341_v31  ;;  %v1512_v43 = vld [vmem:[#allocation4 + $0x30] sm:$0xff]  ;;  %v3260_v20 = vld [vmem:[%s4203_s3 + $0x144] ss:$16 sps:$4 sm:$0xff]   ;;  %v3258_v21 = vld [vmem:[%s4203_s3 + $0x140] ss:$16 sps:$4 sm:$0xff]  }
 0x313   : > { %1350 = vst [vmem:[#allocation4 + $0x8] sm:$0xf0] %v1345_v34  ;;  %1349 = vst [vmem:[#allocation4] sm:$0xf0] %v1344_v35  ;;  %v3266_v22 = vld [vmem:[%s4203_s3 + $0x124] ss:$16 sps:$4 sm:$0xff]  }
 0x314   : > { %2242 = vmatpush1.bf16.msra.mxu1 %v3201_v30  ;;  %v3272_v24 = vld [vmem:[%s4203_s3 + $0x104] ss:$16 sps:$4 sm:$0xff]   ;;  %v3270_v25 = vld [vmem:[%s4203_s3 + $0x100] ss:$16 sps:$4 sm:$0xff]   ;;  %v3225_v34 = vld [vmem:[%s4203_s3 + $0xe8] ss:$16 sps:$4 sm:$0xff]  }
 0x315   : > { %v1381_v37 = vpop.permute.xlu1 %1380  ;;  %v1379_v38 = vpop.permute.xlu0 %1378  ;;  %2243 = vmatprep.subr.bf16.mxu1 %v3209_v33 }
 0x316   : > { %v1385_v41 = vsel %vm485_vm6, %v1381_v37, %v3758_v42  ;;  %v1384_v39 = vsel %vm485_vm6, %v1379_v38, %v1381_v37  ;;  %v1515_v44 = vld [vmem:[#allocation4 + $0x48] sm:$0xff]  ;;  %vm2175_vm6 = vcmask 850944   ;;  %v3231_v38 = vld [vmem:[%s4203_s3 + $0xc8] ss:$16 sps:$4 sm:$0xff]  }
 0x317   : > { %1390 = vst [vmem:[#allocation4 + $0x20] sm:$0xf0] %v1385_v41  ;;  %1389 = vst [vmem:[#allocation4 + $0x18] sm:$0xf0] %v1384_v39  ;;  %v1524_v45 = vpack.c.bf16 %v1515_v44, %v1512_v43  ;;  %v3237_v41 = vld [vmem:[%s4203_s3 + $0xa8] ss:$16 sps:$4 sm:$0xff]  }
 0x318   : > { %2244 = vmatpush1.bf16.msra.mxu1 %v3207_v36  ;;  %v3233_v36 = vld [vmem:[%s4203_s3 + $0xcc] ss:$16 sps:$4 sm:$0xff]   ;;  %v3243_v43 = vld [vmem:[%s4203_s3 + $0x88] ss:$16 sps:$4 sm:$0xff]  }
 0x319   : > { %v1359_v47 = vpop.permute.xlu1 %1358  ;;  %1561 = vmatpush1.bf16.msra.mxu0 %v1524_v45  ;;  %2245 = vmatprep.subr.bf16.mxu1 %v3215_v40  ;;  %v3239_v40 = vld [vmem:[%s4203_s3 + $0xac] ss:$16 sps:$4 sm:$0xff]   ;;  %v3249_v45 = vld [vmem:[%s4203_s3 + $0x68] ss:$16 sps:$4 sm:$0xff]  }
 0x31a   : > { %v1364_v48 = vsel %vm423_vm10, %v1359_v47, %v1361_v23  ;;  %v1507_v42 = vld [vmem:[#allocation4 + $0x8] sm:$0xff]  ;;  %v1506_v51 = vld [vmem:[#allocation4] sm:$0xff] }
 0x31b   : > { %1369 = vst [vmem:[#allocation4 + $0x18] sm:$0xf] %v1364_v48  ;;  %v3264_v23 = vld [vmem:[%s4203_s3 + $0x120] ss:$16 sps:$4 sm:$0xff]   ;;  %v3245_v39 = vld [vmem:[%s4203_s3 + $0x8c] ss:$16 sps:$4 sm:$0xff]  }
 0x31c   : > { %2246 = vmatpush1.bf16.msra.mxu1 %v3213_v46  ;;  %v3251_v44 = vld [vmem:[%s4203_s3 + $0x6c] ss:$16 sps:$4 sm:$0xff]   ;;  %v3255_v47 = vld [vmem:[%s4203_s3 + $0x48] ss:$16 sps:$4 sm:$0xff]  }
 0x31d   : > { %2247 = vmatprep.subr.bf16.mxu1 %v3221_v4  ;;  %v3257_v46 = vld [vmem:[%s4203_s3 + $0x4c] ss:$16 sps:$4 sm:$0xff]  }
 0x31e   : > { %v1510_v49 = vld [vmem:[#allocation4 + $0x20] sm:$0xff] }
 0x31f   : > { %v1522_v50 = vpack.c.bf16 %v1510_v49, %v1507_v42  ;;  %v3263_v48 = vld [vmem:[%s4203_s3 + $0x2c] ss:$16 sps:$4 sm:$0xff]   ;;  %v3261_v42 = vld [vmem:[%s4203_s3 + $0x28] ss:$16 sps:$4 sm:$0xff]  }
 0x320   : > { %2248 = vmatpush1.bf16.msra.mxu1 %v3219_v0  ;;  %v3269_v49 = vld [vmem:[%s4203_s3 + $0xc] ss:$16 sps:$4 sm:$0xff]   ;;  %v3281_v0 = vld [vmem:[%s4203_s3 + $0x1a8] ss:$16 sps:$4 sm:$0xff]  }
 0x321   : > { %1562 = vmatprep.subr.bf16.mxu0 %v1522_v50  ;;  %2274 = vmatprep.subr.bf16.mxu1 %v3227_v8  ;;  %v3267_v50 = vld [vmem:[%s4203_s3 + $0x8] ss:$16 sps:$4 sm:$0xff]   ;;  %v3283_v4 = vld [vmem:[%s4203_s3 + $0x1ac] ss:$16 sps:$4 sm:$0xff]  }
 0x322   : > { %v1509_v52 = vld [vmem:[#allocation4 + $0x18] sm:$0xff]  ;;  %v3292_v8 = vld [vmem:[%s4203_s3 + $0x28c] ss:$16 sps:$4 sm:$0xff]  }
 0x323   : > { %v1521_v54 = vpack.c.bf16 %v1509_v52, %v1506_v51  ;;  %v3275_v52 = vld [vmem:[%s4203_s3 + $0x1ec] ss:$16 sps:$4 sm:$0xff]  }
 0x325   : > { %1563 = vmatpush1.bf16.msra.mxu0 %v1521_v54 }
 0x326   : > { %2192 = vmatprep.subr.bf16.mxu0 %v3183_v53  ;;  %v1534_v28 = vpop.permute.xlu1 %1533 }
 0x328   : > { %2893 = vmatmul.mubr.msk.bf16.vlgmr.msra.gmra.mxu0 %vm586_vm9, %v3781_v5  ;;  %v3216_v5 = vld [vmem:[%s4203_s3 + $0x20] ss:$16 sps:$4 sm:$0xff]  }
 0x329   : > { %2193 = vmatpush1.bf16.msra.mxu0 %v3181_v55 }
 0x32a   : > { %2194 = vmatprep.subr.bf16.mxu0 %v3188_v56  ;;  %v3273_v56 = vld [vmem:[%s4203_s3 + $0x1e8] ss:$16 sps:$4 sm:$0xff]  }
 0x32d   : > { %2195 = vmatpush1.bf16.msra.mxu0 %v3186_v57 }
 0x32e   : > { %2196 = vmatprep.subr.bf16.mxu0 %v3194_v58 }
 0x331   : > { %2197 = vmatpush1.bf16.msra.mxu0 %v3192_v59  ;;  %v3278_v59 = vld [vmem:[%s4203_s3 + $0x1cc] ss:$16 sps:$4 sm:$0xff]  }
 0x332   : > { %2198 = vmatprep.subr.bf16.mxu0 %v3200_v60  ;;  %v2985_v60 = vcombine.low %v1724_v26, %v1724_v26  ;;  %v3311_v26 = vld [vmem:[%s4203_s3 + $0x108] ss:$16 sps:$4 sm:$0xff]  }
 0x335   : > { %2199 = vmatpush1.bf16.msra.mxu0 %v3198_v61 }
 0x336   : > { %2200 = vmatprep.subr.bf16.mxu0 %v3206_v62 }
 0x339   : > { %2201 = vmatpush1.bf16.msra.mxu0 %v3204_v63 }
 0x33a   : > { %2202 = vmatprep.subr.bf16.mxu0 %v3212_v1  ;;  %v3276_v1 = vld [vmem:[%s4203_s3 + $0x1c8] ss:$16 sps:$4 sm:$0xff]  }
 0x33d   : > { %2203 = vmatpush1.bf16.msra.mxu0 %v3210_v2 }
 0x33e   : > { %2204 = vmatprep.subr.bf16.mxu0 %v3218_v3  ;;  %v2187_v3 = vsel %vm2179_vm15, %v2985_v60, 0 }
 0x341   : > { %2205 = vmatpush1.bf16.msra.mxu0 %v3216_v5  ;;  %v3286_v5 = vld [vmem:[%s4203_s3 + $0x2ac] ss:$16 sps:$4 sm:$0xff]  }
 0x342   : > { %2206 = vmatprep.subr.bf16.mxu0 %v3224_v7  ;;  %v3289_v7 = vld [vmem:[%s4203_s3 + $0x18c] ss:$16 sps:$4 sm:$0xff]  }
 0x345   : > { %2207 = vmatpush1.bf16.msra.mxu0 %v3222_v6  ;;  %v3284_v6 = vld [vmem:[%s4203_s3 + $0x2a8] ss:$16 sps:$4 sm:$0xff]  }
 0x346   : > { %2208 = vmatprep.subr.bf16.mxu0 %v3230_v9  ;;  %v3287_v9 = vld [vmem:[%s4203_s3 + $0x188] ss:$16 sps:$4 sm:$0xff]  }
 0x349   : > { %2209 = vmatpush2.bf16.msra.mxu0 %v3228_v10  ;;  %v3290_v10 = vld [vmem:[%s4203_s3 + $0x288] ss:$16 sps:$4 sm:$0xff]  }
 0x34a   : > { %2210 = vmatprep.subr.bf16.mxu0 %v3236_v11  ;;  %v3295_v11 = vld [vmem:[%s4203_s3 + $0x16c] ss:$16 sps:$4 sm:$0xff]  }
 0x34d   : > { %2211 = vmatpush2.bf16.msra.mxu0 %v3234_v12  ;;  %v3298_v12 = vld [vmem:[%s4203_s3 + $0x26c] ss:$16 sps:$4 sm:$0xff]  }
 0x34e   : > { %2212 = vmatprep.subr.bf16.mxu0 %v3242_v14  ;;  %v3293_v14 = vld [vmem:[%s4203_s3 + $0x168] ss:$16 sps:$4 sm:$0xff]  }
 0x351   : > { %2213 = vmatpush2.bf16.msra.mxu0 %v3240_v15  ;;  %v3296_v15 = vld [vmem:[%s4203_s3 + $0x268] ss:$16 sps:$4 sm:$0xff]  }
 0x352   : > { %2214 = vmatprep.subr.bf16.mxu0 %v3248_v16  ;;  %v3301_v16 = vld [vmem:[%s4203_s3 + $0x14c] ss:$16 sps:$4 sm:$0xff]  }
 0x355   : > { %2215 = vmatpush2.bf16.msra.mxu0 %v3246_v17  ;;  %v3304_v17 = vld [vmem:[%s4203_s3 + $0x24c] ss:$16 sps:$4 sm:$0xff]  }
 0x356   : > { %2216 = vmatprep.subr.bf16.mxu0 %v3254_v18  ;;  %v3299_v18 = vld [vmem:[%s4203_s3 + $0x148] ss:$16 sps:$4 sm:$0xff]  }
 0x359   : > { %2217 = vmatpush2.bf16.msra.mxu0 %v3252_v19  ;;  %v3302_v19 = vld [vmem:[%s4203_s3 + $0x248] ss:$16 sps:$4 sm:$0xff]  }
 0x35a   : > { %2218 = vmatprep.subr.bf16.mxu0 %v3260_v20  ;;  %v3307_v20 = vld [vmem:[%s4203_s3 + $0x12c] ss:$16 sps:$4 sm:$0xff]  }
 0x35d   : > { %2219 = vmatpush2.bf16.msra.mxu0 %v3258_v21  ;;  %v3310_v21 = vld [vmem:[%s4203_s3 + $0x22c] ss:$16 sps:$4 sm:$0xff]  }
 0x35e   : > { %2220 = vmatprep.subr.bf16.mxu0 %v3266_v22  ;;  %v3305_v22 = vld [vmem:[%s4203_s3 + $0x128] ss:$16 sps:$4 sm:$0xff]  }
 0x361   : > { %2221 = vmatpush2.bf16.msra.mxu0 %v3264_v23  ;;  %v3308_v23 = vld [vmem:[%s4203_s3 + $0x228] ss:$16 sps:$4 sm:$0xff]  }
 0x362   : > { %2222 = vmatprep.subr.bf16.mxu0 %v3272_v24  ;;  %v3313_v24 = vld [vmem:[%s4203_s3 + $0x10c] ss:$16 sps:$4 sm:$0xff]  }
 0x365   : > { %2223 = vmatpush2.bf16.msra.mxu0 %v3270_v25  ;;  %v3316_v25 = vld [vmem:[%s4203_s3 + $0x20c] ss:$16 sps:$4 sm:$0xff]  }
 0x366   : > { %2989 = vmatprep.subr.msk.bf16.mxu0 %vm2179_vm15, %v2986_v27  ;;  %v3314_v27 = vld [vmem:[%s4203_s3 + $0x208] ss:$16 sps:$4 sm:$0xff]  }
 0x3c7   : > { %v1623_v29 = vpop.f32.mrf.mxu1 }
 0x3c8   : > { %v1624_v30 = vadd.f32 %v1623_v29, %v1534_v28 }
 0x3c9   : > { %v3025_v31 = vpop.f32.mrf.mxu1 }
 0x3ca   : > { %v1631_v32 = vmax.f32 %v1624_v30, 0.0 }
 0x3cb   : > { %v1626_v33 = vpop.f32.mrf.mxu1 }
 0x3cc   : > { %v3949_v35 = vpack.c.bf16 %v1631_v32, %v1631_v32 }
 0x3cd   : > { %v3026_v37 = vpop.f32.mrf.mxu1 }
 0x3ce   : > { %2988 = vmatmul.mubr.msk.bf16.vlgmr.msra.gmra.mxu1 %vm2175_vm6, %v3949_v35 }
 0x3cf   : > { %2275 = vmatpush1.bf16.msra.mxu1 %v3225_v34 }
 0x3d0   : > { %2276 = vmatprep.subr.bf16.mxu1 %v3233_v36 }
 0x3d3   : > { %2277 = vmatpush1.bf16.msra.mxu1 %v3231_v38 }
 0x3d4   : > { %2278 = vmatprep.subr.bf16.mxu1 %v3239_v40 }
 0x3d7   : > { %2279 = vmatpush1.bf16.msra.mxu1 %v3237_v41 }
 0x3d8   : > { %2280 = vmatprep.subr.bf16.mxu1 %v3245_v39 }
 0x3db   : > { %2281 = vmatpush1.bf16.msra.mxu1 %v3243_v43 }
 0x3dc   : > { %2282 = vmatprep.subr.bf16.mxu1 %v3251_v44 }
 0x3df   : > { %2283 = vmatpush1.bf16.msra.mxu1 %v3249_v45 }
 0x3e0   : > { %2284 = vmatprep.subr.bf16.mxu1 %v3257_v46 }
 0x3e3   : > { %2285 = vmatpush1.bf16.msra.mxu1 %v3255_v47 }
 0x3e4   : > { %2286 = vmatprep.subr.bf16.mxu1 %v3263_v48 }
 0x3e7   : > { %2287 = vmatpush1.bf16.msra.mxu1 %v3261_v42 }
 0x3e8   : > { %v1582_v51 = vpop.f32.mrf.mxu0  ;;  %2288 = vmatprep.subr.bf16.mxu1 %v3269_v49 }
 0x3e9   : > { %v1583_v53 = vadd.f32 %v1582_v51, %v1534_v28 }
 0x3ea   : > { %v1584_v54 = vpop.f32.mrf.mxu0 }
 0x3eb   : > { %v1585_v55 = vadd.f32 %v1584_v54, %v1534_v28  ;;  %2289 = vmatpush1.bf16.msra.mxu1 %v3267_v50  ;;  %v1629_v57 = vmax.f32 %v1583_v53, 0.0  ;;  %v2619_v53 = vld [vmem:[%s4209_s9] sm:$0xf] }
 0x3ec   : > { %v1586_v58 = vpop.f32.mrf.mxu0  ;;  %2290 = vmatprep.subr.bf16.mxu1 %v3275_v52 }
 0x3ed   : > { %v1630_v61 = vmax.f32 %v1585_v55, 0.0  ;;  %v1632_v2 = vpack.c.bf16 %v1629_v57, %v1629_v57 }
 0x3ee   : > { %v1587_v62 = vpop.f32.mrf.mxu0 }
 0x3ef   : > { %v1633_v63 = vpack.c.bf16 %v1630_v61, %v1630_v61  ;;  %2291 = vmatpush2.bf16.msra.mxu1 %v3273_v56 }
 0x3f0   : > { %2292 = vmatprep.subr.bf16.mxu1 %v3278_v59 }
 0x3f1   : > { %2224 = vmatprep.mubr.bf16.mxu0 %v1633_v63  ;;  %2306 = vmatprep.mubr.bf16.mxu1 %v1633_v63 }
 0x3f2   : > { %2225 = vmatmul.mubr.bf16.vlgmr.msra.gmra.mxu0 %v1632_v2 }
 0x3f3   : > { %2293 = vmatpush2.bf16.msra.mxu1 %v3276_v1  ;;  %2318 = vmatpush1.bf16.msra.mxu0 %v2187_v3 }
 0x3f4   : > { %2294 = vmatprep.subr.bf16.mxu1 %v3283_v4  ;;  %2319 = vmatprep.subr.bf16.mxu0 %v3286_v5 }
 0x3f5   : > { %2347 = vmatprep.mubr.bf16.mxu0 %v3339_v13 }
 0x3f7   : > { %2295 = vmatpush2.bf16.msra.mxu1 %v3281_v0  ;;  %2320 = vmatpush1.bf16.msra.mxu0 %v3284_v6 }
 0x3f8   : > { %2296 = vmatprep.subr.bf16.mxu1 %v3289_v7  ;;  %2321 = vmatprep.subr.bf16.mxu0 %v3292_v8 }
 0x3fb   : > { %2297 = vmatpush2.bf16.msra.mxu1 %v3287_v9  ;;  %2322 = vmatpush1.bf16.msra.mxu0 %v3290_v10 }
 0x3fc   : > { %2298 = vmatprep.subr.bf16.mxu1 %v3295_v11  ;;  %2323 = vmatprep.subr.bf16.mxu0 %v3298_v12 }
 0x3ff   : > { %2299 = vmatpush2.bf16.msra.mxu1 %v3293_v14  ;;  %2324 = vmatpush1.bf16.msra.mxu0 %v3296_v15 }
 0x400   : > { %2300 = vmatprep.subr.bf16.mxu1 %v3301_v16  ;;  %2325 = vmatprep.subr.bf16.mxu0 %v3304_v17 }
 0x403   : > { %2301 = vmatpush2.bf16.msra.mxu1 %v3299_v18  ;;  %2326 = vmatpush1.bf16.msra.mxu0 %v3302_v19 }
 0x404   : > { %2302 = vmatprep.subr.bf16.mxu1 %v3307_v20  ;;  %2327 = vmatprep.subr.bf16.mxu0 %v3310_v21 }
 0x407   : > { %2303 = vmatpush2.bf16.msra.mxu1 %v3305_v22  ;;  %2328 = vmatpush1.bf16.msra.mxu0 %v3308_v23 }
 0x408   : > { %2304 = vmatprep.subr.bf16.mxu1 %v3313_v24  ;;  %2329 = vmatprep.subr.bf16.mxu0 %v3316_v25 }
 0x40b   : > { %2305 = vmatpush2.bf16.msra.mxu1 %v3311_v26  ;;  %2330 = vmatpush1.bf16.msra.mxu0 %v3314_v27 }
 0x40e   : > { %2307 = vmatmul.mubr.bf16.vlgmr.msra.gmra.mxu1 %v1632_v2  ;;  %2990 = vmatmul.mubr.msk.bf16.vlgmr.msra.gmra.mxu0 %vm2175_vm6, %v3949_v35 }
 0x40f   : > { %2672 = vmatprep.mubr.bf16.mxu0 %v3339_v13  ;;  %2713 = vmatprep.mubr.bf16.mxu1 %v3339_v13 }
 0x48e   : > { %v2267_v28 = vpop.f32.mrf.mxu1 }
 0x490   : > { %v2269_v29 = vpop.f32.mrf.mxu1 }
 0x492   : > { %v2271_v30 = vpop.f32.mrf.mxu1 }
 0x494   : > { %v2272_v31 = vpop.f32.mrf.mxu1 }
 0x4b2   : > { %v2226_v32 = vpop.f32.mrf.mxu0 }
 0x4b3   : > { %v2268_v34 = vadd.f32 %v2267_v28, %v2226_v32 }
 0x4b4   : > { %v2228_v33 = vpop.f32.mrf.mxu0 }
 0x4b5   : > { %v2270_v36 = vadd.f32 %v2269_v29, %v2228_v33  ;;  %v3320_v50 = vcombine.low %v2268_v34, %v2268_v34 }
 0x4b6   : > { %v2230_v37 = vpop.f32.mrf.mxu0 }
 0x4b7   : > { %v2360_v38 = vcombine.low %v2268_v34, %v2270_v36  ;;  %v3319_v41 = vcombine.low %v2270_v36, %v2270_v36 }
 0x4b8   : > { %v2231_v40 = vpop.f32.mrf.mxu0 }
 0x4b9   : > { %2376 = vst [vmem:[#allocation6] sm:$0xf] %v2360_v38  ;;  %2566 = vrot.lane.b32.xlu0 %v2360_v38, %s3346_s19  ;;  %2377 = vst [vmem:[#allocation6 + $0x8] sm:$0xf] %v3319_v41  ;;  %2568 = vrot.lane.b32.xlu1 %v3319_v41, %s3346_s19 }
 0x4bd   : > { %2491 = vrot.lane.b32.xlu0 %v2360_v38, %s3347_s20 }
 0x4c1   : > { %2542 = vrot.lane.b32.xlu0 %v2360_v38, %s3348_s22 }
 0x4c5   : > { %2463 = vrot.lane.b32.xlu0 %v2360_v38, %s3349_s23 }
 0x4c9   : > { %2514 = vrot.lane.b32.xlu0 %v2360_v38, %s3350_s26 }
 0x4cd   : > { %2389 = vrot.lane.b32.xlu0 %v2360_v38, %s3335_s24 }
 0x4ce   : > { %v2308_v13 = vpop.f32.mrf.mxu1  ;;  %v2349_v35 = vpop.f32.mrf.mxu0 }
 0x4cf   : > { %v2350_v44 = vadd.f32 %v2349_v35, %v2308_v13 }
 0x4d0   : > { %v2310_v39 = vpop.f32.mrf.mxu1  ;;  %v2351_v43 = vpop.f32.mrf.mxu0 }
 0x4d1   : > { %v2352_v45 = vadd.f32 %v2351_v43, %v2310_v39  ;;  %2440 = vrot.lane.b32.xlu0 %v2360_v38, %s3345_s15 }
 0x4d2   : > { %v2312_v46 = vpop.f32.mrf.mxu1  ;;  %v2353_v47 = vpop.f32.mrf.mxu0 }
 0x4d3   : > { %v2361_v48 = vcombine.low %v2350_v44, %v2352_v45 }
 0x4d4   : > { %v2313_v42 = vpop.f32.mrf.mxu1  ;;  %v2354_v49 = vpop.f32.mrf.mxu0 }
 0x4d5   : > { %2367 = vst.msk [vmem:[#allocation5 + $0x8] sm:$0xff] %vm2366_vm1, %v2361_v48  ;;  %2465 = vrot.lane.b32.xlu0 %v3319_v41, %s3349_s23 }
 0x4d9   : > { %2516 = vrot.lane.b32.xlu0 %v3319_v41, %s3350_s26 }
 0x4dc   : > { %v2458_v51 = vld [vmem:[#allocation5 + $0x8] sm:$0xff] }
 0x4dd   : > { %v2462_v52 = vcombine.high %v2458_v51, %v2458_v51  ;;  %2467 = vrot.lane.b32.xlu1 %v2458_v51, %s3349_s23  ;;  %2489 = vrot.lane.b32.xlu0 %v3320_v50, %s3347_s20  ;;  %2378 = vst [vmem:[#allocation6 + $0x10] sm:$0xf] %v2458_v51  ;;  %v2488_v54 = vcombine.low %v2458_v51, %v2458_v51 }
 0x4df   : > { %2380 = vst.msk [vmem:[#allocation6 + $0x18] sm:$0xf] %vm2379_vm2, %v2462_v52 }
 0x4e1   : > { %2518 = vrot.lane.b32.xlu1 %v2458_v51, %s3350_s26  ;;  %2540 = vrot.lane.b32.xlu0 %v3320_v50, %s3348_s22 }
 0x4e5   : > { %2495 = vrot.lane.b32.xlu1 %v2458_v51, %s3347_s20  ;;  %2415 = vrot.lane.b32.xlu0 %v3319_v41, %s3337_s25 }
 0x4e9   : > { %2546 = vrot.lane.b32.xlu1 %v2458_v51, %s3348_s22  ;;  %2570 = vrot.lane.b32.xlu0 %v2458_v51, %s3346_s19 }
 0x4ed   : > { %2417 = vrot.lane.b32.xlu1 %v2458_v51, %s3337_s25  ;;  %2387 = vrot.lane.b32.xlu0 %v3320_v50, %s3335_s24 }
 0x4f1   : > { %2393 = vrot.lane.b32.xlu1 %v2458_v51, %s3335_s24  ;;  %2413 = vrot.lane.b32.xlu0 %v2360_v38, %s3337_s25 }
 0x4f5   : > { %2572 = vrot.lane.b32.xlu1 %v2462_v52, %s3346_s19  ;;  %2438 = vrot.lane.b32.xlu0 %v3320_v50, %s3345_s15 }
 0x4f9   : > { %2493 = vrot.lane.b32.xlu1 %v2488_v54, %s3347_s20  ;;  %2622 = vperm.xlu0 %3058, %v2619_v53  }
 0x4fd   : > { %2544 = vrot.lane.b32.xlu1 %v2488_v54, %s3348_s22 }
 0x501   : > { %2469 = vrot.lane.b32.xlu1 %v2462_v52, %s3349_s23 }
 0x505   : > { %2520 = vrot.lane.b32.xlu1 %v2462_v52, %s3350_s26 }
 0x509   : > { %2391 = vrot.lane.b32.xlu1 %v2488_v54, %s3335_s24 }
 0x50d   : > { %2442 = vrot.lane.b32.xlu1 %v2488_v54, %s3345_s15 }
 0x511   : > { %2419 = vrot.lane.b32.xlu1 %v2462_v52, %s3337_s25 }
 0x515   : > { %2444 = vrot.lane.b32.xlu1 %v2458_v51, %s3345_s15  ;;  %s2998_s15 = sshll.u32 %s4212_s14, 4 }
 0x516   : > { %s379_s11 = scalar_lea.vmem %s4210_s10, %s2998_s15 }
 0x52b   : > { %v2567_v55 = vpop.permute.xlu0 %2566  ;;  %v2569_v56 = vpop.permute.xlu1 %2568 }
 0x52c   : > { %v2575_v57 = vsel %vm2574_vm4, %v2567_v55, %v2569_v56 }
 0x52d   : > { %2582 = vst [vmem:[#allocation6 + $0x80] sm:$0xf] %v2575_v57 }
 0x52f   : > { %v4123_v58 = vpop.permute.xlu0 %2491 }
 0x533   : > { %v4125_v59 = vpop.permute.xlu0 %2542 }
 0x534   : > { %v2603_v22 = vld [vmem:[#allocation6 + $0x80] sm:$0xf] }
 0x535   : > { %v2615_v25 = vpack.c.bf16 %v2603_v22, %v2603_v22 }
 0x537   : > { %v2464_v60 = vpop.permute.xlu0 %2463  ;;  %v2629_v31 = vsel %vm590_vm3, %v2615_v25, 0 }
 0x53b   : > { %v2515_v61 = vpop.permute.xlu0 %2514 }
 0x53f   : > { %v4127_v62 = vpop.permute.xlu0 %2389 }
 0x543   : > { %v4129_v63 = vpop.permute.xlu0 %2440 }
 0x547   : > { %v2466_v1 = vpop.permute.xlu0 %2465 }
 0x548   : > { %v2472_v2 = vsel %vm2471_vm5, %v2464_v60, %v2466_v1 }
 0x549   : > { %2479 = vst [vmem:[#allocation6 + $0x40] sm:$0xf] %v2472_v2 }
 0x54b   : > { %v2517_v3 = vpop.permute.xlu0 %2516 }
 0x54c   : > { %v2523_v4 = vsel %vm2522_vm7, %v2515_v61, %v2517_v3 }
 0x54d   : > { %2530 = vst [vmem:[#allocation6 + $0x60] sm:$0xf] %v2523_v4 }
 0x54f   : > { %v4133_v5 = vpop.permute.xlu1 %2467  ;;  %v2490_v0 = vpop.permute.xlu0 %2489 }
 0x550   : > { %v2473_v6 = vsel %vm2471_vm5, %v2466_v1, %v4133_v5  ;;  %v2497_v7 = vsel %vm2175_vm6, %v2490_v0, %v4123_v58 }
 0x551   : > { %2480 = vst [vmem:[#allocation6 + $0x48] sm:$0xf] %v2473_v6  ;;  %2504 = vst [vmem:[#allocation6 + $0x40] sm:$0xf0] %v2497_v7 }
 0x553   : > { %v4139_v8 = vpop.permute.xlu1 %2518  ;;  %v2541_v9 = vpop.permute.xlu0 %2540 }
 0x554   : > { %v2524_v10 = vsel %vm2522_vm7, %v2517_v3, %v4139_v8  ;;  %v2549_v11 = vsel %vm2548_vm8, %v2541_v9, %v4125_v59 }
 0x555   : > { %2531 = vst [vmem:[#allocation6 + $0x68] sm:$0xf] %v2524_v10  ;;  %2556 = vst [vmem:[#allocation6 + $0x60] sm:$0xf0] %v2549_v11  ;;  %v2586_v11 = vld [vmem:[%s4208_s8] sm:$0x3] }
 0x557   : > { %v2496_v12 = vpop.permute.xlu1 %2495  ;;  %v2416_v14 = vpop.permute.xlu0 %2415 }
 0x558   : > { %2507 = vst.msk [vmem:[#allocation6 + $0x58] sm:$0xf0] %vm2405_vm12, %v2496_v12  ;;  %v2595_v52 = vld [vmem:[#allocation6 + $0x40] sm:$0xff] }
 0x55b   : > { %v2547_v15 = vpop.permute.xlu1 %2546  ;;  %v2571_v16 = vpop.permute.xlu0 %2570 }
 0x55c   : > { %2559 = vst.msk [vmem:[#allocation6 + $0x78] sm:$0xf0] %vm2405_vm12, %v2547_v15  ;;  %v2576_v17 = vsel %vm2574_vm4, %v2569_v56, %v2571_v16  ;;  %v2599_v48 = vld [vmem:[#allocation6 + $0x60] sm:$0xff] }
 0x55d   : > { %2583 = vst [vmem:[#allocation6 + $0x88] sm:$0xf] %v2576_v17  ;;  %v2611_v53 = vpack.c.bf16 %v2599_v48, %v2595_v52 }
 0x55f   : > { %v4148_v18 = vpop.permute.xlu1 %2417  ;;  %v2388_v19 = vpop.permute.xlu0 %2387 }
 0x560   : > { %v2422_v20 = vsel %vm423_vm10, %v2416_v14, %v4148_v18  ;;  %v2395_v21 = vsel %vm402_vm11, %v2388_v19, %v4127_v62 }
 0x561   : > { %2429 = vst [vmem:[#allocation6 + $0x28] sm:$0xf] %v2422_v20  ;;  %2402 = vst [vmem:[#allocation6] sm:$0xf0] %v2395_v21 }
 0x563   : > { %v2394_v23 = vpop.permute.xlu1 %2393  ;;  %v2414_v24 = vpop.permute.xlu0 %2413 }
 0x564   : > { %2406 = vst.msk [vmem:[#allocation6 + $0x18] sm:$0xf0] %vm2405_vm12, %v2394_v23  ;;  %v2421_v26 = vsel %vm423_vm10, %v2414_v24, %v2416_v14  ;;  %v2604_v27 = vld [vmem:[#allocation6 + $0x88] sm:$0xf] }
 0x565   : > { %2428 = vst [vmem:[#allocation6 + $0x20] sm:$0xf] %v2421_v26  ;;  %v2616_v28 = vpack.c.bf16 %v2604_v27, %v2604_v27 }
 0x567   : > { %v2573_v29 = vpop.permute.xlu1 %2572  ;;  %2991 = vmatprep.subr.msk.bf16.mxu0 %vm590_vm3, %v2616_v28  ;;  %v2439_v30 = vpop.permute.xlu0 %2438 }
 0x568   : > { %v2577_v32 = vsel %vm2574_vm4, %v2571_v16, %v2573_v29  ;;  %2585 = vst.msk [vmem:[#allocation6 + $0x98] sm:$0xf] %vm2379_vm2, %v2573_v29  ;;  %v2446_v33 = vsel %vm1424_vm13, %v2439_v30, %v4129_v63  ;;  %2651 = vmatpush1.bf16.msra.mxu0 %v2629_v31  ;;  %v2587_v9 = vld [vmem:[#allocation6] sm:$0xff] }
 0x569   : > { %2584 = vst [vmem:[#allocation6 + $0x90] sm:$0xf] %v2577_v32  ;;  %2453 = vst [vmem:[#allocation6 + $0x20] sm:$0xf0] %v2446_v33 }
 0x56b   : > { %v2494_v34 = vpop.permute.xlu1 %2493 }
 0x56c   : > { %v2498_v36 = vsel %vm2175_vm6, %v4123_v58, %v2494_v34  ;;  %v2499_v37 = vsel %vm2175_vm6, %v2494_v34, %v2496_v12  ;;  %v2590_v12 = vld [vmem:[#allocation6 + $0x18] sm:$0xff] }
 0x56d   : > { %2505 = vst [vmem:[#allocation6 + $0x48] sm:$0xf0] %v2498_v36  ;;  %2506 = vst [vmem:[#allocation6 + $0x50] sm:$0xf0] %v2499_v37 }
 0x56f   : > { %v2545_v38 = vpop.permute.xlu1 %2544  ;;  %v2606_v40 = vld [vmem:[#allocation6 + $0x98] sm:$0xf] }
 0x570   : > { %v2550_v41 = vsel %vm2548_vm8, %v4125_v59, %v2545_v38  ;;  %v2551_v13 = vsel %vm2548_vm8, %v2545_v38, %v2547_v15  ;;  %v2618_v35 = vpack.c.bf16 %v2606_v40, %v2606_v40  ;;  %v2605_v39 = vld [vmem:[#allocation6 + $0x90] sm:$0xf]  ;;  %v2591_v0 = vld [vmem:[#allocation6 + $0x20] sm:$0xff] }
 0x571   : > { %2557 = vst [vmem:[#allocation6 + $0x68] sm:$0xf0] %v2550_v41  ;;  %2558 = vst [vmem:[#allocation6 + $0x70] sm:$0xf0] %v2551_v13  ;;  %v2617_v43 = vpack.c.bf16 %v2605_v39, %v2605_v39  ;;  %v2607_v10 = vpack.c.bf16 %v2591_v0, %v2587_v9 }
 0x572   : > { %2993 = vmatprep.subr.msk.bf16.mxu1 %vm590_vm3, %v2618_v35 }
 0x573   : > { %v2470_v44 = vpop.permute.xlu1 %2469  ;;  %v2635_v45 = vsel %vm590_vm3, %v2617_v43, 0  ;;  %vm2735_vm3 = vmor %vm2405_vm12, %vm2179_vm15 }
 0x574   : > { %v2474_v46 = vsel %vm2471_vm5, %v4133_v5, %v2470_v44  ;;  %2482 = vst.msk [vmem:[#allocation6 + $0x58] sm:$0xf] %vm2379_vm2, %v2470_v44  ;;  %2692 = vmatpush1.bf16.msra.mxu1 %v2635_v45  ;;  %v2596_v49 = vld [vmem:[#allocation6 + $0x48] sm:$0xff]  ;;  %v2623_v19 = vpop.permute.xlu0 %2622 }
 0x575   : > { %2481 = vst [vmem:[#allocation6 + $0x50] sm:$0xf] %v2474_v46 }
 0x577   : > { %v2521_v47 = vpop.permute.xlu1 %2520 }
 0x578   : > { %v2525_v42 = vsel %vm2522_vm7, %v4139_v8, %v2521_v47  ;;  %2533 = vst.msk [vmem:[#allocation6 + $0x78] sm:$0xf] %vm2379_vm2, %v2521_v47  ;;  %v2600_v50 = vld [vmem:[#allocation6 + $0x68] sm:$0xff] }
 0x579   : > { %2532 = vst [vmem:[#allocation6 + $0x70] sm:$0xf] %v2525_v42  ;;  %v2612_v51 = vpack.c.bf16 %v2600_v50, %v2596_v49 }
 0x57b   : > { %v2392_v54 = vpop.permute.xlu1 %2391  ;;  %2652 = vmatprep.subr.bf16.mxu0 %v2612_v51  ;;  %v2598_v58 = vld [vmem:[#allocation6 + $0x58] sm:$0xff] }
 0x57c   : > { %v2396_v55 = vsel %vm402_vm11, %v4127_v62, %v2392_v54  ;;  %v2397_v56 = vsel %vm402_vm11, %v2392_v54, %v2394_v23  ;;  %2653 = vmatpush1.bf16.msra.mxu0 %v2611_v53  ;;  %v2597_v1 = vld [vmem:[#allocation6 + $0x50] sm:$0xff] }
 0x57d   : > { %2403 = vst [vmem:[#allocation6 + $0x8] sm:$0xf0] %v2396_v55  ;;  %2404 = vst [vmem:[#allocation6 + $0x10] sm:$0xf0] %v2397_v56 }
 0x57f   : > { %v2443_v57 = vpop.permute.xlu1 %2442  ;;  %v2602_v59 = vld [vmem:[#allocation6 + $0x78] sm:$0xff] }
 0x580   : > { %v2447_v60 = vsel %vm1424_vm13, %v4129_v63, %v2443_v57  ;;  %v2614_v61 = vpack.c.bf16 %v2602_v59, %v2598_v58  ;;  %v2601_v2 = vld [vmem:[#allocation6 + $0x70] sm:$0xff] }
 0x581   : > { %2454 = vst [vmem:[#allocation6 + $0x28] sm:$0xf0] %v2447_v60  ;;  %v2613_v3 = vpack.c.bf16 %v2601_v2, %v2597_v1 }
 0x582   : > { %2693 = vmatprep.subr.bf16.mxu1 %v2614_v61 }
 0x583   : > { %v2420_v4 = vpop.permute.xlu1 %2419  ;;  %2694 = vmatpush1.bf16.msra.mxu1 %v2613_v3 }
 0x584   : > { %v2423_v62 = vsel %vm423_vm10, %v4148_v18, %v2420_v4  ;;  %2431 = vst.msk [vmem:[#allocation6 + $0x38] sm:$0xf] %vm2379_vm2, %v2420_v4  ;;  %v2588_v63 = vld [vmem:[#allocation6 + $0x8] sm:$0xff]  ;;  %v2589_v16 = vld [vmem:[#allocation6 + $0x10] sm:$0xff] }
 0x585   : > { %2430 = vst [vmem:[#allocation6 + $0x30] sm:$0xf] %v2423_v62 }
 0x587   : > { %v2445_v5 = vpop.permute.xlu1 %2444 }
 0x588   : > { %v2448_v6 = vsel %vm1424_vm13, %v2443_v57, %v2445_v5  ;;  %2456 = vst.msk [vmem:[#allocation6 + $0x38] sm:$0xf0] %vm2405_vm12, %v2445_v5  ;;  %v2592_v7 = vld [vmem:[#allocation6 + $0x28] sm:$0xff] }
 0x589   : > { %2455 = vst [vmem:[#allocation6 + $0x30] sm:$0xf0] %v2448_v6  ;;  %v2608_v8 = vpack.c.bf16 %v2592_v7, %v2588_v63 }
 0x58b   : > { %2654 = vmatprep.subr.bf16.mxu0 %v2608_v8 }
 0x58c   : > { %2655 = vmatpush1.bf16.msra.mxu0 %v2607_v10 }
 0x58f   : > { %2992 = vmatmul.mubr.msk.bf16.vlgmr.msra.gmra.mxu0 %vm586_vm9, %v2586_v11  ;;  %v2594_v14 = vld [vmem:[#allocation6 + $0x38] sm:$0xff] }
 0x590   : > { %v2610_v15 = vpack.c.bf16 %v2594_v14, %v2590_v12  ;;  %v2593_v17 = vld [vmem:[#allocation6 + $0x30] sm:$0xff] }
 0x591   : > { %v2609_v18 = vpack.c.bf16 %v2593_v17, %v2589_v16 }
 0x592   : > { %2695 = vmatprep.subr.bf16.mxu1 %v2610_v15 }
 0x593   : > { %2696 = vmatpush1.bf16.msra.mxu1 %v2609_v18 }
 0x596   : > { %2994 = vmatmul.mubr.msk.bf16.vlgmr.msra.gmra.mxu1 %vm586_vm9, %v2586_v11 }
 0x64f   : > { %v2674_v20 = vpop.f32.mrf.mxu0 }
 0x650   : > { %v2675_v21 = vadd.f32 %v2674_v20, %v2623_v19 }
 0x651   : > { %v2676_v22 = vpop.f32.mrf.mxu0 }
 0x652   : > { %v2677_v23 = vadd.f32 %v2676_v22, %v2623_v19  ;;  %v2722_v25 = vmax.f32 %v2675_v21, 0.0 }
 0x653   : > { %v2678_v24 = vpop.f32.mrf.mxu0 }
 0x654   : > { %v2723_v26 = vmax.f32 %v2677_v23, 0.0 }
 0x655   : > { %v2679_v27 = vpop.f32.mrf.mxu0 }
 0x656   : > { %v2730_v28 = vcombine.low %v2722_v25, %v2723_v26  ;;  %v2715_v29 = vpop.f32.mrf.mxu1 }
 0x657   : > { %v2716_v30 = vadd.f32 %v2715_v29, %v2623_v19 }
 0x658   : > { %2734 = vst [vmem:[%s379_s11] sm:$0xff] %v2730_v28  ;;  %v2717_v31 = vpop.f32.mrf.mxu1 }
 0x659   : > { %v2718_v32 = vadd.f32 %v2717_v31, %v2623_v19  ;;  %v2724_v34 = vmax.f32 %v2716_v30, 0.0 }
 0x65a   : > { %v2719_v33 = vpop.f32.mrf.mxu1 }
 0x65b   : > { %v2725_v36 = vmax.f32 %v2718_v32, 0.0 }
 0x65c   : > { %v2720_v37 = vpop.f32.mrf.mxu1 }
 0x65d   : > { %v2731_v38 = vcombine.low %v2724_v34, %v2725_v36 }
 0x65f   : > { %2736 = vst.msk [vmem:[%s379_s11 + $0x8] sm:$0xff] %vm2735_vm3, %v2731_v38 }
 0x660 PF: > { %s20_s13 = sadd.s32 1, %s3327_s13  }
 0x661   : > { %p17_p4 = scmp.ge.s32.totalorder %s20_s13, 4  }
 0x663   :  { %19 = sbr.rel (!%p17_p4) target bundleno = 1 (0x1), region = 93 }

// kernel: up_block_forward.1
= control target key start
LH: loop header
LB: loop body
LE: loop exit
PB: predicated region body
PF: predicated region fallthrough
CT: control target
= control target key end

     0   :  { %s3406_s13 = smov 0   ;;  %s4200_s0 = inlined_call_operand.vmem [shape: f32[2,4,326], index: 0, kind: input, shape index: {}]   ;;  %s4201_s1 = inlined_call_operand.vmem [shape: f32[2,2,402], index: 1, kind: input, shape index: {}]   ;;  %s4202_s2 = inlined_call_operand.vmem [shape: bf16[288,402], index: 2, kind: input, shape index: {}]   ;;  %s4203_s3 = inlined_call_operand.vmem [shape: bf16[360,486], index: 3, kind: input, shape index: {}]   ;;  %s4204_s4 = inlined_call_operand.vmem [shape: bf16[2,36], index: 4, kind: input, shape index: {}]   ;;  %s4205_s5 = inlined_call_operand.vmem [shape: f32[2,1], index: 5, kind: input, shape index: {}]   ;;  %s4206_s6 = inlined_call_operand.vmem [shape: bf16[4,36], index: 6, kind: input, shape index: {}]   ;;  %s4207_s7 = inlined_call_operand.vmem [shape: f32[4,1], index: 7, kind: input, shape index: {}]   ;;  %s4208_s8 = inlined_call_operand.vmem [shape: bf16[4,36], index: 8, kind: input, shape index: {}]   ;;  %s4209_s9 = inlined_call_operand.vmem [shape: f32[4,1], index: 9, kind: input, shape index: {}]   ;;  %s4210_s10 = inlined_call_operand.vmem [shape: f32[2,4,440], index: 10, kind: output, shape index: {}]  }
   0x1 LB: > { %s2804_s14 = sadd.s32 4294967295, %s3327_s13   ;;  %p2808_p0 = scmp.ge.s32.totalorder %s3327_s13, 1  ;;  %s3327_s13 = sphi %s3406_s13, %s20_s13  }
   0x2   : > { %p322_p1 = scmp.lt.s32.totalorder %s3327_s13, 3 }
   0x4   : > { %p323_p2 = pnand %p2808_p0, %p322_p1 }
   0x5   : > { %p365_p3 = scmp.lt.s32.totalorder (!%p323_p2), %s2804_s14, 1  ;;  %s3330_s19 = smov (!%p323_p2), 90  }
   0x6   : > { %326 = sbr.rel (%p323_p2) target bundleno = 1632 (0x660), region = 60  ;;  %s3331_s20 = smov (!%p323_p2), 92  }
   0x7   : > { %s3332_s21 = smov (!%p323_p2), 108   ;;  %s3333_s22 = smov (!%p323_p2), 109  }
   0x8   : > { %s3334_s23 = smov (!%p323_p2), 91   ;;  %s3335_s24 = smov (!%p323_p2), 127  }
   0x9   : > { %s3337_s25 = smov (!%p323_p2), 126   ;;  %s3338_s26 = smov (!%p323_p2), 110  }
   0xa   : > { %s3341_s29 = smov (!%p323_p2), 86   ;;  %s3342_s30 = smov (!%p323_p2), 88  }
   0xb   : > { %s4212_s14 = smov (!%p365_p3, %s2804_s14), 1  ;;  %v3329_v0 = vmov 0.0   ;;  %vm388_vm0 = vcmask 257024   ;;  %vm3336_vm1 = vmmov 0   ;;  %v3339_v13 = vmov 0   ;;  %s3343_s11 = smov 87  }
   0xc   : > { %s3027_s15 = smul.u32 12, %s4212_s14  ;;  %3007 = vmatprep.subr.bf16.mxu1 %v3329_v0  ;;  %3013 = vmatprep.mubr.msk.bf16.mxu1 %vm3336_vm1, %v3329_v0  ;;  %v580_v14 = vld [vmem:[%s4205_s5] sm:$0x3]  ;;  %vm410_vm2 = vcmask 261124   ;;  %vm590_vm3 = vcmask 1041408   ;;  %vm546_vm4 = vcmask 736256  }
   0xd   : > { %632 = vmatprep.mubr.bf16.mxu0 %v3339_v13  ;;  %3058 = vset.pattern.permute.xlu0 %v3339_v13  ;;  %vm464_vm5 = vcmask 891904   ;;  %vm485_vm6 = vcmask 883712   ;;  %v3083_v37 = vld [vmem:[%s4202_s2 + $0x224] ss:$16 sps:$4 sm:$0xff]   ;;  %vm505_vm7 = vcmask 752640   ;;  %vm526_vm8 = vcmask 744448  }
   0xe   : > { %s369_s18 = scalar_lea.vmem %s4200_s0, %s3027_s15  ;;  %3059 = vset.pattern.permute.xlu1 %v3339_v13  ;;  %v3473_v41 = vld [vmem:[%s4204_s4] sm:$0x1]  ;;  %vm586_vm9 = vcmask 293888   ;;  %vm423_vm10 = vcmask 1031168   ;;  %vm402_vm11 = vcmask 1039360   ;;  %vm444_vm12 = vcmask 900096  }
   0xf   : > { %v536_v1 = vld [vmem:[%s369_s18 + $0x8] sm:$0xf]  ;;  %v535_v7 = vld [vmem:[%s369_s18] sm:$0xff]  ;;  %vm1119_vm13 = vcmask 261120   ;;  %vm1319_vm14 = vcmask 1043458   ;;  %vm1320_vm15 = vcmask 146438  }
  0x10   : > { %v495_v2 = vld [vmem:[%s369_s18 + $0x8] sm:$0xf]  ;;  %544 = vrot.lane.b32.xlu0 %v536_v1, %s3330_s19  ;;  %v539_v9 = vcombine.high %v535_v7, %v535_v7  ;;  %386 = vst [vmem:[#allocation2] sm:$0xf] %v535_v7  ;;  %v477_v12 = vcombine.low %v535_v7, %v535_v7  ;;  %v3081_v42 = vld [vmem:[%s4202_s2 + $0x220] ss:$16 sps:$4 sm:$0xff]  }
  0x11   : > { %503 = vrot.lane.b32.xlu1 %v495_v2, %s3331_s20  ;;  %v3060_v3 = vld [vmem:[%s369_s18 + $0x8] ss:$0 sps:$4 sm:$0xff]   ;;  %s3344_s12 = smov 107   ;;  %s3345_s15 = smov 106  }
  0x12   : > { %v454_v4 = vld [vmem:[%s369_s18 + $0x8] sm:$0xf]  ;;  %387 = vst [vmem:[#allocation2 + $0x8] sm:$0xf] %v539_v9 }
  0x13   : > { %v3061_v5 = vld [vmem:[%s369_s18 + $0x8] ss:$0 sps:$4 sm:$0xff]  }
  0x14   : > { %v3062_v6 = vld [vmem:[%s369_s18 + $0x8] ss:$0 sps:$4 sm:$0xff]   ;;  %462 = vrot.lane.b32.xlu0 %v454_v4, %s3333_s22 }
  0x15   : > { %v382_v8 = vld [vmem:[%s369_s18 + $0x8] sm:$0xf]  ;;  %483 = vrot.lane.b32.xlu1 %v3060_v3, %s3332_s21 }
  0x16   : > { %389 = vst.msk [vmem:[#allocation2 + $0x10] sm:$0xf] %vm388_vm0, %v382_v8  ;;  %v3063_v10 = vld [vmem:[%s369_s18 + $0x8] ss:$0 sps:$4 sm:$0xff]  }
  0x17   : > { %v413_v11 = vld [vmem:[%s369_s18 + $0x8] sm:$0xf] }
  0x18   : > { %524 = vrot.lane.b32.xlu0 %v3061_v5, %s3334_s23 }
  0x19   : > { %400 = vrot.lane.b32.xlu1 %v3062_v6, %s3335_s24 }
  0x1c   : > { %421 = vrot.lane.b32.xlu0 %v413_v11, %s3337_s25 }
  0x1d   : > { %442 = vrot.lane.b32.xlu1 %v3063_v10, %s3338_s26 }
  0x20   : > { %540 = vrot.lane.b32.xlu0 %v535_v7, %s3330_s19 }
  0x21   : > { %542 = vrot.lane.b32.xlu1 %v539_v9, %s3330_s19  ;;  %s3346_s19 = smov 82  }
  0x24   : > { %460 = vrot.lane.b32.xlu0 %v539_v9, %s3333_s22 }
  0x25   : > { %481 = vrot.lane.b32.xlu1 %v535_v7, %s3332_s21 }
  0x28   : > { %501 = vrot.lane.b32.xlu0 %v539_v9, %s3331_s20 }
  0x29   : > { %522 = vrot.lane.b32.xlu1 %v535_v7, %s3334_s23 }
  0x2c   : > { %458 = vrot.lane.b32.xlu0 %v535_v7, %s3333_s22  ;;  %s3348_s22 = smov 83  }
  0x2d   : > { %479 = vrot.lane.b32.xlu1 %v477_v12, %s3332_s21 }
  0x30   : > { %499 = vrot.lane.b32.xlu0 %v535_v7, %s3331_s20  ;;  %s3347_s20 = smov 104  }
  0x31   : > { %520 = vrot.lane.b32.xlu1 %v477_v12, %s3334_s23  ;;  %s2997_s23 = sshll.u32 %s4212_s14, 3 }
  0x32   : > { %s374_s28 = scalar_lea.vmem %s4201_s1, %s2997_s23  ;;  %s3349_s23 = smov 105  }
  0x34   : > { %398 = vrot.lane.b32.xlu0 %v535_v7, %s3335_s24 }
  0x35   : > { %419 = vrot.lane.b32.xlu1 %v539_v9, %s3337_s25 }
  0x38   : > { %440 = vrot.lane.b32.xlu0 %v535_v7, %s3338_s26 }
  0x39   : > { %396 = vrot.lane.b32.xlu1 %v477_v12, %s3335_s24 }
  0x3c   : > { %417 = vrot.lane.b32.xlu0 %v535_v7, %s3337_s25 }
  0x3d   : > { %438 = vrot.lane.b32.xlu1 %v477_v12, %s3338_s26  ;;  %s3350_s26 = smov 84  }
  0x40   : > { %583 = vperm.xlu0 %3058, %v580_v14  }
  0x82   : > { %v545_v15 = vpop.permute.xlu0 %544 }
  0x83   : > { %v504_v16 = vpop.permute.xlu1 %503  ;;  %554 = vst.msk [vmem:[#allocation2 + $0x70] sm:$0xf] %vm388_vm0, %v545_v15 }
  0x84   : > { %513 = vst.msk [vmem:[#allocation2 + $0x58] sm:$0xf] %vm388_vm0, %v504_v16 }
  0x86   : > { %v463_v18 = vpop.permute.xlu0 %462 }
  0x87   : > { %v484_v17 = vpop.permute.xlu1 %483  ;;  %472 = vst.msk [vmem:[#allocation2 + $0x40] sm:$0xf] %vm388_vm0, %v463_v18 }
  0x88   : > { %493 = vst.msk [vmem:[#allocation2 + $0x40] sm:$0xf0] %vm410_vm2, %v484_v17 }
  0x8a   : > { %v525_v19 = vpop.permute.xlu0 %524  ;;  %v570_v21 = vld [vmem:[#allocation2 + $0x70] sm:$0xf] }
  0x8b   : > { %v3449_v20 = vpop.permute.xlu1 %400  ;;  %534 = vst.msk [vmem:[#allocation2 + $0x58] sm:$0xf0] %vm410_vm2, %v525_v19  ;;  %v579_v22 = vpack.c.bf16 %v570_v21, %v570_v21  ;;  %v3068_v21 = vld [vmem:[%s4202_s2 + $0xe4] ss:$16 sps:$4 sm:$0xff]  }
  0x8c   : > { %411 = vst.msk [vmem:[#allocation2 + $0x10] sm:$0xf0] %vm410_vm2, %v3449_v20 }
  0x8d   : > { %v598_v23 = vsel %vm590_vm3, %v579_v22, 0 }
  0x8e   : > { %3008 = vmatpush3.bf16.msra.mxu1 %v598_v23  ;;  %v3455_v24 = vpop.permute.xlu0 %421  ;;  %v3066_v23 = vld [vmem:[%s4202_s2 + $0xe0] ss:$16 sps:$4 sm:$0xff]  }
  0x8f   : > { %v3457_v25 = vpop.permute.xlu1 %442  ;;  %431 = vst.msk [vmem:[#allocation2 + $0x28] sm:$0xf] %vm388_vm0, %v3455_v24  ;;  %3009 = vmatprep.subr.bf16.mxu1 %v3329_v0  ;;  %v564_v28 = vld [vmem:[#allocation2 + $0x40] sm:$0xff]  ;;  %vm1321_vm0 = vmor %vm1320_vm15, %vm1319_vm14  ;;  %vm1403_vm14 = vcmask 875520   ;;  %vm2179_vm15 = vcmask 1043456  }
  0x90   : > { %452 = vst.msk [vmem:[#allocation2 + $0x28] sm:$0xf0] %vm410_vm2, %v3457_v25 }
  0x92   : > { %v541_v26 = vpop.permute.xlu0 %540  ;;  %v567_v29 = vld [vmem:[#allocation2 + $0x58] sm:$0xff] }
  0x93   : > { %v543_v27 = vpop.permute.xlu1 %542  ;;  %v576_v32 = vpack.c.bf16 %v567_v29, %v564_v28  ;;  %v558_v35 = vld [vmem:[#allocation2 + $0x10] sm:$0xff] }
  0x94   : > { %v547_v30 = vsel %vm546_vm4, %v541_v26, %v543_v27  ;;  %v548_v31 = vsel %vm546_vm4, %v543_v27, %v545_v15  ;;  %v3074_v26 = vld [vmem:[%s4202_s2 + $0xa4] ss:$16 sps:$4 sm:$0xff]   ;;  %v3072_v27 = vld [vmem:[%s4202_s2 + $0xa0] ss:$16 sps:$4 sm:$0xff]   ;;  %vm1330_vm4 = vcmask 846848  }
  0x95   : > { %552 = vst [vmem:[#allocation2 + $0x60] sm:$0xf] %v547_v30  ;;  %553 = vst [vmem:[#allocation2 + $0x68] sm:$0xf] %v548_v31  ;;  %3010 = vmatpush3.bf16.msra.mxu1 %v576_v32  ;;  %v3077_v28 = vld [vmem:[%s4202_s2 + $0x84] ss:$16 sps:$4 sm:$0xff]  }
  0x96   : > { %v461_v33 = vpop.permute.xlu0 %460  ;;  %3011 = vmatprep.subr.bf16.mxu1 %v3329_v0  ;;  %v3075_v29 = vld [vmem:[%s4202_s2 + $0x80] ss:$16 sps:$4 sm:$0xff]   ;;  %v3080_v30 = vld [vmem:[%s4202_s2 + $0x64] ss:$16 sps:$4 sm:$0xff]  }
  0x97   : > { %v482_v34 = vpop.permute.xlu1 %481  ;;  %v561_v36 = vld [vmem:[#allocation2 + $0x28] sm:$0xff]  ;;  %v466_v38 = vsel %vm464_vm5, %v461_v33, %v463_v18  ;;  %v3078_v31 = vld [vmem:[%s4202_s2 + $0x60] ss:$16 sps:$4 sm:$0xff]   ;;  %v3086_v32 = vld [vmem:[%s4202_s2 + $0x44] ss:$16 sps:$4 sm:$0xff]  }
  0x98   : > { %v487_v39 = vsel %vm485_vm6, %v482_v34, %v484_v17  ;;  %v573_v40 = vpack.c.bf16 %v561_v36, %v558_v35  ;;  %471 = vst [vmem:[#allocation2 + $0x38] sm:$0xf] %v466_v38  ;;  %v3087_v35 = vld [vmem:[%s4202_s2 + $0x200] ss:$16 sps:$4 sm:$0xff]   ;;  %v3092_v36 = vld [vmem:[%s4202_s2 + $0x24] ss:$16 sps:$4 sm:$0xff]  }
  0x99   : > { %492 = vst [vmem:[#allocation2 + $0x38] sm:$0xf0] %v487_v39  ;;  %v3095_v38 = vld [vmem:[%s4202_s2 + $0xec] ss:$16 sps:$4 sm:$0xff]   ;;  %v3098_v39 = vld [vmem:[%s4202_s2 + $0x4] ss:$16 sps:$4 sm:$0xff]  }
  0x9a   : > { %3012 = vmatpush3.bf16.msra.mxu1 %v573_v40  ;;  %v502_v43 = vpop.permute.xlu0 %501  ;;  %v3096_v40 = vld [vmem:[%s4202_s2] ss:$16 sps:$4 sm:$0xff]  }
  0x9b   : > { %v523_v44 = vpop.permute.xlu1 %522  ;;  %1176 = vmatprep.subr.bf16.mxu1 %v3083_v37  ;;  %v507_v45 = vsel %vm505_vm7, %v502_v43, %v504_v16  ;;  %v3090_v37 = vld [vmem:[%s4202_s2 + $0x20] ss:$16 sps:$4 sm:$0xff]  }
  0x9c   : > { %v528_v46 = vsel %vm526_vm8, %v523_v44, %v525_v19  ;;  %v569_v47 = vld [vmem:[#allocation2 + $0x68] sm:$0xf]  ;;  %v568_v48 = vld [vmem:[#allocation2 + $0x60] sm:$0xf]  ;;  %512 = vst [vmem:[#allocation2 + $0x50] sm:$0xf] %v507_v45 }
  0x9d   : > { %533 = vst [vmem:[#allocation2 + $0x50] sm:$0xf0] %v528_v46  ;;  %3014 = vmatmul.mubr.msk.bf16.vlgmr.msra.gmra.mxu1 %vm586_vm9, %v3473_v41  ;;  %v578_v49 = vpack.c.bf16 %v569_v47, %v569_v47  ;;  %v577_v50 = vpack.c.bf16 %v568_v48, %v568_v48  ;;  %v3114_v45 = vld [vmem:[%s4202_s2 + $0x1a0] ss:$16 sps:$4 sm:$0xff]   ;;  %v3116_v46 = vld [vmem:[%s4202_s2 + $0x1a4] ss:$16 sps:$4 sm:$0xff]  }
  0x9e   : > { %1177 = vmatpush1.bf16.msra.mxu1 %v3081_v42  ;;  %1196 = vmatprep.mubr.bf16.mxu1 %v3339_v13  ;;  %v459_v51 = vpop.permute.xlu0 %458  ;;  %v3104_v42 = vld [vmem:[%s4202_s2 + $0x1e4] ss:$16 sps:$4 sm:$0xff]   ;;  %v3120_v47 = vld [vmem:[%s4202_s2 + $0x180] ss:$16 sps:$4 sm:$0xff]  }
  0x9f   : > { %2814 = vmatprep.subr.msk.bf16.mxu0 %vm590_vm3, %v578_v49  ;;  %v480_v52 = vpop.permute.xlu1 %479  ;;  %v592_v53 = vsel %vm590_vm3, %v577_v50, 0  ;;  %v465_v54 = vsel %vm464_vm5, %v459_v51, %v461_v33  ;;  %v3084_v33 = vld [vmem:[%s4202_s2 + $0x40] ss:$16 sps:$4 sm:$0xff]   ;;  %v3122_v48 = vld [vmem:[%s4202_s2 + $0x184] ss:$16 sps:$4 sm:$0xff]   ;;  %vm1495_vm5 = vcmask 703488  }
  0xa0   : > { %v486_v55 = vsel %vm485_vm6, %v480_v52, %v482_v34  ;;  %611 = vmatpush1.bf16.msra.mxu0 %v592_v53  ;;  %470 = vst [vmem:[#allocation2 + $0x30] sm:$0xf] %v465_v54  ;;  %v563_v60 = vld [vmem:[#allocation2 + $0x38] sm:$0xff]  ;;  %v3089_v34 = vld [vmem:[%s4202_s2 + $0x204] ss:$16 sps:$4 sm:$0xff]  }
  0xa1   : > { %491 = vst [vmem:[#allocation2 + $0x30] sm:$0xf0] %v486_v55  ;;  %1178 = vmatprep.subr.bf16.mxu1 %v3089_v34  ;;  %v3126_v49 = vld [vmem:[%s4202_s2 + $0x160] ss:$16 sps:$4 sm:$0xff]   ;;  %v3128_v50 = vld [vmem:[%s4202_s2 + $0x164] ss:$16 sps:$4 sm:$0xff]  }
  0xa2   : > { %v500_v56 = vpop.permute.xlu0 %499  ;;  %1179 = vmatpush1.bf16.msra.mxu1 %v3087_v35  ;;  %v3132_v51 = vld [vmem:[%s4202_s2 + $0x140] ss:$16 sps:$4 sm:$0xff]   ;;  %v3134_v52 = vld [vmem:[%s4202_s2 + $0x144] ss:$16 sps:$4 sm:$0xff]   ;;  %v3155_v34 = vld [vmem:[%s4202_s2 + $0x1ac] ss:$16 sps:$4 sm:$0xff]  }
  0xa3   : > { %v521_v57 = vpop.permute.xlu1 %520  ;;  %v506_v58 = vsel %vm505_vm7, %v500_v56, %v502_v43  ;;  %1205 = vmatprep.subr.bf16.mxu1 %v3095_v38  ;;  %v3108_v43 = vld [vmem:[%s4202_s2 + $0x1c0] ss:$16 sps:$4 sm:$0xff]   ;;  %v3140_v53 = vld [vmem:[%s4202_s2 + $0x124] ss:$16 sps:$4 sm:$0xff]   ;;  %v3158_v35 = vld [vmem:[%s4202_s2 + $0x20c] ss:$16 sps:$4 sm:$0xff]  }
  0xa4   : > { %v527_v59 = vsel %vm526_vm8, %v521_v57, %v523_v44  ;;  %v566_v61 = vld [vmem:[#allocation2 + $0x50] sm:$0xff]  ;;  %511 = vst [vmem:[#allocation2 + $0x48] sm:$0xf] %v506_v58  ;;  %v3152_v57 = vld [vmem:[%s4202_s2 + $0x22c] ss:$16 sps:$4 sm:$0xff]   ;;  %vm1471_vm7 = vcmask 711680  }
  0xa5   : > { %532 = vst [vmem:[#allocation2 + $0x48] sm:$0xf0] %v527_v59  ;;  %v575_v62 = vpack.c.bf16 %v566_v61, %v563_v60  ;;  %v3110_v44 = vld [vmem:[%s4202_s2 + $0x1c4] ss:$16 sps:$4 sm:$0xff]   ;;  %v3138_v54 = vld [vmem:[%s4202_s2 + $0x120] ss:$16 sps:$4 sm:$0xff]  }
  0xa6   : > { %v399_v1 = vpop.permute.xlu0 %398  ;;  %v3146_v55 = vld [vmem:[%s4202_s2 + $0x104] ss:$16 sps:$4 sm:$0xff]   ;;  %v3144_v56 = vld [vmem:[%s4202_s2 + $0x100] ss:$16 sps:$4 sm:$0xff]   ;;  %v3161_v38 = vld [vmem:[%s4202_s2 + $0x18c] ss:$16 sps:$4 sm:$0xff]  }
  0xa7   : > { %612 = vmatprep.subr.bf16.mxu0 %v575_v62  ;;  %v420_v63 = vpop.permute.xlu1 %419  ;;  %v404_v3 = vsel %vm402_vm11, %v399_v1, %v3449_v20  ;;  %vm1351_vm8 = vcmask 850948  }
  0xa8   : > { %v425_v2 = vsel %vm423_vm10, %v420_v63, %v3455_v24  ;;  %409 = vst [vmem:[#allocation2 + $0x8] sm:$0xf0] %v404_v3  ;;  %v562_v4 = vld [vmem:[#allocation2 + $0x30] sm:$0xff]  ;;  %v3101_v3 = vld [vmem:[%s4202_s2 + $0xcc] ss:$16 sps:$4 sm:$0xff]  }
  0xa9   : > { %430 = vst [vmem:[#allocation2 + $0x20] sm:$0xf] %v425_v2  ;;  %v3071_v24 = vld [vmem:[%s4202_s2 + $0xc4] ss:$16 sps:$4 sm:$0xff]  }
  0xaa   : > { %v441_v5 = vpop.permute.xlu0 %440 }
  0xab   : > { %v397_v6 = vpop.permute.xlu1 %396  ;;  %v446_v7 = vsel %vm444_vm12, %v441_v5, %v3457_v25  ;;  %v3069_v25 = vld [vmem:[%s4202_s2 + $0xc0] ss:$16 sps:$4 sm:$0xff]  }
  0xac   : > { %v403_v8 = vsel %vm402_vm11, %v397_v6, %v399_v1  ;;  %v565_v9 = vld [vmem:[#allocation2 + $0x48] sm:$0xff]  ;;  %451 = vst [vmem:[#allocation2 + $0x20] sm:$0xf0] %v446_v7 }
  0xad   : > { %408 = vst [vmem:[#allocation2] sm:$0xf0] %v403_v8  ;;  %v574_v10 = vpack.c.bf16 %v565_v9, %v562_v4  ;;  %v3093_v1 = vld [vmem:[%s4202_s2 + $0xe8] ss:$16 sps:$4 sm:$0xff]   ;;  %v3107_v6 = vld [vmem:[%s4202_s2 + $0xac] ss:$16 sps:$4 sm:$0xff]  }
  0xae   : > { %v418_v11 = vpop.permute.xlu0 %417  ;;  %v3105_v7 = vld [vmem:[%s4202_s2 + $0xa8] ss:$16 sps:$4 sm:$0xff]   ;;  %v3113_v8 = vld [vmem:[%s4202_s2 + $0x8c] ss:$16 sps:$4 sm:$0xff]  }
  0xaf   : > { %v439_v12 = vpop.permute.xlu1 %438  ;;  %613 = vmatpush1.bf16.msra.mxu0 %v574_v10  ;;  %v424_v14 = vsel %vm423_vm10, %v418_v11, %v420_v63  ;;  %v557_v16 = vld [vmem:[#allocation2 + $0x8] sm:$0xff] }
  0xb0   : > { %v445_v15 = vsel %vm444_vm12, %v439_v12, %v441_v5  ;;  %429 = vst [vmem:[#allocation2 + $0x18] sm:$0xf] %v424_v14  ;;  %v3099_v5 = vld [vmem:[%s4202_s2 + $0xc8] ss:$16 sps:$4 sm:$0xff]   ;;  %v3119_v10 = vld [vmem:[%s4202_s2 + $0x6c] ss:$16 sps:$4 sm:$0xff]  }
  0xb1   : > { %450 = vst [vmem:[#allocation2 + $0x18] sm:$0xf0] %v445_v15  ;;  %v3111_v9 = vld [vmem:[%s4202_s2 + $0x88] ss:$16 sps:$4 sm:$0xff]   ;;  %v3125_v12 = vld [vmem:[%s4202_s2 + $0x4c] ss:$16 sps:$4 sm:$0xff]  }
  0xb2   : > { %v3117_v11 = vld [vmem:[%s4202_s2 + $0x68] ss:$16 sps:$4 sm:$0xff]   ;;  %v3131_v15 = vld [vmem:[%s4202_s2 + $0x2c] ss:$16 sps:$4 sm:$0xff]   ;;  %vm1447_vm12 = vcmask 719872  }
  0xb3   : > { %v560_v17 = vld [vmem:[#allocation2 + $0x20] sm:$0xff]  ;;  %v3123_v14 = vld [vmem:[%s4202_s2 + $0x48] ss:$16 sps:$4 sm:$0xff]  }
  0xb4   : > { %v572_v18 = vpack.c.bf16 %v560_v17, %v557_v16  ;;  %v556_v19 = vld [vmem:[#allocation2] sm:$0xff]  ;;  %v3129_v16 = vld [vmem:[%s4202_s2 + $0x28] ss:$16 sps:$4 sm:$0xff]   ;;  %v3137_v17 = vld [vmem:[%s4202_s2 + $0xc] ss:$16 sps:$4 sm:$0xff]  }
  0xb6   : > { %614 = vmatprep.subr.bf16.mxu0 %v572_v18  ;;  %v3135_v18 = vld [vmem:[%s4202_s2 + $0x8] ss:$16 sps:$4 sm:$0xff]  }
  0xb8   : > { %v559_v20 = vld [vmem:[#allocation2 + $0x18] sm:$0xff] }
  0xb9   : > { %v571_v22 = vpack.c.bf16 %v559_v20, %v556_v19  ;;  %v3143_v20 = vld [vmem:[%s4202_s2 + $0x1ec] ss:$16 sps:$4 sm:$0xff]  }
  0xbb   : > { %615 = vmatpush1.bf16.msra.mxu0 %v571_v22  ;;  %v584_v58 = vpop.permute.xlu0 %583 }
  0xbc   : > { %1123 = vmatprep.subr.bf16.mxu0 %v3068_v21 }
  0xbe   : > { %2815 = vmatmul.mubr.msk.bf16.vlgmr.msra.gmra.mxu0 %vm586_vm9, %v3473_v41  ;;  %v3102_v41 = vld [vmem:[%s4202_s2 + $0x1e0] ss:$16 sps:$4 sm:$0xff]  }
  0xbf   : > { %1124 = vmatpush1.bf16.msra.mxu0 %v3066_v23 }
  0xc0   : > { %1125 = vmatprep.subr.bf16.mxu0 %v3071_v24  ;;  %v3141_v24 = vld [vmem:[%s4202_s2 + $0x1e8] ss:$16 sps:$4 sm:$0xff]  }
  0xc3   : > { %1126 = vmatpush1.bf16.msra.mxu0 %v3069_v25 }
  0xc4   : > { %1127 = vmatprep.subr.bf16.mxu0 %v3074_v26  ;;  %v3149_v26 = vld [vmem:[%s4202_s2 + $0x1cc] ss:$16 sps:$4 sm:$0xff]  }
  0xc7   : > { %1128 = vmatpush1.bf16.msra.mxu0 %v3072_v27 }
  0xc8   : > { %1129 = vmatprep.subr.bf16.mxu0 %v3077_v28 }
  0xcb   : > { %1130 = vmatpush1.bf16.msra.mxu0 %v3075_v29 }
  0xcc   : > { %1131 = vmatprep.subr.bf16.mxu0 %v3080_v30 }
  0xcf   : > { %1132 = vmatpush1.bf16.msra.mxu0 %v3078_v31  ;;  %v3147_v31 = vld [vmem:[%s4202_s2 + $0x1c8] ss:$16 sps:$4 sm:$0xff]  }
  0xd0   : > { %1133 = vmatprep.subr.bf16.mxu0 %v3086_v32  ;;  %v3150_v32 = vld [vmem:[%s4202_s2 + $0x228] ss:$16 sps:$4 sm:$0xff]  }
  0xd3   : > { %1134 = vmatpush1.bf16.msra.mxu0 %v3084_v33 }
  0xd4   : > { %1135 = vmatprep.subr.bf16.mxu0 %v3092_v36  ;;  %v3153_v36 = vld [vmem:[%s4202_s2 + $0x1a8] ss:$16 sps:$4 sm:$0xff]  }
  0xd7   : > { %1136 = vmatpush1.bf16.msra.mxu0 %v3090_v37  ;;  %v3156_v37 = vld [vmem:[%s4202_s2 + $0x208] ss:$16 sps:$4 sm:$0xff]  }
  0xd8   : > { %1137 = vmatprep.subr.bf16.mxu0 %v3098_v39  ;;  %v3159_v39 = vld [vmem:[%s4202_s2 + $0x188] ss:$16 sps:$4 sm:$0xff]  }
  0xdb   : > { %1138 = vmatpush1.bf16.msra.mxu0 %v3096_v40  ;;  %v3164_v40 = vld [vmem:[%s4202_s2 + $0x16c] ss:$16 sps:$4 sm:$0xff]  }
  0xdc   : > { %1139 = vmatprep.subr.bf16.mxu0 %v3104_v42  ;;  %v3167_v42 = vld [vmem:[%s4202_s2 + $0x14c] ss:$16 sps:$4 sm:$0xff]  }
  0xdf   : > { %1140 = vmatpush2.bf16.msra.mxu0 %v3102_v41  ;;  %v3162_v41 = vld [vmem:[%s4202_s2 + $0x168] ss:$16 sps:$4 sm:$0xff]  }
  0xe0   : > { %1141 = vmatprep.subr.bf16.mxu0 %v3110_v44  ;;  %v3170_v44 = vld [vmem:[%s4202_s2 + $0x12c] ss:$16 sps:$4 sm:$0xff]  }
  0xe3   : > { %1142 = vmatpush2.bf16.msra.mxu0 %v3108_v43  ;;  %v3165_v43 = vld [vmem:[%s4202_s2 + $0x148] ss:$16 sps:$4 sm:$0xff]  }
  0xe4   : > { %1143 = vmatprep.subr.bf16.mxu0 %v3116_v46  ;;  %v3173_v46 = vld [vmem:[%s4202_s2 + $0x10c] ss:$16 sps:$4 sm:$0xff]  }
  0xe7   : > { %1144 = vmatpush2.bf16.msra.mxu0 %v3114_v45  ;;  %v3168_v45 = vld [vmem:[%s4202_s2 + $0x128] ss:$16 sps:$4 sm:$0xff]  }
  0xe8   : > { %1145 = vmatprep.subr.bf16.mxu0 %v3122_v48  ;;  %v1299_v48 = vld [vmem:[%s374_s28] sm:$0xff] }
  0xeb   : > { %1146 = vmatpush2.bf16.msra.mxu0 %v3120_v47  ;;  %v3171_v47 = vld [vmem:[%s4202_s2 + $0x108] ss:$16 sps:$4 sm:$0xff]  }
  0xec   : > { %1147 = vmatprep.subr.bf16.mxu0 %v3128_v50  ;;  %v3340_v50 = vmov 1983009808  }
  0xef   : > { %1148 = vmatpush2.bf16.msra.mxu0 %v3126_v49  ;;  %v1301_v49 = vcombine.low %v1299_v48, %v1299_v48 }
  0xf0   : > { %1149 = vmatprep.subr.bf16.mxu0 %v3134_v52  ;;  %v1312_v52 = vlaneseq }
  0xf1   : > { %2891 = vst.sshfl [vmem:[#allocation3] sm:$0xf0 pattern:$0x76325410] %v1301_v49 }
  0xf3   : > { %1150 = vmatpush2.bf16.msra.mxu0 %v3132_v51  ;;  %v1310_v51 = vunpack.c.l.s4 %v3340_v50 }
  0xf4   : > { %1151 = vmatprep.subr.bf16.mxu0 %v3140_v53 }
  0xf5   : > { %v1311_v53 = vunpack.c.0.s8 %v1310_v51 }
  0xf7   : > { %1152 = vmatpush2.bf16.msra.mxu0 %v3138_v54  ;;  %v1313_v54 = vshrl.u32 %v1312_v52, 7 }
  0xf8   : > { %1153 = vmatprep.subr.bf16.mxu0 %v3146_v55 }
  0xf9   : > { %v1314_v55 = vsub.s32 %v1311_v53, %v1313_v54 }
  0xfb   : > { %1154 = vmatpush2.bf16.msra.mxu0 %v3144_v56  ;;  %v1315_v56 = vrot.slane %v1299_v48, %v1314_v55 }
  0xfc   : > { %1258 = vmatprep.subr.bf16.mxu0 %v3152_v57 }
  0xfd   : > { %1322 = vst.msk [vmem:[#allocation3 + $0x8] sm:$0xcc] %vm1321_vm0, %v1315_v56  ;;  %v1723_v56 = vld [vmem:[%s4203_s3 + $0x2c0] sm:$0xff]  ;;  %vm2365_vm0 = vcmask 834564  }
 0x15d   : > { %v675_v59 = vpop.f32.mrf.mxu1 }
 0x15e   : > { %v676_v60 = vadd.f32 %v675_v59, %v584_v58 }
 0x15f   : > { %v3015_v61 = vpop.f32.mrf.mxu1 }
 0x160   : > { %v683_v62 = vmax.f32 %v676_v60, 0.0 }
 0x161   : > { %v678_v63 = vpop.f32.mrf.mxu1 }
 0x162   : > { %v3609_v2 = vpack.c.bf16 %v683_v62, %v683_v62 }
 0x163   : > { %v3016_v4 = vpop.f32.mrf.mxu1 }
 0x164   : > { %2889 = vmatmul.mubr.msk.bf16.vlgmr.msra.gmra.mxu1 %vm1119_vm13, %v3609_v2 }
 0x165   : > { %1206 = vmatpush1.bf16.msra.mxu1 %v3093_v1 }
 0x166   : > { %1207 = vmatprep.subr.bf16.mxu1 %v3101_v3 }
 0x169   : > { %1208 = vmatpush1.bf16.msra.mxu1 %v3099_v5 }
 0x16a   : > { %1209 = vmatprep.subr.bf16.mxu1 %v3107_v6 }
 0x16d   : > { %1210 = vmatpush1.bf16.msra.mxu1 %v3105_v7 }
 0x16e   : > { %1211 = vmatprep.subr.bf16.mxu1 %v3113_v8 }
 0x171   : > { %1212 = vmatpush1.bf16.msra.mxu1 %v3111_v9 }
 0x172   : > { %1213 = vmatprep.subr.bf16.mxu1 %v3119_v10 }
 0x175   : > { %1214 = vmatpush1.bf16.msra.mxu1 %v3117_v11 }
 0x176   : > { %1215 = vmatprep.subr.bf16.mxu1 %v3125_v12 }
 0x179   : > { %1216 = vmatpush1.bf16.msra.mxu1 %v3123_v14 }
 0x17a   : > { %1217 = vmatprep.subr.bf16.mxu1 %v3131_v15 }
 0x17d   : > { %1218 = vmatpush1.bf16.msra.mxu1 %v3129_v16 }
 0x17e   : > { %v634_v19 = vpop.f32.mrf.mxu0  ;;  %1219 = vmatprep.subr.bf16.mxu1 %v3137_v17 }
 0x17f   : > { %v635_v21 = vadd.f32 %v634_v19, %v584_v58 }
 0x180   : > { %v636_v22 = vpop.f32.mrf.mxu0 }
 0x181   : > { %v637_v23 = vadd.f32 %v636_v22, %v584_v58  ;;  %1220 = vmatpush1.bf16.msra.mxu1 %v3135_v18  ;;  %v681_v25 = vmax.f32 %v635_v21, 0.0 }
 0x182   : > { %1221 = vmatprep.subr.bf16.mxu1 %v3143_v20  ;;  %v638_v27 = vpop.f32.mrf.mxu0 }
 0x183   : > { %v682_v28 = vmax.f32 %v637_v23, 0.0  ;;  %v684_v33 = vpack.c.bf16 %v681_v25, %v681_v25 }
 0x184   : > { %v639_v29 = vpop.f32.mrf.mxu0 }
 0x185   : > { %v685_v30 = vpack.c.bf16 %v682_v28, %v682_v28  ;;  %1222 = vmatpush2.bf16.msra.mxu1 %v3141_v24  ;;  %v1530_v29 = vld [vmem:[%s4207_s7] sm:$0xf] }
 0x186   : > { %1223 = vmatprep.subr.bf16.mxu1 %v3149_v26 }
 0x187   : > { %1155 = vmatprep.mubr.bf16.mxu0 %v685_v30  ;;  %1237 = vmatprep.mubr.bf16.mxu1 %v685_v30 }
 0x188   : > { %1156 = vmatmul.mubr.bf16.vlgmr.msra.gmra.mxu0 %v684_v33 }
 0x189   : > { %1224 = vmatpush2.bf16.msra.mxu1 %v3147_v31  ;;  %1259 = vmatpush1.bf16.msra.mxu0 %v3150_v32 }
 0x18a   : > { %1225 = vmatprep.subr.bf16.mxu1 %v3155_v34  ;;  %1260 = vmatprep.subr.bf16.mxu0 %v3158_v35 }
 0x18b   : > { %1278 = vmatprep.mubr.bf16.mxu0 %v3339_v13 }
 0x18d   : > { %1226 = vmatpush2.bf16.msra.mxu1 %v3153_v36  ;;  %1261 = vmatpush1.bf16.msra.mxu0 %v3156_v37 }
 0x18e   : > { %1227 = vmatprep.subr.bf16.mxu1 %v3161_v38 }
 0x190   : > { %2890 = vmatmul.mubr.msk.bf16.vlgmr.msra.gmra.mxu0 %vm1119_vm13, %v3609_v2  ;;  %vm1424_vm13 = vcmask 867328  }
 0x191   : > { %1228 = vmatpush2.bf16.msra.mxu1 %v3159_v39  ;;  %1580 = vmatprep.mubr.bf16.mxu0 %v3339_v13 }
 0x192   : > { %1229 = vmatprep.subr.bf16.mxu1 %v3164_v40 }
 0x195   : > { %1230 = vmatpush2.bf16.msra.mxu1 %v3162_v41 }
 0x196   : > { %1231 = vmatprep.subr.bf16.mxu1 %v3167_v42 }
 0x199   : > { %1232 = vmatpush2.bf16.msra.mxu1 %v3165_v43 }
 0x19a   : > { %1233 = vmatprep.subr.bf16.mxu1 %v3170_v44 }
 0x19d   : > { %1234 = vmatpush2.bf16.msra.mxu1 %v3168_v45 }
 0x19e   : > { %1235 = vmatprep.subr.bf16.mxu1 %v3173_v46 }
 0x1a1   : > { %1236 = vmatpush2.bf16.msra.mxu1 %v3171_v47 }
 0x1a2   : > { %3017 = vmatprep.subr.bf16.mxu1 %v3329_v0 }
 0x1a4   : > { %1238 = vmatmul.mubr.bf16.vlgmr.msra.gmra.mxu1 %v684_v33 }
 0x1a5   : > { %3023 = vmatprep.mubr.msk.bf16.mxu1 %vm3336_vm1, %v3329_v0  ;;  %vm1296_vm1 = vcmask 144388  }
 0x1a6   : > { %vm1297_vm2 = vmor %vm1296_vm1, %vm590_vm3 }
 0x1a7   : > { %vm2366_vm1 = vmor %vm2365_vm0, %vm2179_vm15 }
 0x224   : > { %v1198_v57 = vpop.f32.mrf.mxu1 }
 0x226   : > { %v1200_v58 = vpop.f32.mrf.mxu1 }
 0x228   : > { %v1202_v59 = vpop.f32.mrf.mxu1 }
 0x22a   : > { %v1203_v60 = vpop.f32.mrf.mxu1 }
 0x248   : > { %v1157_v61 = vpop.f32.mrf.mxu0 }
 0x249   : > { %v1199_v63 = vadd.f32 %v1198_v57, %v1157_v61  ;;  %v2984_v61 = vcombine.high %v1723_v56, %v1723_v56 }
 0x24a   : > { %v1159_v62 = vpop.f32.mrf.mxu0 }
 0x24b   : > { %v1201_v1 = vadd.f32 %v1200_v58, %v1159_v62  ;;  %v2983_v62 = vcombine.low %v1723_v56, %v1723_v56  ;;  %v3188_v56 = vld [vmem:[%s4203_s3 + $0xc4] ss:$16 sps:$4 sm:$0xff]  }
 0x24c   : > { %v1161_v2 = vpop.f32.mrf.mxu0 }
 0x24d   : > { %v1291_v3 = vcombine.low %v1199_v63, %v1201_v1 }
 0x24e   : > { %v1162_v4 = vpop.f32.mrf.mxu0 }
 0x24f   : > { %1295 = vst [vmem:[#allocation3] sm:$0x33] %v1291_v3 }
 0x250   : > { %v1280_v5 = vpop.f32.mrf.mxu0 }
 0x252   : > { %v1282_v6 = vpop.f32.mrf.mxu0 }
 0x254   : > { %v1284_v7 = vpop.f32.mrf.mxu0 }
 0x255   : > { %v2181_v7 = vsel %vm2179_vm15, %v2983_v62, 0  ;;  %v3206_v62 = vld [vmem:[%s4203_s3 + $0x64] ss:$16 sps:$4 sm:$0xff]  }
 0x256   : > { %v1323_v8 = vld [vmem:[#allocation3] sm:$0xff]  ;;  %v1285_v9 = vpop.f32.mrf.mxu0 }
 0x257   : > { %v1326_v10 = vcombine.high %v1323_v8, %v1323_v8  ;;  %1328 = vst [vmem:[#allocation4] sm:$0xf] %v1323_v8  ;;  %v1416_v28 = vcombine.low %v1323_v8, %v1323_v8 }
 0x259   : > { %1329 = vst [vmem:[#allocation4 + $0x8] sm:$0xf] %v1326_v10 }
 0x264   : > { %v1239_v11 = vpop.f32.mrf.mxu1 }
 0x265   : > { %v1281_v14 = vadd.f32 %v1280_v5, %v1239_v11  ;;  %v3781_v5 = vld [vmem:[%s4206_s6] sm:$0x3] }
 0x266   : > { %v1241_v12 = vpop.f32.mrf.mxu1 }
 0x267   : > { %v1283_v15 = vadd.f32 %v1282_v6, %v1241_v12 }
 0x268   : > { %v1243_v16 = vpop.f32.mrf.mxu1 }
 0x269   : > { %v1292_v17 = vcombine.low %v1281_v14, %v1283_v15  ;;  %v3189_v14 = vld [vmem:[%s4203_s3 + $0x2a0] ss:$16 sps:$4 sm:$0xff]  }
 0x26a   : > { %v1244_v18 = vpop.f32.mrf.mxu1 }
 0x26b   : > { %1298 = vst.msk [vmem:[#allocation3 + $0x8] sm:$0x33] %vm1297_vm2, %v1292_v17  ;;  %v3197_v18 = vld [vmem:[%s4203_s3 + $0x284] ss:$16 sps:$4 sm:$0xff]   ;;  %vm2379_vm2 = vcmask 453632  }
 0x272   : > { %v1482_v19 = vld [vmem:[#allocation3 + $0x8] sm:$0xff] }
 0x273   : > { %1491 = vrot.lane.b32.xlu1 %v1482_v19, %s3341_s29  ;;  %1443 = vrot.lane.b32.xlu0 %v1482_v19, %s3342_s30  ;;  %v1324_v20 = vld [vmem:[#allocation3 + $0x8] sm:$0xf]  ;;  %v1486_v22 = vcombine.high %v1482_v19, %v1482_v19  ;;  %v1462_v23 = vcombine.low %v1482_v19, %v1482_v19 }
 0x274   : > { %v1393_v21 = vld [vmem:[#allocation3 + $0x8] sm:$0xf]  ;;  %1331 = vst.msk [vmem:[#allocation4 + $0x10] sm:$0xf] %vm1330_vm4, %v1324_v20 }
 0x275   : > { %v3178_v24 = vld [vmem:[#allocation3 + $0x8] ss:$0 sps:$4 sm:$0xff]  }
 0x276   : > { %v3179_v25 = vld [vmem:[#allocation3 + $0x8] ss:$0 sps:$4 sm:$0xff]  }
 0x277   : > { %1469 = vrot.lane.b32.xlu1 %v1482_v19, %s3343_s11  ;;  %1401 = vrot.lane.b32.xlu0 %v1393_v21, %s3344_s12  ;;  %v3180_v26 = vld [vmem:[#allocation3 + $0x8] ss:$0 sps:$4 sm:$0xff]  }
 0x278   : > { %v1354_v27 = vld [vmem:[#allocation3 + $0x8] sm:$0xf] }
 0x279   : > { %v3195_v21 = vld [vmem:[%s4203_s3 + $0x280] ss:$16 sps:$4 sm:$0xff]  }
 0x27b   : > { %1493 = vrot.lane.b32.xlu1 %v1486_v22, %s3341_s29  ;;  %1467 = vrot.lane.b32.xlu0 %v1462_v23, %s3343_s11 }
 0x27f   : > { %1445 = vrot.lane.b32.xlu1 %v1486_v22, %s3342_s30  ;;  %1342 = vrot.lane.b32.xlu0 %v3178_v24, %s3335_s24  ;;  %v3203_v24 = vld [vmem:[%s4203_s3 + $0x264] ss:$16 sps:$4 sm:$0xff]  }
 0x283   : > { %1422 = vrot.lane.b32.xlu1 %v3179_v25, %s3345_s15  ;;  %1382 = vrot.lane.b32.xlu0 %v3180_v26, %s3332_s21 }
 0x287   : > { %1362 = vrot.lane.b32.xlu1 %v1354_v27, %s3337_s25  ;;  %1489 = vrot.lane.b32.xlu0 %v1326_v10, %s3341_s29 }
 0x28b   : > { %1487 = vrot.lane.b32.xlu1 %v1323_v8, %s3341_s29  ;;  %1420 = vrot.lane.b32.xlu0 %v1323_v8, %s3345_s15 }
 0x28f   : > { %1399 = vrot.lane.b32.xlu1 %v1326_v10, %s3344_s12  ;;  %1465 = vrot.lane.b32.xlu0 %v1323_v8, %s3343_s11 }
 0x293   : > { %1441 = vrot.lane.b32.xlu1 %v1326_v10, %s3342_s30  ;;  %1418 = vrot.lane.b32.xlu0 %v1416_v28, %s3345_s15 }
 0x297   : > { %1397 = vrot.lane.b32.xlu1 %v1323_v8, %s3344_s12  ;;  %1463 = vrot.lane.b32.xlu0 %v1416_v28, %s3343_s11 }
 0x29b   : > { %1439 = vrot.lane.b32.xlu1 %v1323_v8, %s3342_s30  ;;  %1360 = vrot.lane.b32.xlu0 %v1326_v10, %s3337_s25 }
 0x29f   : > { %1340 = vrot.lane.b32.xlu1 %v1323_v8, %s3335_s24  ;;  %1338 = vrot.lane.b32.xlu0 %v1416_v28, %s3335_s24 }
 0x2a3   : > { %1380 = vrot.lane.b32.xlu1 %v1323_v8, %s3332_s21  ;;  %1378 = vrot.lane.b32.xlu0 %v1416_v28, %s3332_s21 }
 0x2a7   : > { %1358 = vrot.lane.b32.xlu1 %v1323_v8, %s3337_s25  ;;  %v3191_v8 = vld [vmem:[%s4203_s3 + $0x2a4] ss:$16 sps:$4 sm:$0xff]  }
 0x2ab   : > { %1533 = vperm.xlu1 %3059, %v1530_v29  }
 0x2e5   : > { %v1492_v30 = vpop.permute.xlu1 %1491  ;;  %v3744_v31 = vpop.permute.xlu0 %1443 }
 0x2e9   : > { %v1470_v32 = vpop.permute.xlu1 %1469  ;;  %v1402_v33 = vpop.permute.xlu0 %1401 }
 0x2ea   : > { %1411 = vst.msk [vmem:[#allocation4 + $0x40] sm:$0xf] %vm1330_vm4, %v1402_v33 }
 0x2ed   : > { %v1494_v34 = vpop.permute.xlu1 %1493  ;;  %v1468_v35 = vpop.permute.xlu0 %1467 }
 0x2ee   : > { %v1498_v36 = vsel %vm1495_vm5, %v1492_v30, %v1494_v34  ;;  %v1474_v37 = vsel %vm1471_vm7, %v1468_v35, %v1470_v32 }
 0x2ef   : > { %1504 = vst.msk [vmem:[#allocation4 + $0x70] sm:$0xf] %vm1330_vm4, %v1498_v36  ;;  %v3207_v36 = vld [vmem:[%s4203_s3 + $0x240] ss:$16 sps:$4 sm:$0xff]  }
 0x2f0   : > { %1480 = vst.msk [vmem:[#allocation4 + $0x58] sm:$0xf0] %vm1351_vm8, %v1474_v37 }
 0x2f1   : > { %v1446_v38 = vpop.permute.xlu1 %1445  ;;  %v3751_v39 = vpop.permute.xlu0 %1342 }
 0x2f2   : > { %v1450_v40 = vsel %vm1447_vm12, %v3744_v31, %v1446_v38  ;;  %1352 = vst.msk [vmem:[#allocation4 + $0x10] sm:$0xf0] %vm1351_vm8, %v3751_v39 }
 0x2f3   : > { %1456 = vst.msk [vmem:[#allocation4 + $0x58] sm:$0xf] %vm1330_vm4, %v1450_v40  ;;  %v3215_v40 = vld [vmem:[%s4203_s3 + $0x224] ss:$16 sps:$4 sm:$0xff]  }
 0x2f5   : > { %v1423_v41 = vpop.permute.xlu1 %1422  ;;  %v3758_v42 = vpop.permute.xlu0 %1382 }
 0x2f6   : > { %1432 = vst.msk [vmem:[#allocation4 + $0x40] sm:$0xf0] %vm1351_vm8, %v1423_v41  ;;  %1391 = vst.msk [vmem:[#allocation4 + $0x28] sm:$0xf0] %vm1351_vm8, %v3758_v42  ;;  %v1520_v43 = vld [vmem:[#allocation4 + $0x70] sm:$0xf] }
 0x2f7   : > { %v1529_v44 = vpack.c.bf16 %v1520_v43, %v1520_v43  ;;  %vm2548_vm8 = vcmask 678912  }
 0x2f9   : > { %v3763_v45 = vpop.permute.xlu1 %1362  ;;  %v1490_v46 = vpop.permute.xlu0 %1489  ;;  %v1546_v47 = vsel %vm590_vm3, %v1529_v44, 0  ;;  %v1508_v59 = vld [vmem:[#allocation4 + $0x10] sm:$0xff] }
 0x2fa   : > { %1371 = vst.msk [vmem:[#allocation4 + $0x28] sm:$0xf] %vm1330_vm4, %v3763_v45  ;;  %v1497_v48 = vsel %vm1495_vm5, %v1490_v46, %v1492_v30  ;;  %3018 = vmatpush3.bf16.msra.mxu1 %v1546_v47  ;;  %v1517_v52 = vld [vmem:[#allocation4 + $0x58] sm:$0xff]  ;;  %vm2574_vm4 = vcmask 670720  }
 0x2fb   : > { %1503 = vst [vmem:[#allocation4 + $0x68] sm:$0xf] %v1497_v48  ;;  %3019 = vmatprep.subr.bf16.mxu1 %v3329_v0  ;;  %v3201_v30 = vld [vmem:[%s4203_s3 + $0x260] ss:$16 sps:$4 sm:$0xff]  }
 0x2fd   : > { %v1488_v49 = vpop.permute.xlu1 %1487  ;;  %v1421_v50 = vpop.permute.xlu0 %1420  ;;  %v1514_v51 = vld [vmem:[#allocation4 + $0x40] sm:$0xff] }
 0x2fe   : > { %v1496_v53 = vsel %vm1495_vm5, %v1488_v49, %v1490_v46  ;;  %v1426_v54 = vsel %vm1424_vm13, %v1421_v50, %v1423_v41  ;;  %v1526_v55 = vpack.c.bf16 %v1517_v52, %v1514_v51  ;;  %v3213_v46 = vld [vmem:[%s4203_s3 + $0x220] ss:$16 sps:$4 sm:$0xff]   ;;  %vm2471_vm5 = vcmask 859136  }
 0x2ff   : > { %1502 = vst [vmem:[#allocation4 + $0x60] sm:$0xf] %v1496_v53  ;;  %1431 = vst [vmem:[#allocation4 + $0x38] sm:$0xf0] %v1426_v54  ;;  %v3183_v53 = vld [vmem:[%s4203_s3 + $0xe4] ss:$16 sps:$4 sm:$0xff]  }
 0x300   : > { %3020 = vmatpush3.bf16.msra.mxu1 %v1526_v55  ;;  %v3181_v55 = vld [vmem:[%s4203_s3 + $0xe0] ss:$16 sps:$4 sm:$0xff]  }
 0x301   : > { %v1400_v57 = vpop.permute.xlu1 %1399  ;;  %v1466_v58 = vpop.permute.xlu0 %1465  ;;  %3021 = vmatprep.subr.bf16.mxu1 %v3329_v0  ;;  %v1511_v60 = vld [vmem:[#allocation4 + $0x28] sm:$0xff] }
 0x302   : > { %v1405_v63 = vsel %vm1403_vm14, %v1400_v57, %v1402_v33  ;;  %v1473_v1 = vsel %vm1471_vm7, %v1466_v58, %v1468_v35  ;;  %v1523_v2 = vpack.c.bf16 %v1511_v60, %v1508_v59  ;;  %v1519_v3 = vld [vmem:[#allocation4 + $0x68] sm:$0xf]  ;;  %v3209_v33 = vld [vmem:[%s4203_s3 + $0x244] ss:$16 sps:$4 sm:$0xff]  }
 0x303   : > { %1410 = vst [vmem:[#allocation4 + $0x38] sm:$0xf] %v1405_v63  ;;  %1479 = vst [vmem:[#allocation4 + $0x50] sm:$0xf0] %v1473_v1  ;;  %v1528_v4 = vpack.c.bf16 %v1519_v3, %v1519_v3  ;;  %v3192_v59 = vld [vmem:[%s4203_s3 + $0xa0] ss:$16 sps:$4 sm:$0xff]  }
 0x304   : > { %3022 = vmatpush3.bf16.msra.mxu1 %v1523_v2  ;;  %v3200_v60 = vld [vmem:[%s4203_s3 + $0x84] ss:$16 sps:$4 sm:$0xff]   ;;  %v3204_v63 = vld [vmem:[%s4203_s3 + $0x60] ss:$16 sps:$4 sm:$0xff]  }
 0x305   : > { %v1442_v0 = vpop.permute.xlu1 %1441  ;;  %2892 = vmatprep.subr.msk.bf16.mxu0 %vm590_vm3, %v1528_v4  ;;  %v1419_v6 = vpop.permute.xlu0 %1418  ;;  %2987 = vmatprep.subr.msk.bf16.mxu1 %vm2179_vm15, %v2984_v61  ;;  %v3198_v61 = vld [vmem:[%s4203_s3 + $0x80] ss:$16 sps:$4 sm:$0xff]   ;;  %v3212_v1 = vld [vmem:[%s4203_s3 + $0x44] ss:$16 sps:$4 sm:$0xff]  }
 0x306   : > { %v1449_v9 = vsel %vm1447_vm12, %v1442_v0, %v3744_v31  ;;  %v1425_v10 = vsel %vm1424_vm13, %v1419_v6, %v1421_v50  ;;  %v1518_v11 = vld [vmem:[#allocation4 + $0x60] sm:$0xf]  ;;  %v3210_v2 = vld [vmem:[%s4203_s3 + $0x40] ss:$16 sps:$4 sm:$0xff]   ;;  %v3218_v3 = vld [vmem:[%s4203_s3 + $0x24] ss:$16 sps:$4 sm:$0xff]  }
 0x307   : > { %1455 = vst [vmem:[#allocation4 + $0x50] sm:$0xf] %v1449_v9  ;;  %1430 = vst [vmem:[#allocation4 + $0x30] sm:$0xf0] %v1425_v10  ;;  %3024 = vmatmul.mubr.msk.bf16.vlgmr.msra.gmra.mxu1 %vm586_vm9, %v3781_v5  ;;  %v1527_v12 = vpack.c.bf16 %v1518_v11, %v1518_v11  ;;  %v3221_v4 = vld [vmem:[%s4203_s3 + $0x204] ss:$16 sps:$4 sm:$0xff]  }
 0x308   : > { %2236 = vmatpush1.bf16.msra.mxu1 %v2181_v7  ;;  %2265 = vmatprep.mubr.bf16.mxu1 %v3339_v13  ;;  %v3222_v6 = vld [vmem:[%s4203_s3] ss:$16 sps:$4 sm:$0xff]   ;;  %v3224_v7 = vld [vmem:[%s4203_s3 + $0x4] ss:$16 sps:$4 sm:$0xff]  }
 0x309   : > { %v1398_v15 = vpop.permute.xlu1 %1397  ;;  %v1464_v16 = vpop.permute.xlu0 %1463  ;;  %v1540_v17 = vsel %vm590_vm3, %v1527_v12, 0  ;;  %2237 = vmatprep.subr.bf16.mxu1 %v3191_v8  ;;  %v3227_v8 = vld [vmem:[%s4203_s3 + $0xec] ss:$16 sps:$4 sm:$0xff]   ;;  %v3230_v9 = vld [vmem:[%s4203_s3 + $0x1e4] ss:$16 sps:$4 sm:$0xff]  }
 0x30a   : > { %v1404_v19 = vsel %vm1403_vm14, %v1398_v15, %v1400_v57  ;;  %v1472_v20 = vsel %vm1471_vm7, %v1464_v16, %v1466_v58  ;;  %1559 = vmatpush1.bf16.msra.mxu0 %v1540_v17  ;;  %v1513_v27 = vld [vmem:[#allocation4 + $0x38] sm:$0xff]  ;;  %vm2522_vm7 = vcmask 687104  }
 0x30b   : > { %1409 = vst [vmem:[#allocation4 + $0x30] sm:$0xf] %v1404_v19  ;;  %1478 = vst [vmem:[#allocation4 + $0x48] sm:$0xf0] %v1472_v20  ;;  %v3186_v57 = vld [vmem:[%s4203_s3 + $0xc0] ss:$16 sps:$4 sm:$0xff]  }
 0x30c   : > { %2238 = vmatpush1.bf16.msra.mxu1 %v3189_v14  ;;  %v3194_v58 = vld [vmem:[%s4203_s3 + $0xa4] ss:$16 sps:$4 sm:$0xff]   ;;  %v3228_v10 = vld [vmem:[%s4203_s3 + $0x1e0] ss:$16 sps:$4 sm:$0xff]  }
 0x30d   : > { %v1440_v22 = vpop.permute.xlu1 %1439  ;;  %v1361_v23 = vpop.permute.xlu0 %1360  ;;  %2239 = vmatprep.subr.bf16.mxu1 %v3197_v18  ;;  %v3236_v11 = vld [vmem:[%s4203_s3 + $0x1c4] ss:$16 sps:$4 sm:$0xff]   ;;  %v3234_v12 = vld [vmem:[%s4203_s3 + $0x1c0] ss:$16 sps:$4 sm:$0xff]  }
 0x30e   : > { %v1448_v25 = vsel %vm1447_vm12, %v1440_v22, %v1442_v0  ;;  %v1365_v26 = vsel %vm423_vm10, %v1361_v23, %v3763_v45  ;;  %v1516_v28 = vld [vmem:[#allocation4 + $0x50] sm:$0xff]  ;;  %v3219_v0 = vld [vmem:[%s4203_s3 + $0x200] ss:$16 sps:$4 sm:$0xff]   ;;  %v3242_v14 = vld [vmem:[%s4203_s3 + $0x1a4] ss:$16 sps:$4 sm:$0xff]   ;;  %vm2405_vm12 = vcmask 457732  }
 0x30f   : > { %1454 = vst [vmem:[#allocation4 + $0x48] sm:$0xf] %v1448_v25  ;;  %1370 = vst [vmem:[#allocation4 + $0x20] sm:$0xf] %v1365_v26  ;;  %v1525_v29 = vpack.c.bf16 %v1516_v28, %v1513_v27  ;;  %v3240_v15 = vld [vmem:[%s4203_s3 + $0x1a0] ss:$16 sps:$4 sm:$0xff]  }
 0x310   : > { %2240 = vmatpush1.bf16.msra.mxu1 %v3195_v21  ;;  %v3248_v16 = vld [vmem:[%s4203_s3 + $0x184] ss:$16 sps:$4 sm:$0xff]   ;;  %v3246_v17 = vld [vmem:[%s4203_s3 + $0x180] ss:$16 sps:$4 sm:$0xff]   ;;  %v1724_v26 = vld [vmem:[%s4203_s3 + $0x2c8] sm:$0xff] }
 0x311   : > { %v1341_v31 = vpop.permute.xlu1 %1340  ;;  %1560 = vmatprep.subr.bf16.mxu0 %v1525_v29  ;;  %v1339_v32 = vpop.permute.xlu0 %1338  ;;  %2241 = vmatprep.subr.bf16.mxu1 %v3203_v24  ;;  %v3254_v18 = vld [vmem:[%s4203_s3 + $0x164] ss:$16 sps:$4 sm:$0xff]   ;;  %v3252_v19 = vld [vmem:[%s4203_s3 + $0x160] ss:$16 sps:$4 sm:$0xff]   ;;  %v2986_v27 = vcombine.high %v1724_v26, %v1724_v26 }
 0x312   : > { %v1345_v34 = vsel %vm402_vm11, %v1341_v31, %v3751_v39  ;;  %v1344_v35 = vsel %vm402_vm11, %v1339_v32, %v1341_v31  ;;  %v1512_v43 = vld [vmem:[#allocation4 + $0x30] sm:$0xff]  ;;  %v3260_v20 = vld [vmem:[%s4203_s3 + $0x144] ss:$16 sps:$4 sm:$0xff]   ;;  %v3258_v21 = vld [vmem:[%s4203_s3 + $0x140] ss:$16 sps:$4 sm:$0xff]  }
 0x313   : > { %1350 = vst [vmem:[#allocation4 + $0x8] sm:$0xf0] %v1345_v34  ;;  %1349 = vst [vmem:[#allocation4] sm:$0xf0] %v1344_v35  ;;  %v3266_v22 = vld [vmem:[%s4203_s3 + $0x124] ss:$16 sps:$4 sm:$0xff]  }
 0x314   : > { %2242 = vmatpush1.bf16.msra.mxu1 %v3201_v30  ;;  %v3272_v24 = vld [vmem:[%s4203_s3 + $0x104] ss:$16 sps:$4 sm:$0xff]   ;;  %v3270_v25 = vld [vmem:[%s4203_s3 + $0x100] ss:$16 sps:$4 sm:$0xff]   ;;  %v3225_v34 = vld [vmem:[%s4203_s3 + $0xe8] ss:$16 sps:$4 sm:$0xff]  }
 0x315   : > { %v1381_v37 = vpop.permute.xlu1 %1380  ;;  %v1379_v38 = vpop.permute.xlu0 %1378  ;;  %2243 = vmatprep.subr.bf16.mxu1 %v3209_v33 }
 0x316   : > { %v1385_v41 = vsel %vm485_vm6, %v1381_v37, %v3758_v42  ;;  %v1384_v39 = vsel %vm485_vm6, %v1379_v38, %v1381_v37  ;;  %v1515_v44 = vld [vmem:[#allocation4 + $0x48] sm:$0xff]  ;;  %vm2175_vm6 = vcmask 850944   ;;  %v3231_v38 = vld [vmem:[%s4203_s3 + $0xc8] ss:$16 sps:$4 sm:$0xff]  }
 0x317   : > { %1390 = vst [vmem:[#allocation4 + $0x20] sm:$0xf0] %v1385_v41  ;;  %1389 = vst [vmem:[#allocation4 + $0x18] sm:$0xf0] %v1384_v39  ;;  %v1524_v45 = vpack.c.bf16 %v1515_v44, %v1512_v43  ;;  %v3237_v41 = vld [vmem:[%s4203_s3 + $0xa8] ss:$16 sps:$4 sm:$0xff]  }
 0x318   : > { %2244 = vmatpush1.bf16.msra.mxu1 %v3207_v36  ;;  %v3233_v36 = vld [vmem:[%s4203_s3 + $0xcc] ss:$16 sps:$4 sm:$0xff]   ;;  %v3243_v43 = vld [vmem:[%s4203_s3 + $0x88] ss:$16 sps:$4 sm:$0xff]  }
 0x319   : > { %v1359_v47 = vpop.permute.xlu1 %1358  ;;  %1561 = vmatpush1.bf16.msra.mxu0 %v1524_v45  ;;  %2245 = vmatprep.subr.bf16.mxu1 %v3215_v40  ;;  %v3239_v40 = vld [vmem:[%s4203_s3 + $0xac] ss:$16 sps:$4 sm:$0xff]   ;;  %v3249_v45 = vld [vmem:[%s4203_s3 + $0x68] ss:$16 sps:$4 sm:$0xff]  }
 0x31a   : > { %v1364_v48 = vsel %vm423_vm10, %v1359_v47, %v1361_v23  ;;  %v1507_v42 = vld [vmem:[#allocation4 + $0x8] sm:$0xff]  ;;  %v1506_v51 = vld [vmem:[#allocation4] sm:$0xff] }
 0x31b   : > { %1369 = vst [vmem:[#allocation4 + $0x18] sm:$0xf] %v1364_v48  ;;  %v3264_v23 = vld [vmem:[%s4203_s3 + $0x120] ss:$16 sps:$4 sm:$0xff]   ;;  %v3245_v39 = vld [vmem:[%s4203_s3 + $0x8c] ss:$16 sps:$4 sm:$0xff]  }
 0x31c   : > { %2246 = vmatpush1.bf16.msra.mxu1 %v3213_v46  ;;  %v3251_v44 = vld [vmem:[%s4203_s3 + $0x6c] ss:$16 sps:$4 sm:$0xff]   ;;  %v3255_v47 = vld [vmem:[%s4203_s3 + $0x48] ss:$16 sps:$4 sm:$0xff]  }
 0x31d   : > { %2247 = vmatprep.subr.bf16.mxu1 %v3221_v4  ;;  %v3257_v46 = vld [vmem:[%s4203_s3 + $0x4c] ss:$16 sps:$4 sm:$0xff]  }
 0x31e   : > { %v1510_v49 = vld [vmem:[#allocation4 + $0x20] sm:$0xff] }
 0x31f   : > { %v1522_v50 = vpack.c.bf16 %v1510_v49, %v1507_v42  ;;  %v3263_v48 = vld [vmem:[%s4203_s3 + $0x2c] ss:$16 sps:$4 sm:$0xff]   ;;  %v3261_v42 = vld [vmem:[%s4203_s3 + $0x28] ss:$16 sps:$4 sm:$0xff]  }
 0x320   : > { %2248 = vmatpush1.bf16.msra.mxu1 %v3219_v0  ;;  %v3269_v49 = vld [vmem:[%s4203_s3 + $0xc] ss:$16 sps:$4 sm:$0xff]   ;;  %v3281_v0 = vld [vmem:[%s4203_s3 + $0x1a8] ss:$16 sps:$4 sm:$0xff]  }
 0x321   : > { %1562 = vmatprep.subr.bf16.mxu0 %v1522_v50  ;;  %2274 = vmatprep.subr.bf16.mxu1 %v3227_v8  ;;  %v3267_v50 = vld [vmem:[%s4203_s3 + $0x8] ss:$16 sps:$4 sm:$0xff]   ;;  %v3283_v4 = vld [vmem:[%s4203_s3 + $0x1ac] ss:$16 sps:$4 sm:$0xff]  }
 0x322   : > { %v1509_v52 = vld [vmem:[#allocation4 + $0x18] sm:$0xff]  ;;  %v3292_v8 = vld [vmem:[%s4203_s3 + $0x28c] ss:$16 sps:$4 sm:$0xff]  }
 0x323   : > { %v1521_v54 = vpack.c.bf16 %v1509_v52, %v1506_v51  ;;  %v3275_v52 = vld [vmem:[%s4203_s3 + $0x1ec] ss:$16 sps:$4 sm:$0xff]  }
 0x325   : > { %1563 = vmatpush1.bf16.msra.mxu0 %v1521_v54 }
 0x326   : > { %2192 = vmatprep.subr.bf16.mxu0 %v3183_v53  ;;  %v1534_v28 = vpop.permute.xlu1 %1533 }
 0x328   : > { %2893 = vmatmul.mubr.msk.bf16.vlgmr.msra.gmra.mxu0 %vm586_vm9, %v3781_v5  ;;  %v3216_v5 = vld [vmem:[%s4203_s3 + $0x20] ss:$16 sps:$4 sm:$0xff]  }
 0x329   : > { %2193 = vmatpush1.bf16.msra.mxu0 %v3181_v55 }
 0x32a   : > { %2194 = vmatprep.subr.bf16.mxu0 %v3188_v56  ;;  %v3273_v56 = vld [vmem:[%s4203_s3 + $0x1e8] ss:$16 sps:$4 sm:$0xff]  }
 0x32d   : > { %2195 = vmatpush1.bf16.msra.mxu0 %v3186_v57 }
 0x32e   : > { %2196 = vmatprep.subr.bf16.mxu0 %v3194_v58 }
 0x331   : > { %2197 = vmatpush1.bf16.msra.mxu0 %v3192_v59  ;;  %v3278_v59 = vld [vmem:[%s4203_s3 + $0x1cc] ss:$16 sps:$4 sm:$0xff]  }
 0x332   : > { %2198 = vmatprep.subr.bf16.mxu0 %v3200_v60  ;;  %v2985_v60 = vcombine.low %v1724_v26, %v1724_v26  ;;  %v3311_v26 = vld [vmem:[%s4203_s3 + $0x108] ss:$16 sps:$4 sm:$0xff]  }
 0x335   : > { %2199 = vmatpush1.bf16.msra.mxu0 %v3198_v61 }
 0x336   : > { %2200 = vmatprep.subr.bf16.mxu0 %v3206_v62 }
 0x339   : > { %2201 = vmatpush1.bf16.msra.mxu0 %v3204_v63 }
 0x33a   : > { %2202 = vmatprep.subr.bf16.mxu0 %v3212_v1  ;;  %v3276_v1 = vld [vmem:[%s4203_s3 + $0x1c8] ss:$16 sps:$4 sm:$0xff]  }
 0x33d   : > { %2203 = vmatpush1.bf16.msra.mxu0 %v3210_v2 }
 0x33e   : > { %2204 = vmatprep.subr.bf16.mxu0 %v3218_v3  ;;  %v2187_v3 = vsel %vm2179_vm15, %v2985_v60, 0 }
 0x341   : > { %2205 = vmatpush1.bf16.msra.mxu0 %v3216_v5  ;;  %v3286_v5 = vld [vmem:[%s4203_s3 + $0x2ac] ss:$16 sps:$4 sm:$0xff]  }
 0x342   : > { %2206 = vmatprep.subr.bf16.mxu0 %v3224_v7  ;;  %v3289_v7 = vld [vmem:[%s4203_s3 + $0x18c] ss:$16 sps:$4 sm:$0xff]  }
 0x345   : > { %2207 = vmatpush1.bf16.msra.mxu0 %v3222_v6  ;;  %v3284_v6 = vld [vmem:[%s4203_s3 + $0x2a8] ss:$16 sps:$4 sm:$0xff]  }
 0x346   : > { %2208 = vmatprep.subr.bf16.mxu0 %v3230_v9  ;;  %v3287_v9 = vld [vmem:[%s4203_s3 + $0x188] ss:$16 sps:$4 sm:$0xff]  }
 0x349   : > { %2209 = vmatpush2.bf16.msra.mxu0 %v3228_v10  ;;  %v3290_v10 = vld [vmem:[%s4203_s3 + $0x288] ss:$16 sps:$4 sm:$0xff]  }
 0x34a   : > { %2210 = vmatprep.subr.bf16.mxu0 %v3236_v11  ;;  %v3295_v11 = vld [vmem:[%s4203_s3 + $0x16c] ss:$16 sps:$4 sm:$0xff]  }
 0x34d   : > { %2211 = vmatpush2.bf16.msra.mxu0 %v3234_v12  ;;  %v3298_v12 = vld [vmem:[%s4203_s3 + $0x26c] ss:$16 sps:$4 sm:$0xff]  }
 0x34e   : > { %2212 = vmatprep.subr.bf16.mxu0 %v3242_v14  ;;  %v3293_v14 = vld [vmem:[%s4203_s3 + $0x168] ss:$16 sps:$4 sm:$0xff]  }
 0x351   : > { %2213 = vmatpush2.bf16.msra.mxu0 %v3240_v15  ;;  %v3296_v15 = vld [vmem:[%s4203_s3 + $0x268] ss:$16 sps:$4 sm:$0xff]  }
 0x352   : > { %2214 = vmatprep.subr.bf16.mxu0 %v3248_v16  ;;  %v3301_v16 = vld [vmem:[%s4203_s3 + $0x14c] ss:$16 sps:$4 sm:$0xff]  }
 0x355   : > { %2215 = vmatpush2.bf16.msra.mxu0 %v3246_v17  ;;  %v3304_v17 = vld [vmem:[%s4203_s3 + $0x24c] ss:$16 sps:$4 sm:$0xff]  }
 0x356   : > { %2216 = vmatprep.subr.bf16.mxu0 %v3254_v18  ;;  %v3299_v18 = vld [vmem:[%s4203_s3 + $0x148] ss:$16 sps:$4 sm:$0xff]  }
 0x359   : > { %2217 = vmatpush2.bf16.msra.mxu0 %v3252_v19  ;;  %v3302_v19 = vld [vmem:[%s4203_s3 + $0x248] ss:$16 sps:$4 sm:$0xff]  }
 0x35a   : > { %2218 = vmatprep.subr.bf16.mxu0 %v3260_v20  ;;  %v3307_v20 = vld [vmem:[%s4203_s3 + $0x12c] ss:$16 sps:$4 sm:$0xff]  }
 0x35d   : > { %2219 = vmatpush2.bf16.msra.mxu0 %v3258_v21  ;;  %v3310_v21 = vld [vmem:[%s4203_s3 + $0x22c] ss:$16 sps:$4 sm:$0xff]  }
 0x35e   : > { %2220 = vmatprep.subr.bf16.mxu0 %v3266_v22  ;;  %v3305_v22 = vld [vmem:[%s4203_s3 + $0x128] ss:$16 sps:$4 sm:$0xff]  }
 0x361   : > { %2221 = vmatpush2.bf16.msra.mxu0 %v3264_v23  ;;  %v3308_v23 = vld [vmem:[%s4203_s3 + $0x228] ss:$16 sps:$4 sm:$0xff]  }
 0x362   : > { %2222 = vmatprep.subr.bf16.mxu0 %v3272_v24  ;;  %v3313_v24 = vld [vmem:[%s4203_s3 + $0x10c] ss:$16 sps:$4 sm:$0xff]  }
 0x365   : > { %2223 = vmatpush2.bf16.msra.mxu0 %v3270_v25  ;;  %v3316_v25 = vld [vmem:[%s4203_s3 + $0x20c] ss:$16 sps:$4 sm:$0xff]  }
 0x366   : > { %2989 = vmatprep.subr.msk.bf16.mxu0 %vm2179_vm15, %v2986_v27  ;;  %v3314_v27 = vld [vmem:[%s4203_s3 + $0x208] ss:$16 sps:$4 sm:$0xff]  }
 0x3c7   : > { %v1623_v29 = vpop.f32.mrf.mxu1 }
 0x3c8   : > { %v1624_v30 = vadd.f32 %v1623_v29, %v1534_v28 }
 0x3c9   : > { %v3025_v31 = vpop.f32.mrf.mxu1 }
 0x3ca   : > { %v1631_v32 = vmax.f32 %v1624_v30, 0.0 }
 0x3cb   : > { %v1626_v33 = vpop.f32.mrf.mxu1 }
 0x3cc   : > { %v3949_v35 = vpack.c.bf16 %v1631_v32, %v1631_v32 }
 0x3cd   : > { %v3026_v37 = vpop.f32.mrf.mxu1 }
 0x3ce   : > { %2988 = vmatmul.mubr.msk.bf16.vlgmr.msra.gmra.mxu1 %vm2175_vm6, %v3949_v35 }
 0x3cf   : > { %2275 = vmatpush1.bf16.msra.mxu1 %v3225_v34 }
 0x3d0   : > { %2276 = vmatprep.subr.bf16.mxu1 %v3233_v36 }
 0x3d3   : > { %2277 = vmatpush1.bf16.msra.mxu1 %v3231_v38 }
 0x3d4   : > { %2278 = vmatprep.subr.bf16.mxu1 %v3239_v40 }
 0x3d7   : > { %2279 = vmatpush1.bf16.msra.mxu1 %v3237_v41 }
 0x3d8   : > { %2280 = vmatprep.subr.bf16.mxu1 %v3245_v39 }
 0x3db   : > { %2281 = vmatpush1.bf16.msra.mxu1 %v3243_v43 }
 0x3dc   : > { %2282 = vmatprep.subr.bf16.mxu1 %v3251_v44 }
 0x3df   : > { %2283 = vmatpush1.bf16.msra.mxu1 %v3249_v45 }
 0x3e0   : > { %2284 = vmatprep.subr.bf16.mxu1 %v3257_v46 }
 0x3e3   : > { %2285 = vmatpush1.bf16.msra.mxu1 %v3255_v47 }
 0x3e4   : > { %2286 = vmatprep.subr.bf16.mxu1 %v3263_v48 }
 0x3e7   : > { %2287 = vmatpush1.bf16.msra.mxu1 %v3261_v42 }
 0x3e8   : > { %v1582_v51 = vpop.f32.mrf.mxu0  ;;  %2288 = vmatprep.subr.bf16.mxu1 %v3269_v49 }
 0x3e9   : > { %v1583_v53 = vadd.f32 %v1582_v51, %v1534_v28 }
 0x3ea   : > { %v1584_v54 = vpop.f32.mrf.mxu0 }
 0x3eb   : > { %v1585_v55 = vadd.f32 %v1584_v54, %v1534_v28  ;;  %2289 = vmatpush1.bf16.msra.mxu1 %v3267_v50  ;;  %v1629_v57 = vmax.f32 %v1583_v53, 0.0  ;;  %v2619_v53 = vld [vmem:[%s4209_s9] sm:$0xf] }
 0x3ec   : > { %v1586_v58 = vpop.f32.mrf.mxu0  ;;  %2290 = vmatprep.subr.bf16.mxu1 %v3275_v52 }
 0x3ed   : > { %v1630_v61 = vmax.f32 %v1585_v55, 0.0  ;;  %v1632_v2 = vpack.c.bf16 %v1629_v57, %v1629_v57 }
 0x3ee   : > { %v1587_v62 = vpop.f32.mrf.mxu0 }
 0x3ef   : > { %v1633_v63 = vpack.c.bf16 %v1630_v61, %v1630_v61  ;;  %2291 = vmatpush2.bf16.msra.mxu1 %v3273_v56 }
 0x3f0   : > { %2292 = vmatprep.subr.bf16.mxu1 %v3278_v59 }
 0x3f1   : > { %2224 = vmatprep.mubr.bf16.mxu0 %v1633_v63  ;;  %2306 = vmatprep.mubr.bf16.mxu1 %v1633_v63 }
 0x3f2   : > { %2225 = vmatmul.mubr.bf16.vlgmr.msra.gmra.mxu0 %v1632_v2 }
 0x3f3   : > { %2293 = vmatpush2.bf16.msra.mxu1 %v3276_v1  ;;  %2318 = vmatpush1.bf16.msra.mxu0 %v2187_v3 }
 0x3f4   : > { %2294 = vmatprep.subr.bf16.mxu1 %v3283_v4  ;;  %2319 = vmatprep.subr.bf16.mxu0 %v3286_v5 }
 0x3f5   : > { %2347 = vmatprep.mubr.bf16.mxu0 %v3339_v13 }
 0x3f7   : > { %2295 = vmatpush2.bf16.msra.mxu1 %v3281_v0  ;;  %2320 = vmatpush1.bf16.msra.mxu0 %v3284_v6 }
 0x3f8   : > { %2296 = vmatprep.subr.bf16.mxu1 %v3289_v7  ;;  %2321 = vmatprep.subr.bf16.mxu0 %v3292_v8 }
 0x3fb   : > { %2297 = vmatpush2.bf16.msra.mxu1 %v3287_v9  ;;  %2322 = vmatpush1.bf16.msra.mxu0 %v3290_v10 }
 0x3fc   : > { %2298 = vmatprep.subr.bf16.mxu1 %v3295_v11  ;;  %2323 = vmatprep.subr.bf16.mxu0 %v3298_v12 }
 0x3ff   : > { %2299 = vmatpush2.bf16.msra.mxu1 %v3293_v14  ;;  %2324 = vmatpush1.bf16.msra.mxu0 %v3296_v15 }
 0x400   : > { %2300 = vmatprep.subr.bf16.mxu1 %v3301_v16  ;;  %2325 = vmatprep.subr.bf16.mxu0 %v3304_v17 }
 0x403   : > { %2301 = vmatpush2.bf16.msra.mxu1 %v3299_v18  ;;  %2326 = vmatpush1.bf16.msra.mxu0 %v3302_v19 }
 0x404   : > { %2302 = vmatprep.subr.bf16.mxu1 %v3307_v20  ;;  %2327 = vmatprep.subr.bf16.mxu0 %v3310_v21 }
 0x407   : > { %2303 = vmatpush2.bf16.msra.mxu1 %v3305_v22  ;;  %2328 = vmatpush1.bf16.msra.mxu0 %v3308_v23 }
 0x408   : > { %2304 = vmatprep.subr.bf16.mxu1 %v3313_v24  ;;  %2329 = vmatprep.subr.bf16.mxu0 %v3316_v25 }
 0x40b   : > { %2305 = vmatpush2.bf16.msra.mxu1 %v3311_v26  ;;  %2330 = vmatpush1.bf16.msra.mxu0 %v3314_v27 }
 0x40e   : > { %2307 = vmatmul.mubr.bf16.vlgmr.msra.gmra.mxu1 %v1632_v2  ;;  %2990 = vmatmul.mubr.msk.bf16.vlgmr.msra.gmra.mxu0 %vm2175_vm6, %v3949_v35 }
 0x40f   : > { %2672 = vmatprep.mubr.bf16.mxu0 %v3339_v13  ;;  %2713 = vmatprep.mubr.bf16.mxu1 %v3339_v13 }
 0x48e   : > { %v2267_v28 = vpop.f32.mrf.mxu1 }
 0x490   : > { %v2269_v29 = vpop.f32.mrf.mxu1 }
 0x492   : > { %v2271_v30 = vpop.f32.mrf.mxu1 }
 0x494   : > { %v2272_v31 = vpop.f32.mrf.mxu1 }
 0x4b2   : > { %v2226_v32 = vpop.f32.mrf.mxu0 }
 0x4b3   : > { %v2268_v34 = vadd.f32 %v2267_v28, %v2226_v32 }
 0x4b4   : > { %v2228_v33 = vpop.f32.mrf.mxu0 }
 0x4b5   : > { %v2270_v36 = vadd.f32 %v2269_v29, %v2228_v33  ;;  %v3320_v50 = vcombine.low %v2268_v34, %v2268_v34 }
 0x4b6   : > { %v2230_v37 = vpop.f32.mrf.mxu0 }
 0x4b7   : > { %v2360_v38 = vcombine.low %v2268_v34, %v2270_v36  ;;  %v3319_v41 = vcombine.low %v2270_v36, %v2270_v36 }
 0x4b8   : > { %v2231_v40 = vpop.f32.mrf.mxu0 }
 0x4b9   : > { %2376 = vst [vmem:[#allocation6] sm:$0xf] %v2360_v38  ;;  %2566 = vrot.lane.b32.xlu0 %v2360_v38, %s3346_s19  ;;  %2377 = vst [vmem:[#allocation6 + $0x8] sm:$0xf] %v3319_v41  ;;  %2568 = vrot.lane.b32.xlu1 %v3319_v41, %s3346_s19 }
 0x4bd   : > { %2491 = vrot.lane.b32.xlu0 %v2360_v38, %s3347_s20 }
 0x4c1   : > { %2542 = vrot.lane.b32.xlu0 %v2360_v38, %s3348_s22 }
 0x4c5   : > { %2463 = vrot.lane.b32.xlu0 %v2360_v38, %s3349_s23 }
 0x4c9   : > { %2514 = vrot.lane.b32.xlu0 %v2360_v38, %s3350_s26 }
 0x4cd   : > { %2389 = vrot.lane.b32.xlu0 %v2360_v38, %s3335_s24 }
 0x4ce   : > { %v2308_v13 = vpop.f32.mrf.mxu1  ;;  %v2349_v35 = vpop.f32.mrf.mxu0 }
 0x4cf   : > { %v2350_v44 = vadd.f32 %v2349_v35, %v2308_v13 }
 0x4d0   : > { %v2310_v39 = vpop.f32.mrf.mxu1  ;;  %v2351_v43 = vpop.f32.mrf.mxu0 }
 0x4d1   : > { %v2352_v45 = vadd.f32 %v2351_v43, %v2310_v39  ;;  %2440 = vrot.lane.b32.xlu0 %v2360_v38, %s3345_s15 }
 0x4d2   : > { %v2312_v46 = vpop.f32.mrf.mxu1  ;;  %v2353_v47 = vpop.f32.mrf.mxu0 }
 0x4d3   : > { %v2361_v48 = vcombine.low %v2350_v44, %v2352_v45 }
 0x4d4   : > { %v2313_v42 = vpop.f32.mrf.mxu1  ;;  %v2354_v49 = vpop.f32.mrf.mxu0 }
 0x4d5   : > { %2367 = vst.msk [vmem:[#allocation5 + $0x8] sm:$0xff] %vm2366_vm1, %v2361_v48  ;;  %2465 = vrot.lane.b32.xlu0 %v3319_v41, %s3349_s23 }
 0x4d9   : > { %2516 = vrot.lane.b32.xlu0 %v3319_v41, %s3350_s26 }
 0x4dc   : > { %v2458_v51 = vld [vmem:[#allocation5 + $0x8] sm:$0xff] }
 0x4dd   : > { %v2462_v52 = vcombine.high %v2458_v51, %v2458_v51  ;;  %2467 = vrot.lane.b32.xlu1 %v2458_v51, %s3349_s23  ;;  %2489 = vrot.lane.b32.xlu0 %v3320_v50, %s3347_s20  ;;  %2378 = vst [vmem:[#allocation6 + $0x10] sm:$0xf] %v2458_v51  ;;  %v2488_v54 = vcombine.low %v2458_v51, %v2458_v51 }
 0x4df   : > { %2380 = vst.msk [vmem:[#allocation6 + $0x18] sm:$0xf] %vm2379_vm2, %v2462_v52 }
 0x4e1   : > { %2518 = vrot.lane.b32.xlu1 %v2458_v51, %s3350_s26  ;;  %2540 = vrot.lane.b32.xlu0 %v3320_v50, %s3348_s22 }
 0x4e5   : > { %2495 = vrot.lane.b32.xlu1 %v2458_v51, %s3347_s20  ;;  %2415 = vrot.lane.b32.xlu0 %v3319_v41, %s3337_s25 }
 0x4e9   : > { %2546 = vrot.lane.b32.xlu1 %v2458_v51, %s3348_s22  ;;  %2570 = vrot.lane.b32.xlu0 %v2458_v51, %s3346_s19 }
 0x4ed   : > { %2417 = vrot.lane.b32.xlu1 %v2458_v51, %s3337_s25  ;;  %2387 = vrot.lane.b32.xlu0 %v3320_v50, %s3335_s24 }
 0x4f1   : > { %2393 = vrot.lane.b32.xlu1 %v2458_v51, %s3335_s24  ;;  %2413 = vrot.lane.b32.xlu0 %v2360_v38, %s3337_s25 }
 0x4f5   : > { %2572 = vrot.lane.b32.xlu1 %v2462_v52, %s3346_s19  ;;  %2438 = vrot.lane.b32.xlu0 %v3320_v50, %s3345_s15 }
 0x4f9   : > { %2493 = vrot.lane.b32.xlu1 %v2488_v54, %s3347_s20  ;;  %2622 = vperm.xlu0 %3058, %v2619_v53  }
 0x4fd   : > { %2544 = vrot.lane.b32.xlu1 %v2488_v54, %s3348_s22 }
 0x501   : > { %2469 = vrot.lane.b32.xlu1 %v2462_v52, %s3349_s23 }
 0x505   : > { %2520 = vrot.lane.b32.xlu1 %v2462_v52, %s3350_s26 }
 0x509   : > { %2391 = vrot.lane.b32.xlu1 %v2488_v54, %s3335_s24 }
 0x50d   : > { %2442 = vrot.lane.b32.xlu1 %v2488_v54, %s3345_s15 }
 0x511   : > { %2419 = vrot.lane.b32.xlu1 %v2462_v52, %s3337_s25 }
 0x515   : > { %2444 = vrot.lane.b32.xlu1 %v2458_v51, %s3345_s15  ;;  %s2998_s15 = sshll.u32 %s4212_s14, 4 }
 0x516   : > { %s379_s11 = scalar_lea.vmem %s4210_s10, %s2998_s15 }
 0x52b   : > { %v2567_v55 = vpop.permute.xlu0 %2566  ;;  %v2569_v56 = vpop.permute.xlu1 %2568 }
 0x52c   : > { %v2575_v57 = vsel %vm2574_vm4, %v2567_v55, %v2569_v56 }
 0x52d   : > { %2582 = vst [vmem:[#allocation6 + $0x80] sm:$0xf] %v2575_v57 }
 0x52f   : > { %v4123_v58 = vpop.permute.xlu0 %2491 }
 0x533   : > { %v4125_v59 = vpop.permute.xlu0 %2542 }
 0x534   : > { %v2603_v22 = vld [vmem:[#allocation6 + $0x80] sm:$0xf] }
 0x535   : > { %v2615_v25 = vpack.c.bf16 %v2603_v22, %v2603_v22 }
 0x537   : > { %v2464_v60 = vpop.permute.xlu0 %2463  ;;  %v2629_v31 = vsel %vm590_vm3, %v2615_v25, 0 }
 0x53b   : > { %v2515_v61 = vpop.permute.xlu0 %2514 }
 0x53f   : > { %v4127_v62 = vpop.permute.xlu0 %2389 }
 0x543   : > { %v4129_v63 = vpop.permute.xlu0 %2440 }
 0x547   : > { %v2466_v1 = vpop.permute.xlu0 %2465 }
 0x548   : > { %v2472_v2 = vsel %vm2471_vm5, %v2464_v60, %v2466_v1 }
 0x549   : > { %2479 = vst [vmem:[#allocation6 + $0x40] sm:$0xf] %v2472_v2 }
 0x54b   : > { %v2517_v3 = vpop.permute.xlu0 %2516 }
 0x54c   : > { %v2523_v4 = vsel %vm2522_vm7, %v2515_v61, %v2517_v3 }
 0x54d   : > { %2530 = vst [vmem:[#allocation6 + $0x60] sm:$0xf] %v2523_v4 }
 0x54f   : > { %v4133_v5 = vpop.permute.xlu1 %2467  ;;  %v2490_v0 = vpop.permute.xlu0 %2489 }
 0x550   : > { %v2473_v6 = vsel %vm2471_vm5, %v2466_v1, %v4133_v5  ;;  %v2497_v7 = vsel %vm2175_vm6, %v2490_v0, %v4123_v58 }
 0x551   : > { %2480 = vst [vmem:[#allocation6 + $0x48] sm:$0xf] %v2473_v6  ;;  %2504 = vst [vmem:[#allocation6 + $0x40] sm:$0xf0] %v2497_v7 }
 0x553   : > { %v4139_v8 = vpop.permute.xlu1 %2518  ;;  %v2541_v9 = vpop.permute.xlu0 %2540 }
 0x554   : > { %v2524_v10 = vsel %vm2522_vm7, %v2517_v3, %v4139_v8  ;;  %v2549_v11 = vsel %vm2548_vm8, %v2541_v9, %v4125_v59 }
 0x555   : > { %2531 = vst [vmem:[#allocation6 + $0x68] sm:$0xf] %v2524_v10  ;;  %2556 = vst [vmem:[#allocation6 + $0x60] sm:$0xf0] %v2549_v11  ;;  %v2586_v11 = vld [vmem:[%s4208_s8] sm:$0x3] }
 0x557   : > { %v2496_v12 = vpop.permute.xlu1 %2495  ;;  %v2416_v14 = vpop.permute.xlu0 %2415 }
 0x558   : > { %2507 = vst.msk [vmem:[#allocation6 + $0x58] sm:$0xf0] %vm2405_vm12, %v2496_v12  ;;  %v2595_v52 = vld [vmem:[#allocation6 + $0x40] sm:$0xff] }
 0x55b   : > { %v2547_v15 = vpop.permute.xlu1 %2546  ;;  %v2571_v16 = vpop.permute.xlu0 %2570 }
 0x55c   : > { %2559 = vst.msk [vmem:[#allocation6 + $0x78] sm:$0xf0] %vm2405_vm12, %v2547_v15  ;;  %v2576_v17 = vsel %vm2574_vm4, %v2569_v56, %v2571_v16  ;;  %v2599_v48 = vld [vmem:[#allocation6 + $0x60] sm:$0xff] }
 0x55d   : > { %2583 = vst [vmem:[#allocation6 + $0x88] sm:$0xf] %v2576_v17  ;;  %v2611_v53 = vpack.c.bf16 %v2599_v48, %v2595_v52 }
 0x55f   : > { %v4148_v18 = vpop.permute.xlu1 %2417  ;;  %v2388_v19 = vpop.permute.xlu0 %2387 }
 0x560   : > { %v2422_v20 = vsel %vm423_vm10, %v2416_v14, %v4148_v18  ;;  %v2395_v21 = vsel %vm402_vm11, %v2388_v19, %v4127_v62 }
 0x561   : > { %2429 = vst [vmem:[#allocation6 + $0x28] sm:$0xf] %v2422_v20  ;;  %2402 = vst [vmem:[#allocation6] sm:$0xf0] %v2395_v21 }
 0x563   : > { %v2394_v23 = vpop.permute.xlu1 %2393  ;;  %v2414_v24 = vpop.permute.xlu0 %2413 }
 0x564   : > { %2406 = vst.msk [vmem:[#allocation6 + $0x18] sm:$0xf0] %vm2405_vm12, %v2394_v23  ;;  %v2421_v26 = vsel %vm423_vm10, %v2414_v24, %v2416_v14  ;;  %v2604_v27 = vld [vmem:[#allocation6 + $0x88] sm:$0xf] }
 0x565   : > { %2428 = vst [vmem:[#allocation6 + $0x20] sm:$0xf] %v2421_v26  ;;  %v2616_v28 = vpack.c.bf16 %v2604_v27, %v2604_v27 }
 0x567   : > { %v2573_v29 = vpop.permute.xlu1 %2572  ;;  %2991 = vmatprep.subr.msk.bf16.mxu0 %vm590_vm3, %v2616_v28  ;;  %v2439_v30 = vpop.permute.xlu0 %2438 }
 0x568   : > { %v2577_v32 = vsel %vm2574_vm4, %v2571_v16, %v2573_v29  ;;  %2585 = vst.msk [vmem:[#allocation6 + $0x98] sm:$0xf] %vm2379_vm2, %v2573_v29  ;;  %v2446_v33 = vsel %vm1424_vm13, %v2439_v30, %v4129_v63  ;;  %2651 = vmatpush1.bf16.msra.mxu0 %v2629_v31  ;;  %v2587_v9 = vld [vmem:[#allocation6] sm:$0xff] }
 0x569   : > { %2584 = vst [vmem:[#allocation6 + $0x90] sm:$0xf] %v2577_v32  ;;  %2453 = vst [vmem:[#allocation6 + $0x20] sm:$0xf0] %v2446_v33 }
 0x56b   : > { %v2494_v34 = vpop.permute.xlu1 %2493 }
 0x56c   : > { %v2498_v36 = vsel %vm2175_vm6, %v4123_v58, %v2494_v34  ;;  %v2499_v37 = vsel %vm2175_vm6, %v2494_v34, %v2496_v12  ;;  %v2590_v12 = vld [vmem:[#allocation6 + $0x18] sm:$0xff] }
 0x56d   : > { %2505 = vst [vmem:[#allocation6 + $0x48] sm:$0xf0] %v2498_v36  ;;  %2506 = vst [vmem:[#allocation6 + $0x50] sm:$0xf0] %v2499_v37 }
 0x56f   : > { %v2545_v38 = vpop.permute.xlu1 %2544  ;;  %v2606_v40 = vld [vmem:[#allocation6 + $0x98] sm:$0xf] }
 0x570   : > { %v2550_v41 = vsel %vm2548_vm8, %v4125_v59, %v2545_v38  ;;  %v2551_v13 = vsel %vm2548_vm8, %v2545_v38, %v2547_v15  ;;  %v2618_v35 = vpack.c.bf16 %v2606_v40, %v2606_v40  ;;  %v2605_v39 = vld [vmem:[#allocation6 + $0x90] sm:$0xf]  ;;  %v2591_v0 = vld [vmem:[#allocation6 + $0x20] sm:$0xff] }
 0x571   : > { %2557 = vst [vmem:[#allocation6 + $0x68] sm:$0xf0] %v2550_v41  ;;  %2558 = vst [vmem:[#allocation6 + $0x70] sm:$0xf0] %v2551_v13  ;;  %v2617_v43 = vpack.c.bf16 %v2605_v39, %v2605_v39  ;;  %v2607_v10 = vpack.c.bf16 %v2591_v0, %v2587_v9 }
 0x572   : > { %2993 = vmatprep.subr.msk.bf16.mxu1 %vm590_vm3, %v2618_v35 }
 0x573   : > { %v2470_v44 = vpop.permute.xlu1 %2469  ;;  %v2635_v45 = vsel %vm590_vm3, %v2617_v43, 0  ;;  %vm2735_vm3 = vmor %vm2405_vm12, %vm2179_vm15 }
 0x574   : > { %v2474_v46 = vsel %vm2471_vm5, %v4133_v5, %v2470_v44  ;;  %2482 = vst.msk [vmem:[#allocation6 + $0x58] sm:$0xf] %vm2379_vm2, %v2470_v44  ;;  %2692 = vmatpush1.bf16.msra.mxu1 %v2635_v45  ;;  %v2596_v49 = vld [vmem:[#allocation6 + $0x48] sm:$0xff]  ;;  %v2623_v19 = vpop.permute.xlu0 %2622 }
 0x575   : > { %2481 = vst [vmem:[#allocation6 + $0x50] sm:$0xf] %v2474_v46 }
 0x577   : > { %v2521_v47 = vpop.permute.xlu1 %2520 }
 0x578   : > { %v2525_v42 = vsel %vm2522_vm7, %v4139_v8, %v2521_v47  ;;  %2533 = vst.msk [vmem:[#allocation6 + $0x78] sm:$0xf] %vm2379_vm2, %v2521_v47  ;;  %v2600_v50 = vld [vmem:[#allocation6 + $0x68] sm:$0xff] }
 0x579   : > { %2532 = vst [vmem:[#allocation6 + $0x70] sm:$0xf] %v2525_v42  ;;  %v2612_v51 = vpack.c.bf16 %v2600_v50, %v2596_v49 }
 0x57b   : > { %v2392_v54 = vpop.permute.xlu1 %2391  ;;  %2652 = vmatprep.subr.bf16.mxu0 %v2612_v51  ;;  %v2598_v58 = vld [vmem:[#allocation6 + $0x58] sm:$0xff] }
 0x57c   : > { %v2396_v55 = vsel %vm402_vm11, %v4127_v62, %v2392_v54  ;;  %v2397_v56 = vsel %vm402_vm11, %v2392_v54, %v2394_v23  ;;  %2653 = vmatpush1.bf16.msra.mxu0 %v2611_v53  ;;  %v2597_v1 = vld [vmem:[#allocation6 + $0x50] sm:$0xff] }
 0x57d   : > { %2403 = vst [vmem:[#allocation6 + $0x8] sm:$0xf0] %v2396_v55  ;;  %2404 = vst [vmem:[#allocation6 + $0x10] sm:$0xf0] %v2397_v56 }
 0x57f   : > { %v2443_v57 = vpop.permute.xlu1 %2442  ;;  %v2602_v59 = vld [vmem:[#allocation6 + $0x78] sm:$0xff] }
 0x580   : > { %v2447_v60 = vsel %vm1424_vm13, %v4129_v63, %v2443_v57  ;;  %v2614_v61 = vpack.c.bf16 %v2602_v59, %v2598_v58  ;;  %v2601_v2 = vld [vmem:[#allocation6 + $0x70] sm:$0xff] }
 0x581   : > { %2454 = vst [vmem:[#allocation6 + $0x28] sm:$0xf0] %v2447_v60  ;;  %v2613_v3 = vpack.c.bf16 %v2601_v2, %v2597_v1 }
 0x582   : > { %2693 = vmatprep.subr.bf16.mxu1 %v2614_v61 }
 0x583   : > { %v2420_v4 = vpop.permute.xlu1 %2419  ;;  %2694 = vmatpush1.bf16.msra.mxu1 %v2613_v3 }
 0x584   : > { %v2423_v62 = vsel %vm423_vm10, %v4148_v18, %v2420_v4  ;;  %2431 = vst.msk [vmem:[#allocation6 + $0x38] sm:$0xf] %vm2379_vm2, %v2420_v4  ;;  %v2588_v63 = vld [vmem:[#allocation6 + $0x8] sm:$0xff]  ;;  %v2589_v16 = vld [vmem:[#allocation6 + $0x10] sm:$0xff] }
 0x585   : > { %2430 = vst [vmem:[#allocation6 + $0x30] sm:$0xf] %v2423_v62 }
 0x587   : > { %v2445_v5 = vpop.permute.xlu1 %2444 }
 0x588   : > { %v2448_v6 = vsel %vm1424_vm13, %v2443_v57, %v2445_v5  ;;  %2456 = vst.msk [vmem:[#allocation6 + $0x38] sm:$0xf0] %vm2405_vm12, %v2445_v5  ;;  %v2592_v7 = vld [vmem:[#allocation6 + $0x28] sm:$0xff] }
 0x589   : > { %2455 = vst [vmem:[#allocation6 + $0x30] sm:$0xf0] %v2448_v6  ;;  %v2608_v8 = vpack.c.bf16 %v2592_v7, %v2588_v63 }
 0x58b   : > { %2654 = vmatprep.subr.bf16.mxu0 %v2608_v8 }
 0x58c   : > { %2655 = vmatpush1.bf16.msra.mxu0 %v2607_v10 }
 0x58f   : > { %2992 = vmatmul.mubr.msk.bf16.vlgmr.msra.gmra.mxu0 %vm586_vm9, %v2586_v11  ;;  %v2594_v14 = vld [vmem:[#allocation6 + $0x38] sm:$0xff] }
 0x590   : > { %v2610_v15 = vpack.c.bf16 %v2594_v14, %v2590_v12  ;;  %v2593_v17 = vld [vmem:[#allocation6 + $0x30] sm:$0xff] }
 0x591   : > { %v2609_v18 = vpack.c.bf16 %v2593_v17, %v2589_v16 }
 0x592   : > { %2695 = vmatprep.subr.bf16.mxu1 %v2610_v15 }
 0x593   : > { %2696 = vmatpush1.bf16.msra.mxu1 %v2609_v18 }
 0x596   : > { %2994 = vmatmul.mubr.msk.bf16.vlgmr.msra.gmra.mxu1 %vm586_vm9, %v2586_v11 }
 0x64f   : > { %v2674_v20 = vpop.f32.mrf.mxu0 }
 0x650   : > { %v2675_v21 = vadd.f32 %v2674_v20, %v2623_v19 }
 0x651   : > { %v2676_v22 = vpop.f32.mrf.mxu0 }
 0x652   : > { %v2677_v23 = vadd.f32 %v2676_v22, %v2623_v19  ;;  %v2722_v25 = vmax.f32 %v2675_v21, 0.0 }
 0x653   : > { %v2678_v24 = vpop.f32.mrf.mxu0 }
 0x654   : > { %v2723_v26 = vmax.f32 %v2677_v23, 0.0 }
 0x655   : > { %v2679_v27 = vpop.f32.mrf.mxu0 }
 0x656   : > { %v2730_v28 = vcombine.low %v2722_v25, %v2723_v26  ;;  %v2715_v29 = vpop.f32.mrf.mxu1 }
 0x657   : > { %v2716_v30 = vadd.f32 %v2715_v29, %v2623_v19 }
 0x658   : > { %2734 = vst [vmem:[%s379_s11] sm:$0xff] %v2730_v28  ;;  %v2717_v31 = vpop.f32.mrf.mxu1 }
 0x659   : > { %v2718_v32 = vadd.f32 %v2717_v31, %v2623_v19  ;;  %v2724_v34 = vmax.f32 %v2716_v30, 0.0 }
 0x65a   : > { %v2719_v33 = vpop.f32.mrf.mxu1 }
 0x65b   : > { %v2725_v36 = vmax.f32 %v2718_v32, 0.0 }
 0x65c   : > { %v2720_v37 = vpop.f32.mrf.mxu1 }
 0x65d   : > { %v2731_v38 = vcombine.low %v2724_v34, %v2725_v36 }
 0x65f   : > { %2736 = vst.msk [vmem:[%s379_s11 + $0x8] sm:$0xff] %vm2735_vm3, %v2731_v38 }
 0x660 PF: > { %s20_s13 = sadd.s32 1, %s3327_s13  }
 0x661   : > { %p17_p4 = scmp.ge.s32.totalorder %s20_s13, 4  }
 0x663   :  { %19 = sbr.rel (!%p17_p4) target bundleno = 1 (0x1), region = 93 }

</bundles_post_ra>
